<compile_context>
chip_gen: v7x
topology: tpu7x:2x2x1
jax: 0.10.0
libtpu: 0.0.40
codegen_flags: <defaults>
</compile_context>

<pallas_src>
import jax
import jax.numpy as jnp
from jax.experimental import pallas as pl
from jax.experimental.pallas import tpu as pltpu

IMG = 32      # input spatial size (H = W = 32)
W_PAD = 32    # W width carried through the whole kernel (multiple of 8)


# ----------------------------- kernel helpers ---------------------------------
def _maxpool_2x2_strided(y4, stride):
    """MaxPool2d(2,2) on (H, W_PAD, C) f32 whose live columns sit at multiples
    of `stride`.  H is compacted via free leading-dim reshapes; W is NOT
    compacted -- the result's live columns sit at multiples of 2*stride."""
    H, _, C = y4.shape
    Hp = (H - 2) // 2
    th = jnp.max(y4[:2 * Hp].reshape(Hp, 2, W_PAD, C), axis=1)
    # pair column k*stride with (k+1)*stride via a sublane roll (XLU slot).
    return jnp.maximum(th, pltpu.roll(th, W_PAD - stride, axis=1))


def _conv_block_strided(x, w_ref, scale, shift, stride):
    """Conv2d(k=3, valid) + folded BN + ReLU + MaxPool2d(2,2) on an
    (H, W_PAD, Cin) f32 activation whose live columns sit at multiples of
    `stride`.  The 9 taps are gathered with sublane rolls (W) and leading-dim
    concats (H), then contracted in ONE fused-K MXU matmul (K = 9*Cin)."""
    H, _, Cin = x.shape
    Cout = w_ref.shape[1]

    # W-shifted variants (dx = 0,1,2): within-slab sublane rolls.
    xw = [x if dx == 0 else pltpu.roll(x, W_PAD - dx * stride, axis=1)
          for dx in range(3)]

    cols = []
    for dy in range(3):
        for dx in range(3):
            p = xw[dx]
            if dy:  # H shift: cheap leading-dim rotation (slab-level concat).
                p = jnp.concatenate([p[dy:], p[:dy]], axis=0)
            cols.append(p.astype(jnp.bfloat16))
    xcol = jnp.concatenate(cols, axis=2)              # (H, W_PAD, 9*Cin) bf16
    xcol = xcol.reshape(H * W_PAD, 9 * Cin)           # free: W_PAD % 8 == 0

    y = jnp.dot(xcol, w_ref[...], preferred_element_type=jnp.float32)
    y = jnp.maximum(y * scale + shift, 0.0)           # folded BN + ReLU (f32)
    return _maxpool_2x2_strided(y.reshape(H, W_PAD, Cout), stride)


# ----------------------------- fused kernel body ------------------------------
def _cnn_kernel(xc1_ref,
                w1_ref, s1_ref, t1_ref,
                w2_ref, s2_ref, t2_ref,
                w3_ref, s3_ref, t3_ref,
                fw1_ref, fb1_ref, fw2_ref, fb2_ref, fw3_ref, fb3_ref,
                o_ref):
    # ---- block 1: im2col was hoisted to the wrapper -> one MXU matmul.
    y = jnp.dot(xc1_ref[...], w1_ref[...], preferred_element_type=jnp.float32)
    y = jnp.maximum(y * s1_ref[...] + t1_ref[...], 0.0)
    x1 = _maxpool_2x2_strided(y.reshape(IMG, W_PAD, 32), stride=1)  # (15,32,32), stride 2

    # ---- blocks 2 & 3: roll-based im2col + single fused-K matmul each.
    x2 = _conv_block_strided(x1, w2_ref, s2_ref[...], t2_ref[...], stride=2)  # (6,32,64), stride 4
    x3 = _conv_block_strided(x2, w3_ref, s3_ref[...], t3_ref[...], stride=4)  # (2,32,64), stride 8

    # ---- AdaptiveAvgPool2d(1): surviving 2x2 grid lives at rows {0,1}, cols {0,8}.
    p = x3[:, 0:1, :] + x3[:, 8:9, :]                 # (2, 1, 64)
    g = (p[0] + p[1]) * 0.25                          # (1, 64)

    # ---- MLP head (bf16 MXU inputs, f32 accumulation).
    h = jnp.dot(g.astype(jnp.bfloat16), fw1_ref[...],
                preferred_element_type=jnp.float32) + fb1_ref[...]
    h = jnp.maximum(h, 0.0)
    h = jnp.dot(h.astype(jnp.bfloat16), fw2_ref[...],
                preferred_element_type=jnp.float32) + fb2_ref[...]
    h = jnp.maximum(h, 0.0)
    o_ref[...] = (jnp.dot(h.astype(jnp.bfloat16), fw3_ref[...],
                          preferred_element_type=jnp.float32) + fb3_ref[...])


# ------------------------------- full forward --------------------------------
def cnn_forward(x_nchw, convs, fcs):
    """x_nchw: (N, 3, 32, 32) like the PyTorch module; returns (N, 2) f32."""
    N = x_nchw.shape[0]
    x = jnp.transpose(x_nchw, (0, 2, 3, 1)).astype(jnp.float32)     # NHWC

    # ---- block-1 im2col (space-to-depth) done once in XLA: -> (N, 1024, 32)
    taps = []
    for dy in range(3):
        for dx in range(3):
            tap = x[:, dy:, dx:, :]
            taps.append(jnp.pad(tap, ((0, 0), (0, dy), (0, dx), (0, 0))))
    xcol1 = jnp.concatenate(taps, axis=-1)                           # (N,32,32,27)
    xcol1 = jnp.pad(xcol1, ((0, 0), (0, 0), (0, 0), (0, 5)))         # K: 27 -> 32
    xcol1 = xcol1.reshape(N, IMG * W_PAD, 32).astype(jnp.bfloat16)

    # ---- pack conv weights (fused-K layout, channel dims padded to 32/64).
    (w1, s1, t1), (w2, s2, t2), (w3, s3, t3) = convs
    w1f = jnp.pad(w1.reshape(27, 32), ((0, 5), (0, 0))).astype(jnp.bfloat16)
    w2f = jnp.pad(w2, ((0, 0), (0, 0), (0, 0), (0, 16))
                  ).reshape(9 * 32, 64).astype(jnp.bfloat16)         # Cout 48->64
    s2p = jnp.pad(s2, ((0, 0), (0, 16)), constant_values=1.0)
    t2p = jnp.pad(t2, ((0, 0), (0, 16)))
    w3f = jnp.pad(w3, ((0, 0), (0, 0), (0, 16), (0, 0))
                  ).reshape(9 * 64, 64).astype(jnp.bfloat16)         # Cin 48->64

    (fw1, fb1), (fw2, fb2), (fw3, fb3) = fcs
    params = [w1f, s1, t1, w2f, s2p, t2p, w3f, s3, t3,
              fw1.astype(jnp.bfloat16), fb1,
              fw2.astype(jnp.bfloat16), fb2,
              fw3.astype(jnp.bfloat16), fb3]

    in_specs = ([pl.BlockSpec((None, IMG * W_PAD, 32), lambda n: (n, 0, 0))] +
                [pl.BlockSpec(p.shape, lambda n: (0, 0)) for p in params])

    out = pl.pallas_call(
        _cnn_kernel,
        out_shape=jax.ShapeDtypeStruct((N, 1, 2), jnp.float32),
        grid=(N,),
        in_specs=in_specs,
        out_specs=pl.BlockSpec((None, 1, 2), lambda n: (n, 0, 0)),
        compiler_params=pltpu.CompilerParams(
            dimension_semantics=("parallel",),
            vmem_limit_bytes=32 * 1024 * 1024),
    )(xcol1, *params)
    return out.reshape(N, 2)


# ------------------------------ parameter init --------------------------------
def init_params(key):
    keys = iter(jax.random.split(key, 32))

    def conv_block_params(cin, cout):
        w = jax.random.normal(next(keys), (3, 3, cin, cout), jnp.float32) \
            / jnp.sqrt(9.0 * cin)
        b = 0.05 * jax.random.normal(next(keys), (cout,), jnp.float32)
        gamma = 1.0 + 0.1 * jax.random.normal(next(keys), (cout,), jnp.float32)
        beta = 0.1 * jax.random.normal(next(keys), (cout,), jnp.float32)
        rmean = 0.1 * jax.random.normal(next(keys), (cout,), jnp.float32)
        rvar = jax.random.uniform(next(keys), (cout,), jnp.float32,
                                  minval=0.5, maxval=1.5)
        inv = gamma / jnp.sqrt(rvar + 1e-5)
        scale = inv.reshape(1, cout)
        shift = (beta + (b - rmean) * inv).reshape(1, cout)
        return w, scale, shift

    def linear_params(cin, cout):
        w = jax.random.normal(next(keys), (cin, cout), jnp.float32) \
            / jnp.sqrt(float(cin))
        b = 0.05 * jax.random.normal(next(keys), (1, cout), jnp.float32)
        return w, b

    convs = [conv_block_params(3, 32),
             conv_block_params(32, 48),
             conv_block_params(48, 64)]
    fcs = [linear_params(64, 32),
           linear_params(32, 16),
           linear_params(16, 2)]
    return convs, fcs


# ------------------------------ f32 reference ---------------------------------
def reference_forward(x_nchw, convs, fcs):
    """Pure-JAX f32 reference of the same forward pass (for a sanity check)."""
    x = jnp.transpose(x_nchw, (0, 2, 3, 1)).astype(jnp.float32)
    for (w, scale, shift) in convs:
        y = jax.lax.conv_general_dilated(
            x, w, window_strides=(1, 1), padding="VALID",
            dimension_numbers=("NHWC", "HWIO", "NHWC"))
        y = jnp.maximum(y * scale.reshape(1, 1, 1, -1)
                        + shift.reshape(1, 1, 1, -1), 0.0)
        n, ho, wo, c = y.shape
        hp, wp = ho // 2, wo // 2
        x = y[:, :2 * hp, :2 * wp, :].reshape(n, hp, 2, wp, 2, c).max(axis=(2, 4))
    h = x.mean(axis=(1, 2))
    for i, (w, b) in enumerate(fcs):
        h = h @ w + b
        if i + 1 < len(fcs):
            h = jnp.maximum(h, 0.0)
    return h


if __name__ == "__main__":
    root = jax.random.PRNGKey(0)
    pkey, xkey = jax.random.split(root)
    convs, fcs = init_params(pkey)

    # NCHW input like the PyTorch module: 3 channels, 32x32 so the three
    # conv_blocks give spatial sizes 32->15->6->2 before the global pool.
    x = jax.random.normal(xkey, (2, 3, IMG, IMG), jnp.float32)

    out = jax.block_until_ready(jax.jit(cnn_forward)(x, convs, fcs))
    ref = jax.block_until_ready(reference_forward(x, convs, fcs))

    assert out.shape == (2, 2)
    assert bool(jnp.all(jnp.isfinite(out)))
    # bf16 MXU inputs vs f32 reference -> loose tolerance; indexing bugs would
    # be O(1) off and still caught.
    assert bool(jnp.allclose(out, ref, rtol=0.2, atol=0.1)), (out, ref)
    print("KERNEL_OK")
</pallas_src>

<mosaic_0001>
module attributes {stable_mosaic.version = 11 : i64} {
  func.func @_cnn_kernel(%arg0: i32, %arg1: memref<1x1024x32xbf16, #tpu.memory_space<vmem>>, %arg2: memref<32x32xbf16, #tpu.memory_space<vmem>>, %arg3: memref<1x32xf32, #tpu.memory_space<vmem>>, %arg4: memref<1x32xf32, #tpu.memory_space<vmem>>, %arg5: memref<288x64xbf16, #tpu.memory_space<vmem>>, %arg6: memref<1x64xf32, #tpu.memory_space<vmem>>, %arg7: memref<1x64xf32, #tpu.memory_space<vmem>>, %arg8: memref<576x64xbf16, #tpu.memory_space<vmem>>, %arg9: memref<1x64xf32, #tpu.memory_space<vmem>>, %arg10: memref<1x64xf32, #tpu.memory_space<vmem>>, %arg11: memref<64x32xbf16, #tpu.memory_space<vmem>>, %arg12: memref<1x32xf32, #tpu.memory_space<vmem>>, %arg13: memref<32x16xbf16, #tpu.memory_space<vmem>>, %arg14: memref<1x16xf32, #tpu.memory_space<vmem>>, %arg15: memref<16x2xbf16, #tpu.memory_space<vmem>>, %arg16: memref<1x2xf32, #tpu.memory_space<vmem>>, %arg17: memref<1x1x2xf32, #tpu.memory_space<vmem>>) attributes {dimension_semantics = [#tpu.dimension_semantics<parallel>], iteration_bounds = array<i64: 2>, scalar_prefetch = 0 : i64, scratch_operands = 0 : i64, tpu.core_type = #tpu.core_type<tc>, window_params = [{transform_indices = @transform_0, window_bounds = array<i64: 1, 1024, 32>}, {pipeline_mode = #tpu.pipeline_mode<synchronous>, transform_indices = @transform_1, window_bounds = array<i64: 32, 32>}, {pipeline_mode = #tpu.pipeline_mode<synchronous>, transform_indices = @transform_2, window_bounds = array<i64: 1, 32>}, {pipeline_mode = #tpu.pipeline_mode<synchronous>, transform_indices = @transform_3, window_bounds = array<i64: 1, 32>}, {pipeline_mode = #tpu.pipeline_mode<synchronous>, transform_indices = @transform_4, window_bounds = array<i64: 288, 64>}, {pipeline_mode = #tpu.pipeline_mode<synchronous>, transform_indices = @transform_5, window_bounds = array<i64: 1, 64>}, {pipeline_mode = #tpu.pipeline_mode<synchronous>, transform_indices = @transform_6, window_bounds = array<i64: 1, 64>}, {pipeline_mode = #tpu.pipeline_mode<synchronous>, transform_indices = @transform_7, window_bounds = array<i64: 576, 64>}, {pipeline_mode = #tpu.pipeline_mode<synchronous>, transform_indices = @transform_8, window_bounds = array<i64: 1, 64>}, {pipeline_mode = #tpu.pipeline_mode<synchronous>, transform_indices = @transform_9, window_bounds = array<i64: 1, 64>}, {pipeline_mode = #tpu.pipeline_mode<synchronous>, transform_indices = @transform_10, window_bounds = array<i64: 64, 32>}, {pipeline_mode = #tpu.pipeline_mode<synchronous>, transform_indices = @transform_11, window_bounds = array<i64: 1, 32>}, {pipeline_mode = #tpu.pipeline_mode<synchronous>, transform_indices = @transform_12, window_bounds = array<i64: 32, 16>}, {pipeline_mode = #tpu.pipeline_mode<synchronous>, transform_indices = @transform_13, window_bounds = array<i64: 1, 16>}, {pipeline_mode = #tpu.pipeline_mode<synchronous>, transform_indices = @transform_14, window_bounds = array<i64: 16, 2>}, {pipeline_mode = #tpu.pipeline_mode<synchronous>, transform_indices = @transform_15, window_bounds = array<i64: 1, 2>}, {transform_indices = @transform_16, window_bounds = array<i64: 1, 1, 2>}]} {
    %c0 = arith.constant 0 : index
    %c0_0 = arith.constant 0 : index
    %c0_1 = arith.constant 0 : index
    %0 = vector.load %arg1[%c0, %c0_0, %c0_1] : memref<1x1024x32xbf16, #tpu.memory_space<vmem>>, vector<1x1024x32xbf16>
    %1 = vector.shape_cast %0 : vector<1x1024x32xbf16> to vector<1024x32xbf16>
    %c0_2 = arith.constant 0 : index
    %c0_3 = arith.constant 0 : index
    %2 = vector.load %arg2[%c0_2, %c0_3] : memref<32x32xbf16, #tpu.memory_space<vmem>>, vector<32x32xbf16>
    %cst = arith.constant dense<0.000000e+00> : vector<1024x32xf32>
    %3 = tpu.matmul %1, %2, %cst {dimension_numbers = #tpu.dot_dimension_numbers<[1], [0], [0], [1], [0, 0, 1, 1], [], []>} : vector<1024x32xbf16>, vector<32x32xbf16>, vector<1024x32xf32> -> vector<1024x32xf32>
    %c0_4 = arith.constant 0 : index
    %c0_5 = arith.constant 0 : index
    %4 = vector.load %arg3[%c0_4, %c0_5] : memref<1x32xf32, #tpu.memory_space<vmem>>, vector<1x32xf32>
    %5 = vector.broadcast %4 : vector<1x32xf32> to vector<1024x32xf32>
    %6 = arith.mulf %3, %5 : vector<1024x32xf32>
    %c0_6 = arith.constant 0 : index
    %c0_7 = arith.constant 0 : index
    %7 = vector.load %arg4[%c0_6, %c0_7] : memref<1x32xf32, #tpu.memory_space<vmem>>, vector<1x32xf32>
    %8 = vector.broadcast %7 : vector<1x32xf32> to vector<1024x32xf32>
    %9 = arith.addf %6, %8 : vector<1024x32xf32>
    %cst_8 = arith.constant 0.000000e+00 : f32
    %10 = vector.broadcast %cst_8 : f32 to vector<1024x32xf32>
    %11 = arith.maximumf %9, %10 : vector<1024x32xf32>
    %12 = vector.shape_cast %11 : vector<1024x32xf32> to vector<32x32x32xf32>
    %13 = vector.extract_strided_slice %12 {offsets = [0, 0, 0], sizes = [30, 32, 32], strides = [1, 1, 1]} : vector<32x32x32xf32> to vector<30x32x32xf32>
    %14 = vector.shape_cast %13 : vector<30x32x32xf32> to vector<15x2x32x32xf32>
    %cst_9 = arith.constant dense<0xFF800000> : vector<15x32x32xf32>
    %15 = vector.multi_reduction <maximumf>, %14, %cst_9 [1] : vector<15x2x32x32xf32> to vector<15x32x32xf32>
    %c31_i32 = arith.constant 31 : i32
    %16 = tpu.dynamic_rotate %15 by %c31_i32 dim 1 : vector<15x32x32xf32>, i32 -> vector<15x32x32xf32>
    %17 = arith.maximumf %15, %16 : vector<15x32x32xf32>
    %c0_10 = arith.constant 0 : index
    %c0_11 = arith.constant 0 : index
    %18 = vector.load %arg6[%c0_10, %c0_11] : memref<1x64xf32, #tpu.memory_space<vmem>>, vector<1x64xf32>
    %c0_12 = arith.constant 0 : index
    %c0_13 = arith.constant 0 : index
    %19 = vector.load %arg7[%c0_12, %c0_13] : memref<1x64xf32, #tpu.memory_space<vmem>>, vector<1x64xf32>
    %c30_i32 = arith.constant 30 : i32
    %20 = tpu.dynamic_rotate %17 by %c30_i32 dim 1 : vector<15x32x32xf32>, i32 -> vector<15x32x32xf32>
    %c28_i32 = arith.constant 28 : i32
    %21 = tpu.dynamic_rotate %17 by %c28_i32 dim 1 : vector<15x32x32xf32>, i32 -> vector<15x32x32xf32>
    %22 = arith.truncf %17 : vector<15x32x32xf32> to vector<15x32x32xbf16>
    %23 = arith.truncf %20 : vector<15x32x32xf32> to vector<15x32x32xbf16>
    %24 = arith.truncf %21 : vector<15x32x32xf32> to vector<15x32x32xbf16>
    %25 = vector.extract_strided_slice %17 {offsets = [1, 0, 0], sizes = [14, 32, 32], strides = [1, 1, 1]} : vector<15x32x32xf32> to vector<14x32x32xf32>
    %26 = vector.extract_strided_slice %17 {offsets = [0, 0, 0], sizes = [1, 32, 32], strides = [1, 1, 1]} : vector<15x32x32xf32> to vector<1x32x32xf32>
    %27 = tpu.concatenate %25, %26 in 0 : vector<14x32x32xf32>, vector<1x32x32xf32> -> vector<15x32x32xf32>
    %28 = arith.truncf %27 : vector<15x32x32xf32> to vector<15x32x32xbf16>
    %29 = vector.extract_strided_slice %20 {offsets = [1, 0, 0], sizes = [14, 32, 32], strides = [1, 1, 1]} : vector<15x32x32xf32> to vector<14x32x32xf32>
    %30 = vector.extract_strided_slice %20 {offsets = [0, 0, 0], sizes = [1, 32, 32], strides = [1, 1, 1]} : vector<15x32x32xf32> to vector<1x32x32xf32>
    %31 = tpu.concatenate %29, %30 in 0 : vector<14x32x32xf32>, vector<1x32x32xf32> -> vector<15x32x32xf32>
    %32 = arith.truncf %31 : vector<15x32x32xf32> to vector<15x32x32xbf16>
    %33 = vector.extract_strided_slice %21 {offsets = [1, 0, 0], sizes = [14, 32, 32], strides = [1, 1, 1]} : vector<15x32x32xf32> to vector<14x32x32xf32>
    %34 = vector.extract_strided_slice %21 {offsets = [0, 0, 0], sizes = [1, 32, 32], strides = [1, 1, 1]} : vector<15x32x32xf32> to vector<1x32x32xf32>
    %35 = tpu.concatenate %33, %34 in 0 : vector<14x32x32xf32>, vector<1x32x32xf32> -> vector<15x32x32xf32>
    %36 = arith.truncf %35 : vector<15x32x32xf32> to vector<15x32x32xbf16>
    %37 = vector.extract_strided_slice %17 {offsets = [2, 0, 0], sizes = [13, 32, 32], strides = [1, 1, 1]} : vector<15x32x32xf32> to vector<13x32x32xf32>
    %38 = vector.extract_strided_slice %17 {offsets = [0, 0, 0], sizes = [2, 32, 32], strides = [1, 1, 1]} : vector<15x32x32xf32> to vector<2x32x32xf32>
    %39 = tpu.concatenate %37, %38 in 0 : vector<13x32x32xf32>, vector<2x32x32xf32> -> vector<15x32x32xf32>
    %40 = arith.truncf %39 : vector<15x32x32xf32> to vector<15x32x32xbf16>
    %41 = vector.extract_strided_slice %20 {offsets = [2, 0, 0], sizes = [13, 32, 32], strides = [1, 1, 1]} : vector<15x32x32xf32> to vector<13x32x32xf32>
    %42 = vector.extract_strided_slice %20 {offsets = [0, 0, 0], sizes = [2, 32, 32], strides = [1, 1, 1]} : vector<15x32x32xf32> to vector<2x32x32xf32>
    %43 = tpu.concatenate %41, %42 in 0 : vector<13x32x32xf32>, vector<2x32x32xf32> -> vector<15x32x32xf32>
    %44 = arith.truncf %43 : vector<15x32x32xf32> to vector<15x32x32xbf16>
    %45 = vector.extract_strided_slice %21 {offsets = [2, 0, 0], sizes = [13, 32, 32], strides = [1, 1, 1]} : vector<15x32x32xf32> to vector<13x32x32xf32>
    %46 = vector.extract_strided_slice %21 {offsets = [0, 0, 0], sizes = [2, 32, 32], strides = [1, 1, 1]} : vector<15x32x32xf32> to vector<2x32x32xf32>
    %47 = tpu.concatenate %45, %46 in 0 : vector<13x32x32xf32>, vector<2x32x32xf32> -> vector<15x32x32xf32>
    %48 = arith.truncf %47 : vector<15x32x32xf32> to vector<15x32x32xbf16>
    %49 = tpu.concatenate %22, %23, %24, %28, %32, %36, %40, %44, %48 in 2 : vector<15x32x32xbf16>, vector<15x32x32xbf16>, vector<15x32x32xbf16>, vector<15x32x32xbf16>, vector<15x32x32xbf16>, vector<15x32x32xbf16>, vector<15x32x32xbf16>, vector<15x32x32xbf16>, vector<15x32x32xbf16> -> vector<15x32x288xbf16>
    %50 = vector.shape_cast %49 : vector<15x32x288xbf16> to vector<480x288xbf16>
    %c0_14 = arith.constant 0 : index
    %c0_15 = arith.constant 0 : index
    %51 = vector.load %arg5[%c0_14, %c0_15] : memref<288x64xbf16, #tpu.memory_space<vmem>>, vector<288x64xbf16>
    %cst_16 = arith.constant dense<0.000000e+00> : vector<480x64xf32>
    %52 = tpu.matmul %50, %51, %cst_16 {dimension_numbers = #tpu.dot_dimension_numbers<[1], [0], [0], [1], [0, 0, 1, 1], [], []>} : vector<480x288xbf16>, vector<288x64xbf16>, vector<480x64xf32> -> vector<480x64xf32>
    %53 = vector.broadcast %18 : vector<1x64xf32> to vector<480x64xf32>
    %54 = arith.mulf %52, %53 : vector<480x64xf32>
    %55 = vector.broadcast %19 : vector<1x64xf32> to vector<480x64xf32>
    %56 = arith.addf %54, %55 : vector<480x64xf32>
    %cst_17 = arith.constant 0.000000e+00 : f32
    %57 = vector.broadcast %cst_17 : f32 to vector<480x64xf32>
    %58 = arith.maximumf %56, %57 : vector<480x64xf32>
    %59 = vector.shape_cast %58 : vector<480x64xf32> to vector<15x32x64xf32>
    %60 = vector.extract_strided_slice %59 {offsets = [0, 0, 0], sizes = [12, 32, 64], strides = [1, 1, 1]} : vector<15x32x64xf32> to vector<12x32x64xf32>
    %61 = vector.shape_cast %60 : vector<12x32x64xf32> to vector<6x2x32x64xf32>
    %cst_18 = arith.constant dense<0xFF800000> : vector<6x32x64xf32>
    %62 = vector.multi_reduction <maximumf>, %61, %cst_18 [1] : vector<6x2x32x64xf32> to vector<6x32x64xf32>
    %c30_i32_19 = arith.constant 30 : i32
    %63 = tpu.dynamic_rotate %62 by %c30_i32_19 dim 1 : vector<6x32x64xf32>, i32 -> vector<6x32x64xf32>
    %64 = arith.maximumf %62, %63 : vector<6x32x64xf32>
    %c0_20 = arith.constant 0 : index
    %c0_21 = arith.constant 0 : index
    %65 = vector.load %arg9[%c0_20, %c0_21] : memref<1x64xf32, #tpu.memory_space<vmem>>, vector<1x64xf32>
    %c0_22 = arith.constant 0 : index
    %c0_23 = arith.constant 0 : index
    %66 = vector.load %arg10[%c0_22, %c0_23] : memref<1x64xf32, #tpu.memory_space<vmem>>, vector<1x64xf32>
    %c28_i32_24 = arith.constant 28 : i32
    %67 = tpu.dynamic_rotate %64 by %c28_i32_24 dim 1 : vector<6x32x64xf32>, i32 -> vector<6x32x64xf32>
    %c24_i32 = arith.constant 24 : i32
    %68 = tpu.dynamic_rotate %64 by %c24_i32 dim 1 : vector<6x32x64xf32>, i32 -> vector<6x32x64xf32>
    %69 = arith.truncf %64 : vector<6x32x64xf32> to vector<6x32x64xbf16>
    %70 = arith.truncf %67 : vector<6x32x64xf32> to vector<6x32x64xbf16>
    %71 = arith.truncf %68 : vector<6x32x64xf32> to vector<6x32x64xbf16>
    %72 = vector.extract_strided_slice %64 {offsets = [1, 0, 0], sizes = [5, 32, 64], strides = [1, 1, 1]} : vector<6x32x64xf32> to vector<5x32x64xf32>
    %73 = vector.extract_strided_slice %64 {offsets = [0, 0, 0], sizes = [1, 32, 64], strides = [1, 1, 1]} : vector<6x32x64xf32> to vector<1x32x64xf32>
    %74 = tpu.concatenate %72, %73 in 0 : vector<5x32x64xf32>, vector<1x32x64xf32> -> vector<6x32x64xf32>
    %75 = arith.truncf %74 : vector<6x32x64xf32> to vector<6x32x64xbf16>
    %76 = vector.extract_strided_slice %67 {offsets = [1, 0, 0], sizes = [5, 32, 64], strides = [1, 1, 1]} : vector<6x32x64xf32> to vector<5x32x64xf32>
    %77 = vector.extract_strided_slice %67 {offsets = [0, 0, 0], sizes = [1, 32, 64], strides = [1, 1, 1]} : vector<6x32x64xf32> to vector<1x32x64xf32>
    %78 = tpu.concatenate %76, %77 in 0 : vector<5x32x64xf32>, vector<1x32x64xf32> -> vector<6x32x64xf32>
    %79 = arith.truncf %78 : vector<6x32x64xf32> to vector<6x32x64xbf16>
    %80 = vector.extract_strided_slice %68 {offsets = [1, 0, 0], sizes = [5, 32, 64], strides = [1, 1, 1]} : vector<6x32x64xf32> to vector<5x32x64xf32>
    %81 = vector.extract_strided_slice %68 {offsets = [0, 0, 0], sizes = [1, 32, 64], strides = [1, 1, 1]} : vector<6x32x64xf32> to vector<1x32x64xf32>
    %82 = tpu.concatenate %80, %81 in 0 : vector<5x32x64xf32>, vector<1x32x64xf32> -> vector<6x32x64xf32>
    %83 = arith.truncf %82 : vector<6x32x64xf32> to vector<6x32x64xbf16>
    %84 = vector.extract_strided_slice %64 {offsets = [2, 0, 0], sizes = [4, 32, 64], strides = [1, 1, 1]} : vector<6x32x64xf32> to vector<4x32x64xf32>
    %85 = vector.extract_strided_slice %64 {offsets = [0, 0, 0], sizes = [2, 32, 64], strides = [1, 1, 1]} : vector<6x32x64xf32> to vector<2x32x64xf32>
    %86 = tpu.concatenate %84, %85 in 0 : vector<4x32x64xf32>, vector<2x32x64xf32> -> vector<6x32x64xf32>
    %87 = arith.truncf %86 : vector<6x32x64xf32> to vector<6x32x64xbf16>
    %88 = vector.extract_strided_slice %67 {offsets = [2, 0, 0], sizes = [4, 32, 64], strides = [1, 1, 1]} : vector<6x32x64xf32> to vector<4x32x64xf32>
    %89 = vector.extract_strided_slice %67 {offsets = [0, 0, 0], sizes = [2, 32, 64], strides = [1, 1, 1]} : vector<6x32x64xf32> to vector<2x32x64xf32>
    %90 = tpu.concatenate %88, %89 in 0 : vector<4x32x64xf32>, vector<2x32x64xf32> -> vector<6x32x64xf32>
    %91 = arith.truncf %90 : vector<6x32x64xf32> to vector<6x32x64xbf16>
    %92 = vector.extract_strided_slice %68 {offsets = [2, 0, 0], sizes = [4, 32, 64], strides = [1, 1, 1]} : vector<6x32x64xf32> to vector<4x32x64xf32>
    %93 = vector.extract_strided_slice %68 {offsets = [0, 0, 0], sizes = [2, 32, 64], strides = [1, 1, 1]} : vector<6x32x64xf32> to vector<2x32x64xf32>
    %94 = tpu.concatenate %92, %93 in 0 : vector<4x32x64xf32>, vector<2x32x64xf32> -> vector<6x32x64xf32>
    %95 = arith.truncf %94 : vector<6x32x64xf32> to vector<6x32x64xbf16>
    %96 = tpu.concatenate %69, %70, %71, %75, %79, %83, %87, %91, %95 in 2 : vector<6x32x64xbf16>, vector<6x32x64xbf16>, vector<6x32x64xbf16>, vector<6x32x64xbf16>, vector<6x32x64xbf16>, vector<6x32x64xbf16>, vector<6x32x64xbf16>, vector<6x32x64xbf16>, vector<6x32x64xbf16> -> vector<6x32x576xbf16>
    %97 = vector.shape_cast %96 : vector<6x32x576xbf16> to vector<192x576xbf16>
    %c0_25 = arith.constant 0 : index
    %c0_26 = arith.constant 0 : index
    %98 = vector.load %arg8[%c0_25, %c0_26] : memref<576x64xbf16, #tpu.memory_space<vmem>>, vector<576x64xbf16>
    %cst_27 = arith.constant dense<0.000000e+00> : vector<192x64xf32>
    %99 = tpu.matmul %97, %98, %cst_27 {dimension_numbers = #tpu.dot_dimension_numbers<[1], [0], [0], [1], [0, 0, 1, 1], [], []>} : vector<192x576xbf16>, vector<576x64xbf16>, vector<192x64xf32> -> vector<192x64xf32>
    %100 = vector.broadcast %65 : vector<1x64xf32> to vector<192x64xf32>
    %101 = arith.mulf %99, %100 : vector<192x64xf32>
    %102 = vector.broadcast %66 : vector<1x64xf32> to vector<192x64xf32>
    %103 = arith.addf %101, %102 : vector<192x64xf32>
    %cst_28 = arith.constant 0.000000e+00 : f32
    %104 = vector.broadcast %cst_28 : f32 to vector<192x64xf32>
    %105 = arith.maximumf %103, %104 : vector<192x64xf32>
    %106 = vector.shape_cast %105 : vector<192x64xf32> to vector<6x32x64xf32>
    %107 = vector.extract_strided_slice %106 {offsets = [0, 0, 0], sizes = [4, 32, 64], strides = [1, 1, 1]} : vector<6x32x64xf32> to vector<4x32x64xf32>
    %108 = vector.shape_cast %107 : vector<4x32x64xf32> to vector<2x2x32x64xf32>
    %cst_29 = arith.constant dense<0xFF800000> : vector<2x32x64xf32>
    %109 = vector.multi_reduction <maximumf>, %108, %cst_29 [1] : vector<2x2x32x64xf32> to vector<2x32x64xf32>
    %c28_i32_30 = arith.constant 28 : i32
    %110 = tpu.dynamic_rotate %109 by %c28_i32_30 dim 1 : vector<2x32x64xf32>, i32 -> vector<2x32x64xf32>
    %111 = arith.maximumf %109, %110 : vector<2x32x64xf32>
    %112 = vector.extract_strided_slice %111 {offsets = [0, 0, 0], sizes = [2, 1, 64], strides = [1, 1, 1]} : vector<2x32x64xf32> to vector<2x1x64xf32>
    %113 = vector.extract_strided_slice %111 {offsets = [0, 8, 0], sizes = [2, 1, 64], strides = [1, 1, 1]} : vector<2x32x64xf32> to vector<2x1x64xf32>
    %114 = arith.addf %112, %113 : vector<2x1x64xf32>
    %115 = vector.extract_strided_slice %114 {offsets = [0, 0, 0], sizes = [1, 1, 64], strides = [1, 1, 1]} : vector<2x1x64xf32> to vector<1x1x64xf32>
    %116 = vector.shape_cast %115 : vector<1x1x64xf32> to vector<1x64xf32>
    %117 = vector.extract_strided_slice %114 {offsets = [1, 0, 0], sizes = [1, 1, 64], strides = [1, 1, 1]} : vector<2x1x64xf32> to vector<1x1x64xf32>
    %118 = vector.shape_cast %117 : vector<1x1x64xf32> to vector<1x64xf32>
    %119 = arith.addf %116, %118 : vector<1x64xf32>
    %cst_31 = arith.constant 2.500000e-01 : f32
    %120 = vector.broadcast %cst_31 : f32 to vector<1x64xf32>
    %121 = arith.mulf %119, %120 : vector<1x64xf32>
    %122 = arith.truncf %121 : vector<1x64xf32> to vector<1x64xbf16>
    %c0_32 = arith.constant 0 : index
    %c0_33 = arith.constant 0 : index
    %123 = vector.load %arg11[%c0_32, %c0_33] : memref<64x32xbf16, #tpu.memory_space<vmem>>, vector<64x32xbf16>
    %cst_34 = arith.constant dense<0.000000e+00> : vector<1x32xf32>
    %124 = tpu.matmul %122, %123, %cst_34 {dimension_numbers = #tpu.dot_dimension_numbers<[1], [0], [0], [1], [0, 0, 1, 1], [], []>} : vector<1x64xbf16>, vector<64x32xbf16>, vector<1x32xf32> -> vector<1x32xf32>
    %c0_35 = arith.constant 0 : index
    %c0_36 = arith.constant 0 : index
    %125 = vector.load %arg12[%c0_35, %c0_36] : memref<1x32xf32, #tpu.memory_space<vmem>>, vector<1x32xf32>
    %126 = arith.addf %124, %125 : vector<1x32xf32>
    %cst_37 = arith.constant 0.000000e+00 : f32
    %127 = vector.broadcast %cst_37 : f32 to vector<1x32xf32>
    %128 = arith.maximumf %126, %127 : vector<1x32xf32>
    %129 = arith.truncf %128 : vector<1x32xf32> to vector<1x32xbf16>
    %c0_38 = arith.constant 0 : index
    %c0_39 = arith.constant 0 : index
    %130 = vector.load %arg13[%c0_38, %c0_39] : memref<32x16xbf16, #tpu.memory_space<vmem>>, vector<32x16xbf16>
    %cst_40 = arith.constant dense<0.000000e+00> : vector<1x16xf32>
    %131 = tpu.matmul %129, %130, %cst_40 {dimension_numbers = #tpu.dot_dimension_numbers<[1], [0], [0], [1], [0, 0, 1, 1], [], []>} : vector<1x32xbf16>, vector<32x16xbf16>, vector<1x16xf32> -> vector<1x16xf32>
    %c0_41 = arith.constant 0 : index
    %c0_42 = arith.constant 0 : index
    %132 = vector.load %arg14[%c0_41, %c0_42] : memref<1x16xf32, #tpu.memory_space<vmem>>, vector<1x16xf32>
    %133 = arith.addf %131, %132 : vector<1x16xf32>
    %cst_43 = arith.constant 0.000000e+00 : f32
    %134 = vector.broadcast %cst_43 : f32 to vector<1x16xf32>
    %135 = arith.maximumf %133, %134 : vector<1x16xf32>
    %136 = arith.truncf %135 : vector<1x16xf32> to vector<1x16xbf16>
    %c0_44 = arith.constant 0 : index
    %c0_45 = arith.constant 0 : index
    %137 = vector.load %arg15[%c0_44, %c0_45] : memref<16x2xbf16, #tpu.memory_space<vmem>>, vector<16x2xbf16>
    %cst_46 = arith.constant dense<0.000000e+00> : vector<1x2xf32>
    %138 = tpu.matmul %136, %137, %cst_46 {dimension_numbers = #tpu.dot_dimension_numbers<[1], [0], [0], [1], [0, 0, 1, 1], [], []>} : vector<1x16xbf16>, vector<16x2xbf16>, vector<1x2xf32> -> vector<1x2xf32>
    %c0_47 = arith.constant 0 : index
    %c0_48 = arith.constant 0 : index
    %139 = vector.load %arg16[%c0_47, %c0_48] : memref<1x2xf32, #tpu.memory_space<vmem>>, vector<1x2xf32>
    %140 = arith.addf %138, %139 : vector<1x2xf32>
    %c0_49 = arith.constant 0 : index
    %c0_50 = arith.constant 0 : index
    %c0_51 = arith.constant 0 : index
    %141 = vector.load %arg17[%c0_49, %c0_50, %c0_51] : memref<1x1x2xf32, #tpu.memory_space<vmem>>, vector<1x1x2xf32>
    %142 = vector.shape_cast %141 : vector<1x1x2xf32> to vector<1x2xf32>
    %143 = vector.shape_cast %140 : vector<1x2xf32> to vector<1x1x2xf32>
    tpu.vector_store %arg17[%c0_49, %c0_50, %c0_51], %143 {strides = array<i32>} : memref<1x1x2xf32, #tpu.memory_space<vmem>>, vector<1x1x2xf32>,
    return
  }
  func.func @transform_0(%arg0: i32) -> (i32, i32, i32) {
    %c0_i32 = arith.constant 0 : i32
    %c0_i32_0 = arith.constant 0 : i32
    %c0_i32_1 = arith.constant 0 : i32
    return %arg0, %c0_i32, %c0_i32_0 : i32, i32, i32
  }
  func.func @transform_1(%arg0: i32) -> (i32, i32) {
    %c0_i32 = arith.constant 0 : i32
    %c0_i32_0 = arith.constant 0 : i32
    %c0_i32_1 = arith.constant 0 : i32
    return %c0_i32, %c0_i32_0 : i32, i32
  }
  func.func @transform_2(%arg0: i32) -> (i32, i32) {
    %c0_i32 = arith.constant 0 : i32
    %c0_i32_0 = arith.constant 0 : i32
    %c0_i32_1 = arith.constant 0 : i32
    return %c0_i32, %c0_i32_0 : i32, i32
  }
  func.func @transform_3(%arg0: i32) -> (i32, i32) {
    %c0_i32 = arith.constant 0 : i32
    %c0_i32_0 = arith.constant 0 : i32
    %c0_i32_1 = arith.constant 0 : i32
    return %c0_i32, %c0_i32_0 : i32, i32
  }
  func.func @transform_4(%arg0: i32) -> (i32, i32) {
    %c0_i32 = arith.constant 0 : i32
    %c0_i32_0 = arith.constant 0 : i32
    %c0_i32_1 = arith.constant 0 : i32
    return %c0_i32, %c0_i32_0 : i32, i32
  }
  func.func @transform_5(%arg0: i32) -> (i32, i32) {
    %c0_i32 = arith.constant 0 : i32
    %c0_i32_0 = arith.constant 0 : i32
    %c0_i32_1 = arith.constant 0 : i32
    return %c0_i32, %c0_i32_0 : i32, i32
  }
  func.func @transform_6(%arg0: i32) -> (i32, i32) {
    %c0_i32 = arith.constant 0 : i32
    %c0_i32_0 = arith.constant 0 : i32
    %c0_i32_1 = arith.constant 0 : i32
    return %c0_i32, %c0_i32_0 : i32, i32
  }
  func.func @transform_7(%arg0: i32) -> (i32, i32) {
    %c0_i32 = arith.constant 0 : i32
    %c0_i32_0 = arith.constant 0 : i32
    %c0_i32_1 = arith.constant 0 : i32
    return %c0_i32, %c0_i32_0 : i32, i32
  }
  func.func @transform_8(%arg0: i32) -> (i32, i32) {
    %c0_i32 = arith.constant 0 : i32
    %c0_i32_0 = arith.constant 0 : i32
    %c0_i32_1 = arith.constant 0 : i32
    return %c0_i32, %c0_i32_0 : i32, i32
  }
  func.func @transform_9(%arg0: i32) -> (i32, i32) {
    %c0_i32 = arith.constant 0 : i32
    %c0_i32_0 = arith.constant 0 : i32
    %c0_i32_1 = arith.constant 0 : i32
    return %c0_i32, %c0_i32_0 : i32, i32
  }
  func.func @transform_10(%arg0: i32) -> (i32, i32) {
    %c0_i32 = arith.constant 0 : i32
    %c0_i32_0 = arith.constant 0 : i32
    %c0_i32_1 = arith.constant 0 : i32
    return %c0_i32, %c0_i32_0 : i32, i32
  }
  func.func @transform_11(%arg0: i32) -> (i32, i32) {
    %c0_i32 = arith.constant 0 : i32
    %c0_i32_0 = arith.constant 0 : i32
    %c0_i32_1 = arith.constant 0 : i32
    return %c0_i32, %c0_i32_0 : i32, i32
  }
  func.func @transform_12(%arg0: i32) -> (i32, i32) {
    %c0_i32 = arith.constant 0 : i32
    %c0_i32_0 = arith.constant 0 : i32
    %c0_i32_1 = arith.constant 0 : i32
    return %c0_i32, %c0_i32_0 : i32, i32
  }
  func.func @transform_13(%arg0: i32) -> (i32, i32) {
    %c0_i32 = arith.constant 0 : i32
    %c0_i32_0 = arith.constant 0 : i32
    %c0_i32_1 = arith.constant 0 : i32
    return %c0_i32, %c0_i32_0 : i32, i32
  }
  func.func @transform_14(%arg0: i32) -> (i32, i32) {
    %c0_i32 = arith.constant 0 : i32
    %c0_i32_0 = arith.constant 0 : i32
    %c0_i32_1 = arith.constant 0 : i32
    return %c0_i32, %c0_i32_0 : i32, i32
  }
  func.func @transform_15(%arg0: i32) -> (i32, i32) {
    %c0_i32 = arith.constant 0 : i32
    %c0_i32_0 = arith.constant 0 : i32
    %c0_i32_1 = arith.constant 0 : i32
    return %c0_i32, %c0_i32_0 : i32, i32
  }
  func.func @transform_16(%arg0: i32) -> (i32, i32, i32) {
    %c0_i32 = arith.constant 0 : i32
    %c0_i32_0 = arith.constant 0 : i32
    %c0_i32_1 = arith.constant 0 : i32
    return %arg0, %c0_i32, %c0_i32_0 : i32, i32, i32
  }
}

</mosaic_0001>

<bundles_post_ra>
// kernel: cnn_forward.1
= control target key start
LH: loop header
LB: loop body
LE: loop exit
PB: predicated region body
PF: predicated region fallthrough
CT: control target
= control target key end

     0   :  { %s10948_s0 = inlined_call_operand.vmem [shape: bf16[2,1024,32], index: 0, kind: input, shape index: {}]   ;;  %s10949_s1 = inlined_call_operand.vmem [shape: bf16[32,32], index: 1, kind: input, shape index: {}]   ;;  %s10950_s2 = inlined_call_operand.vmem [shape: f32[1,32], index: 2, kind: input, shape index: {}]   ;;  %s10951_s3 = inlined_call_operand.vmem [shape: f32[1,32], index: 3, kind: input, shape index: {}]   ;;  %s10952_s4 = inlined_call_operand.vmem [shape: bf16[288,64], index: 4, kind: input, shape index: {}]   ;;  %s10953_s5 = inlined_call_operand.vmem [shape: f32[1,64], index: 5, kind: input, shape index: {}]   ;;  %s10954_s6 = inlined_call_operand.vmem [shape: f32[1,64], index: 6, kind: input, shape index: {}]   ;;  %s10955_s7 = inlined_call_operand.vmem [shape: bf16[576,64], index: 7, kind: input, shape index: {}]   ;;  %s10956_s8 = inlined_call_operand.vmem [shape: f32[1,64], index: 8, kind: input, shape index: {}]   ;;  %s10957_s9 = inlined_call_operand.vmem [shape: f32[1,64], index: 9, kind: input, shape index: {}]   ;;  %s10958_s10 = inlined_call_operand.vmem [shape: bf16[64,32], index: 10, kind: input, shape index: {}]   ;;  %s10959_s11 = inlined_call_operand.vmem [shape: f32[1,32], index: 11, kind: input, shape index: {}]   ;;  %s10960_s12 = inlined_call_operand.vmem [shape: bf16[32,16], index: 12, kind: input, shape index: {}]   ;;  %s10961_s13 = inlined_call_operand.vmem [shape: f32[1,16], index: 13, kind: input, shape index: {}]   ;;  %s10962_s14 = inlined_call_operand.vmem [shape: bf16[16,2], index: 14, kind: input, shape index: {}]   ;;  %s10963_s15 = inlined_call_operand.vmem [shape: f32[1,2], index: 15, kind: input, shape index: {}]   ;;  %s10964_s16 = inlined_call_operand.hbm [shape: f32[2,1,2], index: 16, kind: output, shape index: {}]  }
   0x1   :  { %11034 = sst [smem:[#allocation49_spill]] %s10948_s0 }
   0x2   :  { %21 = vsyncpa [#allocation3], 0 }
   0x3   :  { %23 = vsyncpa [#allocation3 + $0x1], 0  ;;  %s7262_s21 = smov 0   ;;  %s7264_s22 = smov 0  }
   0x4   :  { %s7266_s23 = smov 0   ;;  %s7268_s24 = smov 0  }
   0x5 LB: > { %11035 = sst [smem:[#allocation5_spill]] %s7164_s23  ;;  %s7283_s25 = sadd.s32 4294967295, %s7168_s24   ;;  %s7168_s24 = sphi %s7268_s24, %s11221_s24   ;;  %s7164_s23 = sphi %s7266_s23, %s11223_s23   ;;  %s7160_s22 = sphi %s7264_s22, %s11225_s22   ;;  %s7156_s21 = sphi %s7262_s21, %s11224_s21  }
   0x6   : > { %s6122_s26 = sadd.s32 4294967294, %s7168_s24   ;;  %s7287_s27 = sadd.s32 1, %s7168_s24  }
   0x7   : > { %11036 = sst [smem:[#allocation6_spill]] %s7287_s27  ;;  %s377_s28 = sadd.s32 1, %s7164_s23 }
   0x8   : > { %s374_s29 = ssub.s32 %s7168_s24, %s7287_s27  ;;  %p387_p0 = scmp.ne.s32.totalorder %s7164_s23, %s7160_s22 }
   0x9   : > { %p375_p1 = scmp.eq.s32.totalorder %s374_s29, 0  ;;  %p388_p2 = scmp.eq.s32.totalorder %s7283_s25, 1 }
   0xa   : > { %p393_p3 = scmp.ne.s32.totalorder %s7160_s22, %s7156_s21  ;;  %p394_p4 = scmp.eq.s32.totalorder %s6122_s26, 1 }
   0xb   : > { %s7298_s30 = scalar_select %p375_p1, %s7164_s23, %s377_s28  }
   0xc   : > { %p7300_p5 = por %p388_p2, %p387_p0  ;;  %p7304_p6 = por %p394_p4, %p393_p3 }
   0xd   : > { %11037 = sst [smem:[#allocation7_spill]] %s7298_s30  ;;  %p6125_p7 = scmp.ge.s32.totalorder %s7168_s24, 1 }
   0xe   : > { %s11039_s17 = scalar_select %p7304_p6, 1, 0 }
   0xf   : > { %p465_p8 = scmp.lt.s32.totalorder %s7168_s24, 3 }
  0x10   : > { %11040 = sst [smem:[#allocation8_spill]] %s11039_s17 }
  0x11   : > { %p466_p9 = pnand %p6125_p7, %p465_p8 }
  0x13   : > { %469 = sbr.rel (%p466_p9) target bundleno = 2030 (0x7ee), region = 84 }
  0x1a   : > { %v6973_v0 = vld [vmem:[%s10949_s1] sm:$0xff]   ;;  %p514_p10 = scmp.lt.s32.totalorder %s7283_s25, 1  ;;  %v6974_v1 = vld [vmem:[%s10949_s1 + $0x8] sm:$0xff]   ;;  %vm984_vm0 = vcmask 261120   ;;  %s11041_s27 = sld [smem:[#allocation49_spill]]  ;;  %vm3325_vm4 = vcmask 523264  }
  0x1b   : > { %6674 = vmatprep.subr.bf16.mxu0 %v6973_v0  ;;  %v7039_v43 = vld [vmem:[%s10952_s4 + $0x80] sm:$0xff]   ;;  %v7040_v46 = vld [vmem:[%s10952_s4 + $0x88] sm:$0xff]   ;;  %s7171_s19 = smov 64   ;;  %s7173_s20 = smov 96   ;;  %vm3386_vm5 = vcmask 785408   ;;  %vm7175_vm6 = vmmov 0  }
  0x1c   : > { %s515_s28 = scalar_select %p514_p10, %s7283_s25, 1  ;;  %6675 = vmatpush3.bf16.msra.mxu0 %v6973_v0  ;;  %v7442_v60 = vld [vmem:[%s10950_s2] ss:$0 sm:$0xff]  ;;  %vm6008_vm7 = vcmask 130048   ;;  %vm6052_vm8 = vcmask 8192  }
  0x1d   : > { %6676 = vmatprep.subr.bf16.mxu0 %v6974_v1  ;;  %s512_s18 = sand.u32 1, %s7160_s22  }
  0x1e   : > { %s6373_s29 = sshll.u32 %s515_s28, 9  ;;  %s7172_s28 = smov 32  }
  0x20   : > { %s7321_s17 = scalar_lea.vmem %s11041_s27, %s6373_s29  ;;  %6677 = vmatpush3.bf16.msra.mxu0 %v6974_v1 }
  0x21   : > { %v6975_v2 = vld [vmem:[%s7321_s17] sm:$0xff]   ;;  %v6976_v3 = vld [vmem:[%s7321_s17 + $0x8] sm:$0xff]   ;;  %v6977_v4 = vld [vmem:[%s7321_s17 + $0x10] sm:$0xff]   ;;  %6806 = vmatprep.subr.bf16.mxu0 %v7039_v43 }
  0x22   : > { %6678 = vmatprep.mubr.msk.bf16.mxu0 %vm984_vm0, %v6975_v2  ;;  %v6978_v5 = vld [vmem:[%s7321_s17 + $0x18] sm:$0xff]   ;;  %v6979_v6 = vld [vmem:[%s7321_s17 + $0x20] sm:$0xff]   ;;  %v6980_v7 = vld [vmem:[%s7321_s17 + $0x28] sm:$0xff]  }
  0x23   : > { %6679 = vmatmul.mubr.msk.bf16.vlgmr.msra.gmra.mrb[0].mxu0 %vm984_vm0, %v6976_v3  ;;  %v6981_v8 = vld [vmem:[%s7321_s17 + $0x30] sm:$0xff]   ;;  %v6982_v9 = vld [vmem:[%s7321_s17 + $0x38] sm:$0xff]   ;;  %v6983_v10 = vld [vmem:[%s7321_s17 + $0x40] sm:$0xff]  }
  0x24   : > { %6682 = vmatprep.mubr.msk.bf16.mxu0 %vm984_vm0, %v6977_v4  ;;  %v6984_v11 = vld [vmem:[%s7321_s17 + $0x48] sm:$0xff]   ;;  %v6985_v12 = vld [vmem:[%s7321_s17 + $0x50] sm:$0xff]   ;;  %v6986_v13 = vld [vmem:[%s7321_s17 + $0x58] sm:$0xff]   ;;  %6807 = vmatpush3.bf16.msra.mxu0 %v7039_v43 }
  0x25   : > { %v6987_v14 = vld [vmem:[%s7321_s17 + $0x60] sm:$0xff]   ;;  %v6988_v15 = vld [vmem:[%s7321_s17 + $0x68] sm:$0xff]   ;;  %v6989_v16 = vld [vmem:[%s7321_s17 + $0x70] sm:$0xff]   ;;  %6808 = vmatprep.subr.bf16.mxu0 %v7040_v46 }
  0x26   : > { %v6990_v17 = vld [vmem:[%s7321_s17 + $0x78] sm:$0xff]   ;;  %v6991_v18 = vld [vmem:[%s7321_s17 + $0x80] sm:$0xff]   ;;  %v6992_v19 = vld [vmem:[%s7321_s17 + $0x88] sm:$0xff]  }
  0x27   : > { %v6993_v20 = vld [vmem:[%s7321_s17 + $0x90] sm:$0xff]   ;;  %v6994_v21 = vld [vmem:[%s7321_s17 + $0x98] sm:$0xff]   ;;  %v6995_v22 = vld [vmem:[%s7321_s17 + $0xa0] sm:$0xff]  }
  0x28   : > { %v6996_v23 = vld [vmem:[%s7321_s17 + $0xa8] sm:$0xff]   ;;  %v6997_v24 = vld [vmem:[%s7321_s17 + $0xb0] sm:$0xff]   ;;  %v6998_v25 = vld [vmem:[%s7321_s17 + $0xb8] sm:$0xff]   ;;  %6809 = vmatpush3.bf16.msra.mxu0 %v7040_v46 }
  0x29   : > { %v6999_v26 = vld [vmem:[%s7321_s17 + $0xc0] sm:$0xff]   ;;  %v7000_v27 = vld [vmem:[%s7321_s17 + $0xc8] sm:$0xff]   ;;  %v7001_v28 = vld [vmem:[%s7321_s17 + $0xd0] sm:$0xff]  }
  0x2a   : > { %v7002_v29 = vld [vmem:[%s7321_s17 + $0xd8] sm:$0xff]   ;;  %v7003_v30 = vld [vmem:[%s7321_s17 + $0xe0] sm:$0xff]   ;;  %v7004_v31 = vld [vmem:[%s7321_s17 + $0xe8] sm:$0xff]  }
  0x2b   : > { %6683 = vmatmul.mubr.msk.bf16.gmra.mrb[4].mxu0 %vm984_vm0, %v6978_v5  ;;  %v7005_v32 = vld [vmem:[%s7321_s17 + $0xf0] sm:$0xff]   ;;  %v7006_v33 = vld [vmem:[%s7321_s17 + $0xf8] sm:$0xff]   ;;  %v7007_v34 = vld [vmem:[%s7321_s17 + $0x100] sm:$0xff]  }
  0x2c   : > { %6686 = vmatprep.mubr.msk.bf16.mxu0 %vm984_vm0, %v6979_v6  ;;  %v7008_v35 = vld [vmem:[%s7321_s17 + $0x108] sm:$0xff]   ;;  %v7009_v36 = vld [vmem:[%s7321_s17 + $0x110] sm:$0xff]   ;;  %v7010_v37 = vld [vmem:[%s7321_s17 + $0x118] sm:$0xff]  }
  0x2d   : > { %v7011_v38 = vld [vmem:[%s7321_s17 + $0x120] sm:$0xff]   ;;  %v7012_v39 = vld [vmem:[%s7321_s17 + $0x128] sm:$0xff]   ;;  %v7013_v40 = vld [vmem:[%s7321_s17 + $0x130] sm:$0xff]  }
  0x2e   : > { %v7014_v41 = vld [vmem:[%s7321_s17 + $0x138] sm:$0xff]   ;;  %v7015_v42 = vld [vmem:[%s7321_s17 + $0x140] sm:$0xff]   ;;  %v7016_v44 = vld [vmem:[%s7321_s17 + $0x148] sm:$0xff]  }
  0x2f   : > { %v7017_v45 = vld [vmem:[%s7321_s17 + $0x150] sm:$0xff]   ;;  %v7018_v47 = vld [vmem:[%s7321_s17 + $0x158] sm:$0xff]   ;;  %v7019_v48 = vld [vmem:[%s7321_s17 + $0x160] sm:$0xff]  }
  0x30   : > { %v7020_v49 = vld [vmem:[%s7321_s17 + $0x168] sm:$0xff]   ;;  %v7021_v50 = vld [vmem:[%s7321_s17 + $0x170] sm:$0xff]   ;;  %v7022_v51 = vld [vmem:[%s7321_s17 + $0x178] sm:$0xff]  }
  0x31   : > { %v7023_v52 = vld [vmem:[%s7321_s17 + $0x180] sm:$0xff]   ;;  %v7024_v53 = vld [vmem:[%s7321_s17 + $0x188] sm:$0xff]   ;;  %v7025_v54 = vld [vmem:[%s7321_s17 + $0x190] sm:$0xff]  }
  0x32   : > { %v7026_v55 = vld [vmem:[%s7321_s17 + $0x198] sm:$0xff]   ;;  %v7027_v56 = vld [vmem:[%s7321_s17 + $0x1a0] sm:$0xff]   ;;  %v7028_v57 = vld [vmem:[%s7321_s17 + $0x1a8] sm:$0xff]  }
  0x33   : > { %6687 = vmatmul.mubr.msk.bf16.gmra.mrb[8].mxu0 %vm984_vm0, %v6980_v7  ;;  %v7029_v58 = vld [vmem:[%s7321_s17 + $0x1b0] sm:$0xff]   ;;  %v7030_v62 = vld [vmem:[%s7321_s17 + $0x1b8] sm:$0xff]   ;;  %v7031_v0 = vld [vmem:[%s7321_s17 + $0x1c0] sm:$0xff]  }
  0x34   : > { %6690 = vmatprep.mubr.msk.bf16.mxu0 %vm984_vm0, %v6981_v8  ;;  %v7450_v3 = vld [vmem:[%s10951_s3] ss:$0 sm:$0xff] }
  0x35   : > { %v7041_v7 = vld [vmem:[%s10952_s4] sm:$0xff]  }
  0x3b   : > { %6691 = vmatmul.mubr.msk.bf16.gmra.mrb[12].mxu0 %vm984_vm0, %v6982_v9  ;;  %v2328_v9 = vlaneseq }
  0x3c   : > { %6694 = vmatprep.mubr.msk.bf16.mxu0 %vm984_vm0, %v6983_v10  ;;  %v7170_v10 = vmov 0  }
  0x3d   : > { %3951 = vmatprep.subr.bf16.mxu1 %v7170_v10 }
  0x3e   : > { %3952 = vmatpush1.bf16.msra.mxu1 %v7041_v7 }
  0x3f   : > { %3953 = vmatprep.subr.bf16.mxu1 %v7170_v10 }
  0x43   : > { %6695 = vmatmul.mubr.msk.bf16.gmra.mrb[16].mxu0 %vm984_vm0, %v6984_v11 }
  0x44   : > { %6698 = vmatprep.mubr.msk.bf16.mxu0 %vm984_vm0, %v6985_v12 }
  0x4b   : > { %6699 = vmatmul.mubr.msk.bf16.gmra.mrb[20].mxu0 %vm984_vm0, %v6986_v13 }
  0x4c   : > { %6702 = vmatprep.mubr.msk.bf16.mxu0 %vm984_vm0, %v6987_v14 }
  0x53   : > { %6703 = vmatmul.mubr.msk.bf16.gmra.mrb[24].mxu0 %vm984_vm0, %v6988_v15 }
  0x54   : > { %6706 = vmatprep.mubr.msk.bf16.mxu0 %vm984_vm0, %v6989_v16  ;;  %v7032_v16 = vld [vmem:[%s7321_s17 + $0x1c8] sm:$0xff]  }
  0x5b   : > { %6707 = vmatmul.mubr.msk.bf16.gmra.mrb[28].mxu0 %vm984_vm0, %v6990_v17 }
  0x5c   : > { %6710 = vmatprep.mubr.msk.bf16.mxu0 %vm984_vm0, %v6991_v18 }
  0x63   : > { %6711 = vmatmul.mubr.msk.bf16.gmra.mrb[32].mxu0 %vm984_vm0, %v6992_v19 }
  0x64   : > { %6714 = vmatprep.mubr.msk.bf16.mxu0 %vm984_vm0, %v6993_v20  ;;  %v7033_v20 = vld [vmem:[%s7321_s17 + $0x1d0] sm:$0xff]  }
  0x6b   : > { %6715 = vmatmul.mubr.msk.bf16.gmra.mrb[36].mxu0 %vm984_vm0, %v6994_v21  ;;  %v7042_v21 = vld [vmem:[%s10952_s4 + $0x8] sm:$0xff]  }
  0x6c   : > { %6718 = vmatprep.mubr.msk.bf16.mxu0 %vm984_vm0, %v6995_v22  ;;  %3954 = vmatpush1.bf16.msra.mxu1 %v7042_v21 }
  0x6d   : > { %3955 = vmatprep.subr.bf16.mxu1 %v7170_v10 }
  0x73   : > { %6719 = vmatmul.mubr.msk.bf16.gmra.mrb[40].mxu0 %vm984_vm0, %v6996_v23 }
  0x74   : > { %6722 = vmatprep.mubr.msk.bf16.mxu0 %vm984_vm0, %v6997_v24 }
  0x7b   : > { %6723 = vmatmul.mubr.msk.bf16.gmra.mrb[44].mxu0 %vm984_vm0, %v6998_v25  ;;  %v7475_v25 = vshrl.u32 %v2328_v9, 7 }
  0x7c   : > { %6726 = vmatprep.mubr.msk.bf16.mxu0 %vm984_vm0, %v6999_v26 }
  0x7d   : > { %vm2330_vm1 = vcmp.lt.s32.totalorder %v7475_v25, 7  ;;  %vm2513_vm2 = vcmp.lt.s32.totalorder %v7475_v25, 6  ;;  %vm2634_vm3 = vcmp.lt.s32.totalorder %v7475_v25, 4 }
  0x83   : > { %6727 = vmatmul.mubr.msk.bf16.gmra.mrb[48].mxu0 %vm984_vm0, %v7000_v27 }
  0x84   : > { %6730 = vmatprep.mubr.msk.bf16.mxu0 %vm984_vm0, %v7001_v28 }
  0x8b   : > { %6731 = vmatmul.mubr.msk.bf16.gmra.mrb[52].mxu0 %vm984_vm0, %v7002_v29 }
  0x8c   : > { %6734 = vmatprep.mubr.msk.bf16.mxu0 %vm984_vm0, %v7003_v30 }
  0x93   : > { %6735 = vmatmul.mubr.msk.bf16.gmra.mrb[56].mxu0 %vm984_vm0, %v7004_v31 }
  0x94   : > { %6738 = vmatprep.mubr.msk.bf16.mxu0 %vm984_vm0, %v7005_v32 }
  0x9b   : > { %6739 = vmatmul.mubr.msk.bf16.gmra.mrb[60].mxu0 %vm984_vm0, %v7006_v33 }
  0x9c   : > { %6742 = vmatprep.mubr.msk.bf16.mxu0 %vm984_vm0, %v7007_v34 }
  0xa3   : > { %6743 = vmatmul.mubr.msk.bf16.gmra.mrb[64].mxu0 %vm984_vm0, %v7008_v35 }
  0xa4   : > { %6746 = vmatprep.mubr.msk.bf16.mxu0 %vm984_vm0, %v7009_v36  ;;  %v7043_v36 = vld [vmem:[%s10952_s4 + $0x10] sm:$0xff]  }
  0xa5   : > { %3956 = vmatpush1.bf16.msra.mxu1 %v7043_v36  ;;  %v7046_v36 = vld [vmem:[%s10952_s4 + $0x28] sm:$0xff]  }
  0xa6   : > { %3957 = vmatprep.subr.bf16.mxu1 %v7170_v10 }
  0xab   : > { %6747 = vmatmul.mubr.msk.bf16.gmra.mrb[68].mxu0 %vm984_vm0, %v7010_v37 }
  0xac   : > { %6750 = vmatprep.mubr.msk.bf16.mxu0 %vm984_vm0, %v7011_v38 }
  0xb3   : > { %6751 = vmatmul.mubr.msk.bf16.gmra.mrb[72].mxu0 %vm984_vm0, %v7012_v39 }
  0xb4   : > { %6754 = vmatprep.mubr.msk.bf16.mxu0 %vm984_vm0, %v7013_v40 }
  0xbb   : > { %6755 = vmatmul.mubr.msk.bf16.gmra.mrb[76].mxu0 %vm984_vm0, %v7014_v41 }
  0xbc   : > { %6758 = vmatprep.mubr.msk.bf16.mxu0 %vm984_vm0, %v7015_v42 }
  0xc3   : > { %6759 = vmatmul.mubr.msk.bf16.gmra.mrb[80].mxu0 %vm984_vm0, %v7016_v44 }
  0xc4   : > { %6762 = vmatprep.mubr.msk.bf16.mxu0 %vm984_vm0, %v7017_v45 }
  0xcb   : > { %6763 = vmatmul.mubr.msk.bf16.gmra.mrb[84].mxu0 %vm984_vm0, %v7018_v47 }
  0xcc   : > { %6766 = vmatprep.mubr.msk.bf16.mxu0 %vm984_vm0, %v7019_v48 }
  0xd3   : > { %6767 = vmatmul.mubr.msk.bf16.gmra.mrb[88].mxu0 %vm984_vm0, %v7020_v49 }
  0xd4   : > { %6770 = vmatprep.mubr.msk.bf16.mxu0 %vm984_vm0, %v7021_v50  ;;  %v7034_v50 = vld [vmem:[%s7321_s17 + $0x1d8] sm:$0xff]  }
  0xdb   : > { %6771 = vmatmul.mubr.msk.bf16.gmra.mrb[92].mxu0 %vm984_vm0, %v7022_v51 }
  0xdc   : > { %6774 = vmatprep.mubr.msk.bf16.mxu0 %vm984_vm0, %v7023_v52 }
  0xe3   : > { %6775 = vmatmul.mubr.msk.bf16.gmra.mrb[96].mxu0 %vm984_vm0, %v7024_v53 }
  0xe4   : > { %6778 = vmatprep.mubr.msk.bf16.mxu0 %vm984_vm0, %v7025_v54 }
  0xeb   : > { %6779 = vmatmul.mubr.msk.bf16.gmra.mrb[100].mxu0 %vm984_vm0, %v7026_v55 }
  0xec   : > { %6782 = vmatprep.mubr.msk.bf16.mxu0 %vm984_vm0, %v7027_v56  ;;  %v7035_v56 = vld [vmem:[%s7321_s17 + $0x1e0] sm:$0xff]  }
  0xf3   : > { %6783 = vmatmul.mubr.msk.bf16.gmra.mrb[104].mxu0 %vm984_vm0, %v7028_v57  ;;  %v7044_v57 = vld [vmem:[%s10952_s4 + $0x18] sm:$0xff]  }
  0xf4   : > { %6786 = vmatprep.mubr.msk.bf16.mxu0 %vm984_vm0, %v7029_v58  ;;  %3958 = vmatpush1.bf16.msra.mxu1 %v7044_v57 }
  0xf5   : > { %3959 = vmatprep.subr.bf16.mxu1 %v7170_v10 }
  0xf6   : > { %v6680_v59 = vpop.f32.mrb[0].mxu0 }
  0xf7   : > { %v1211_v61 = vpop.f32.mrb[1].mxu0  ;;  %v1723_v1 = vmul.f32 %v6680_v59, %v7442_v60 }
  0xf8   : > { %v6681_v63 = vpop.f32.mrb[2].mxu0  ;;  %v1721_v4 = vmul.f32 %v7442_v60, %v1211_v61 }
  0xf9   : > { %v1214_v2 = vpop.f32.mrb[3].mxu0  ;;  %v1724_v5 = vmul.f32 %v6681_v63, %v7442_v60  ;;  %v1850_v8 = vadd.f32 %v7450_v3, %v1723_v1 }
  0xfa   : > { %v1722_v6 = vmul.f32 %v7442_v60, %v1214_v2  ;;  %v1848_v11 = vadd.f32 %v7450_v3, %v1721_v4 }
  0xfb   : > { %6787 = vmatmul.mubr.msk.bf16.gmra.mrb[108].mxu0 %vm984_vm0, %v7030_v62  ;;  %v1851_v13 = vadd.f32 %v7450_v3, %v1724_v5  ;;  %v1970_v22 = vmax.f32 %v1850_v8, 0.0 }
  0xfc   : > { %6790 = vmatprep.mubr.msk.bf16.mxu0 %vm984_vm0, %v7031_v0  ;;  %v1849_v17 = vadd.f32 %v7450_v3, %v1722_v6  ;;  %v1968_v27 = vmax.f32 %v1848_v11, 0.0 }
  0xfd   : > { %v1971_v30 = vmax.f32 %v1851_v13, 0.0  ;;  %v2094_v37 = vsel %vm984_vm0, %v1970_v22, -inf  ;;  %v7045_v13 = vld [vmem:[%s10952_s4 + $0x20] sm:$0xff]  }
  0xfe   : > { %v6684_v12 = vpop.f32.mrb[4].mxu0  ;;  %v1969_v33 = vmax.f32 %v1849_v17, 0.0  ;;  %v2088_v40 = vsel %vm984_vm0, %v1968_v27, -inf  ;;  %3960 = vmatpush1.bf16.msra.mxu1 %v7045_v13 }
  0xff   : > { %v1727_v14 = vmul.f32 %v6684_v12, %v7442_v60  ;;  %v1227_v15 = vpop.f32.mrb[5].mxu0  ;;  %v2097_v45 = vsel %vm984_vm0, %v1971_v30, -inf  ;;  %3961 = vmatprep.subr.bf16.mxu1 %v7170_v10 }
 0x100   : > { %v1725_v18 = vmul.f32 %v7442_v60, %v1227_v15  ;;  %v6685_v19 = vpop.f32.mrb[6].mxu0  ;;  %v2091_v51 = vsel %vm984_vm0, %v1969_v33, -inf }
 0x101   : > { %v1854_v23 = vadd.f32 %v7450_v3, %v1727_v14  ;;  %v1728_v24 = vmul.f32 %v6685_v19, %v7442_v60  ;;  %v1230_v26 = vpop.f32.mrb[7].mxu0 }
 0x102   : > { %v1852_v28 = vadd.f32 %v7450_v3, %v1725_v18  ;;  %v1726_v29 = vmul.f32 %v7442_v60, %v1230_v26  ;;  %3962 = vmatpush1.bf16.msra.mxu1 %v7046_v36 }
 0x103   : > { %v1974_v31 = vmax.f32 %v1854_v23, 0.0  ;;  %v1855_v32 = vadd.f32 %v7450_v3, %v1728_v24  ;;  %6791 = vmatmul.mubr.msk.bf16.gmra.mrb[112].mxu0 %vm984_vm0, %v7032_v16  ;;  %3963 = vmatprep.subr.bf16.mxu1 %v7170_v10 }
 0x104   : > { %v1972_v34 = vmax.f32 %v1852_v28, 0.0  ;;  %v1853_v35 = vadd.f32 %v7450_v3, %v1726_v29  ;;  %6794 = vmatprep.mubr.msk.bf16.mxu0 %vm984_vm0, %v7033_v20  ;;  %v7036_v29 = vld [vmem:[%s7321_s17 + $0x1e8] sm:$0xff]  }
 0x105   : > { %v2095_v38 = vsel %vm984_vm0, %v1974_v31, -inf  ;;  %v1975_v39 = vmax.f32 %v1855_v32, 0.0 }
 0x106   : > { %v2096_v41 = vmax.f32 %v2094_v37, %v2095_v38  ;;  %v2089_v42 = vsel %vm984_vm0, %v1972_v34, -inf  ;;  %v1973_v43 = vmax.f32 %v1853_v35, 0.0  ;;  %v6688_v44 = vpop.f32.mrb[8].mxu0  ;;  %v7037_v35 = vld [vmem:[%s7321_s17 + $0x1f0] sm:$0xff]  }
 0x107   : > { %v2090_v46 = vmax.f32 %v2088_v40, %v2089_v42  ;;  %v2098_v47 = vsel %vm984_vm0, %v1975_v39, -inf  ;;  %v1731_v48 = vmul.f32 %v6688_v44, %v7442_v60  ;;  %v1243_v49 = vpop.f32.mrb[9].mxu0 }
 0x108   : > { %v2099_v52 = vmax.f32 %v2097_v45, %v2098_v47  ;;  %v2092_v53 = vsel %vm984_vm0, %v1973_v43, -inf  ;;  %v1729_v54 = vmul.f32 %v7442_v60, %v1243_v49  ;;  %v6689_v55 = vpop.f32.mrb[10].mxu0  ;;  %v2298_v0 = vrot.slane %v2096_v41, 1 }
 0x109   : > { %v2268_v58 = vrot.slane %v2090_v46, 1  ;;  %v2093_v59 = vmax.f32 %v2091_v51, %v2092_v53  ;;  %v1858_v61 = vadd.f32 %v7450_v3, %v1731_v48  ;;  %v1732_v62 = vmul.f32 %v6689_v55, %v7442_v60  ;;  %v1246_v63 = vpop.f32.mrb[11].mxu0 }
 0x10a   : > { %v2313_v1 = vrot.slane %v2099_v52, 1  ;;  %v1856_v2 = vadd.f32 %v7450_v3, %v1729_v54  ;;  %v1730_v4 = vmul.f32 %v7442_v60, %v1246_v63  ;;  %v7047_v54 = vld [vmem:[%s10952_s4 + $0x30] sm:$0xff]  }
 0x10b   : > { %v2283_v5 = vrot.slane %v2093_v59, 1  ;;  %v1978_v6 = vmax.f32 %v1858_v61, 0.0  ;;  %v1859_v7 = vadd.f32 %v7450_v3, %v1732_v62  ;;  %6795 = vmatmul.mubr.msk.bf16.gmra.mrb[116].mxu0 %vm984_vm0, %v7034_v50  ;;  %3964 = vmatpush1.bf16.msra.mxu1 %v7047_v54 }
 0x10c   : > { %v2331_v8 = vsel %vm2330_vm1, %v2298_v0, %v2313_v1  ;;  %v2376_v9 = vsel %vm2330_vm1, %v2313_v1, %v2268_v58  ;;  %v1976_v11 = vmax.f32 %v1856_v2, 0.0  ;;  %v1857_v12 = vadd.f32 %v7450_v3, %v1730_v4  ;;  %6798 = vmatprep.mubr.msk.bf16.mxu0 %vm984_vm0, %v7035_v56  ;;  %3965 = vmatprep.subr.bf16.mxu1 %v7170_v10 }
 0x10d   : > { %v7522_v14 = vmax.f32 %v2096_v41, %v2331_v8  ;;  %v7524_v15 = vmax.f32 %v2099_v52, %v2376_v9  ;;  %v2346_v16 = vsel %vm2330_vm1, %v2283_v5, %v2298_v0  ;;  %v2361_v17 = vsel %vm2330_vm1, %v2268_v58, %v2283_v5 }
 0x10e   : > { %v7530_v18 = vmax.f32 %v2090_v46, %v2361_v17  ;;  %v7532_v19 = vmax.f32 %v2093_v59, %v2346_v16  ;;  %v2106_v20 = vsel %vm984_vm0, %v1978_v6, -inf  ;;  %v2100_v21 = vsel %vm984_vm0, %v1976_v11, -inf  ;;  %v6692_v22 = vpop.f32.mrb[12].mxu0  ;;  %v7048_v16 = vld [vmem:[%s10952_s4 + $0x38] sm:$0xff]  }
 0x10f   : > { %v1979_v23 = vmax.f32 %v1859_v7, 0.0  ;;  %v1977_v24 = vmax.f32 %v1857_v12, 0.0  ;;  %v1735_v26 = vmul.f32 %v6692_v22, %v7442_v60  ;;  %v1259_v27 = vpop.f32.mrb[13].mxu0  ;;  %v2604_v28 = vrot.slane %v7522_v14, 4  ;;  %v7038_v7 = vld [vmem:[%s7321_s17 + $0x1f8] sm:$0xff]   ;;  %3966 = vmatpush1.bf16.msra.mxu1 %v7048_v16  ;;  %s513_s17 = scalar_lea.vmem [#allocation2], %s512_s18 }
 0x110   : > { %v1733_v30 = vmul.f32 %v7442_v60, %v1259_v27  ;;  %v6693_v31 = vpop.f32.mrb[14].mxu0  ;;  %v2574_v32 = vrot.slane %v7530_v18, 4  ;;  %v2589_v33 = vrot.slane %v7532_v19, 4  ;;  %v2453_v34 = vrot.slane %v7530_v18, 2  ;;  %3967 = vmatprep.subr.bf16.mxu1 %v7170_v10  ;;  %s6067_s29 = sshll.u32 %s513_s17, 4  ;;  %s10908_s29 = int_to_ptr.vmem [resolvable:$true] %s6067_s29 }
 0x111   : > { %v2109_v37 = vsel %vm984_vm0, %v1979_v23, -inf  ;;  %v2103_v38 = vsel %vm984_vm0, %v1977_v24, -inf  ;;  %v1862_v39 = vadd.f32 %v7450_v3, %v1735_v26  ;;  %v1736_v40 = vmul.f32 %v6693_v31, %v7442_v60  ;;  %v1262_v41 = vpop.f32.mrb[15].mxu0  ;;  %s7106_s30 = scalar_lea.vmem %s10908_s29, 16 }
 0x112   : > { %v1860_v42 = vadd.f32 %v7450_v3, %v1733_v30  ;;  %v1734_v43 = vmul.f32 %v7442_v60, %v1262_v41  ;;  %v2650_v44 = vsel %vm2634_vm3, %v2589_v33, %v2604_v28  ;;  %v2665_v45 = vsel %vm2634_vm3, %v2574_v32, %v2589_v33  ;;  %p7107_p11 = scmp.ne.s32.totalorder %s10908_s29, %s7106_s30 }
 0x113   : > { %v1982_v46 = vmax.f32 %v1862_v39, 0.0  ;;  %v1863_v47 = vadd.f32 %v7450_v3, %v1736_v40  ;;  %v7563_v48 = vpack.c.bf16 %v2650_v44, %v2665_v45  ;;  %v2468_v49 = vrot.slane %v7532_v19, 2  ;;  %6799 = vmatmul.mubr.msk.bf16.gmra.mrb[120].mxu0 %vm984_vm0, %v7036_v29  ;;  %v7049_v39 = vld [vmem:[%s10952_s4 + $0x40] sm:$0xff]  }
 0x114   : > { %v1980_v50 = vmax.f32 %v1860_v42, 0.0  ;;  %v1861_v51 = vadd.f32 %v7450_v3, %v1734_v43  ;;  %v2483_v52 = vrot.slane %v7522_v14, 2  ;;  %v2498_v53 = vrot.slane %v7524_v15, 2  ;;  %6802 = vmatprep.mubr.msk.bf16.mxu0 %vm984_vm0, %v7037_v35  ;;  %3968 = vmatpush1.bf16.msra.mxu1 %v7049_v39  ;;  %p7108_p12 = pnand %p7107_p11, %p7300_p5 }
 0x115   : > { %11042 = vst [vmem:[#allocation9_spill] sm:$0xff] %v7563_v48  ;;  %v2107_v55 = vsel %vm984_vm0, %v1982_v46, -inf  ;;  %v1983_v56 = vmax.f32 %v1863_v47, 0.0  ;;  %2905 = vrot.lane.b32.xlu1 %v7563_v48, %s7171_s19  ;;  %v2544_v57 = vsel %vm2513_vm2, %v2453_v34, %v2468_v49  ;;  %v2619_v58 = vrot.slane %v7524_v15, 4  ;;  %3969 = vmatprep.subr.bf16.mxu1 %v7170_v10 }
 0x116   : > { %v2108_v59 = vmax.f32 %v2106_v20, %v2107_v55  ;;  %v2101_v61 = vsel %vm984_vm0, %v1980_v50, -inf  ;;  %v1981_v62 = vmax.f32 %v1861_v51, 0.0  ;;  %v2529_v63 = vsel %vm2513_vm2, %v2468_v49, %v2483_v52  ;;  %v6696_v0 = vpop.f32.mrb[16].mxu0  ;;  %p7109_p13 = pneg %p7108_p12 }
 0x117   : > { %v7584_v1 = vmax.f32 %v2100_v21, %v2101_v61  ;;  %v2110_v2 = vsel %vm984_vm0, %v1983_v56, -inf  ;;  %v7587_v4 = vpack.c.bf16 %v2529_v63, %v2544_v57  ;;  %v1739_v5 = vmul.f32 %v6696_v0, %v7442_v60  ;;  %v1275_v6 = vpop.f32.mrb[17].mxu0 }
 0x118   : > { %v2299_v8 = vrot.slane %v2108_v59, 1  ;;  %v2111_v9 = vmax.f32 %v2109_v37, %v2110_v2  ;;  %v2104_v11 = vsel %vm984_vm0, %v1981_v62, -inf  ;;  %v1737_v12 = vmul.f32 %v7442_v60, %v1275_v6  ;;  %v6697_v13 = vpop.f32.mrb[18].mxu0 }
 0x119   : > { %11043 = vst [vmem:[#allocation10_spill] sm:$0xff] %v7587_v4  ;;  %v2269_v17 = vrot.slane %v7584_v1, 1  ;;  %v2105_v20 = vmax.f32 %v2103_v38, %v2104_v11  ;;  %2815 = vrot.lane.b32.xlu0 %v7587_v4, %s7172_s28  ;;  %v1866_v21 = vadd.f32 %v7450_v3, %v1739_v5  ;;  %v1740_v22 = vmul.f32 %v6697_v13, %v7442_v60  ;;  %v1278_v23 = vpop.f32.mrb[19].mxu0 }
 0x11a   : > { %v2314_v24 = vrot.slane %v2111_v9, 1  ;;  %v1864_v26 = vadd.f32 %v7450_v3, %v1737_v12  ;;  %v2514_v27 = vsel %vm2513_vm2, %v2483_v52, %v2498_v53  ;;  %v2559_v29 = vsel %vm2513_vm2, %v2498_v53, %v2453_v34 }
 0x11b   : > { %v2284_v30 = vrot.slane %v2105_v20, 1  ;;  %v1986_v31 = vmax.f32 %v1866_v21, 0.0  ;;  %v1867_v33 = vadd.f32 %v7450_v3, %v1740_v22  ;;  %v7608_v35 = vpack.c.bf16 %v2559_v29, %v2514_v27  ;;  %6803 = vmatmul.mubr.msk.bf16.gmra.mrb[124].mxu0 %vm984_vm0, %v7038_v7 }
 0x11c   : > { %v2377_v36 = vsel %vm2330_vm1, %v2314_v24, %v2269_v17  ;;  %v1984_v37 = vmax.f32 %v1864_v26, 0.0  ;;  %v1738_v38 = vmul.f32 %v7442_v60, %v1278_v23  ;;  %v2635_v34 = vsel %vm2634_vm3, %v2604_v28, %v2619_v58 }
 0x11d   : > { %11044 = vst [vmem:[#allocation11_spill] sm:$0xff] %v7608_v35  ;;  %v7622_v40 = vmax.f32 %v2111_v9, %v2377_v36  ;;  %v2347_v41 = vsel %vm2330_vm1, %v2284_v30, %v2299_v8  ;;  %v2118_v42 = vsel %vm984_vm0, %v1986_v31, -inf  ;;  %v1987_v43 = vmax.f32 %v1867_v33, 0.0  ;;  %2817 = vrot.lane.b32.xlu1 %v7608_v35, %s7172_s28 }
 0x11e   : > { %v7629_v44 = vmax.f32 %v2105_v20, %v2347_v41  ;;  %v2112_v45 = vsel %vm984_vm0, %v1984_v37, -inf  ;;  %v1865_v28 = vadd.f32 %v7450_v3, %v1738_v38  ;;  %v2680_v46 = vsel %vm2634_vm3, %v2619_v58, %v2574_v32  ;;  %v6700_v47 = vpop.f32.mrb[20].mxu0  ;;  %v7050_v58 = vld [vmem:[%s10952_s4 + $0x48] sm:$0xff]   ;;  %v7051_v20 = vld [vmem:[%s10952_s4 + $0x50] sm:$0xff]  }
 0x11f   : > { %v2121_v49 = vsel %vm984_vm0, %v1987_v43, -inf  ;;  %v7638_v50 = vpack.c.bf16 %v2680_v46, %v2635_v34  ;;  %v1743_v51 = vmul.f32 %v6700_v47, %v7442_v60  ;;  %v1291_v52 = vpop.f32.mrb[21].mxu0  ;;  %v2332_v53 = vsel %vm2330_vm1, %v2299_v8, %v2314_v24  ;;  %3970 = vmatpush1.bf16.msra.mxu1 %v7050_v58 }
 0x120   : > { %v1985_v54 = vmax.f32 %v1865_v28, 0.0  ;;  %v1741_v55 = vmul.f32 %v7442_v60, %v1291_v52  ;;  %v6701_v56 = vpop.f32.mrb[22].mxu0  ;;  %v7645_v57 = vmax.f32 %v2108_v59, %v2332_v53  ;;  %v2362_v32 = vsel %vm2330_vm1, %v2269_v17, %v2284_v30  ;;  %3971 = vmatprep.subr.bf16.mxu1 %v7170_v10 }
 0x121   : > { %11045 = vst [vmem:[#allocation12_spill] sm:$0xff] %v7638_v50  ;;  %2907 = vrot.lane.b32.xlu1 %v7638_v50, %s7171_s19  ;;  %v1870_v61 = vadd.f32 %v7450_v3, %v1743_v51  ;;  %v1744_v62 = vmul.f32 %v6701_v56, %v7442_v60  ;;  %v1294_v63 = vpop.f32.mrb[23].mxu0  ;;  %v7657_v0 = vmax.f32 %v7584_v1, %v2362_v32  ;;  %v2590_v59 = vrot.slane %v7629_v44, 4 }
 0x122   : > { %v2115_v2 = vsel %vm984_vm0, %v1985_v54, -inf  ;;  %v1868_v5 = vadd.f32 %v7450_v3, %v1741_v55  ;;  %v7664_v6 = vpack.c.bf16 %v7622_v40, %v7645_v57  ;;  %v1742_v7 = vmul.f32 %v7442_v60, %v1294_v63 }
 0x123   : > { %v1990_v8 = vmax.f32 %v1870_v61, 0.0  ;;  %v1871_v9 = vadd.f32 %v7450_v3, %v1744_v62  ;;  %v7670_v1 = vpack.c.bf16 %v7629_v44, %v7657_v0  ;;  %v2575_v11 = vrot.slane %v7657_v0, 4  ;;  %3972 = vmatpush1.bf16.msra.mxu1 %v7051_v20 }
 0x124   : > { %11046 = vst [vmem:[#allocation13_spill] sm:$0xff] %v7664_v6  ;;  %v1988_v12 = vmax.f32 %v1868_v5, 0.0  ;;  %v1869_v13 = vadd.f32 %v7450_v3, %v1742_v7  ;;  %v2605_v16 = vrot.slane %v7645_v57, 4  ;;  %v2620_v17 = vrot.slane %v7622_v40, 4  ;;  %3973 = vmatprep.subr.bf16.mxu1 %v7170_v10  ;;  %v7053_v5 = vld [vmem:[%s10952_s4 + $0x60] sm:$0xff]  }
 0x125   : > { %11047 = vst [vmem:[#allocation14_spill] sm:$0xff] %v7670_v1  ;;  %v2119_v21 = vsel %vm984_vm0, %v1990_v8, -inf  ;;  %v1991_v22 = vmax.f32 %v1871_v9, 0.0  ;;  %2997 = vrot.lane.b32.xlu1 %v7664_v6, %s7173_s20  ;;  %v2666_v23 = vsel %vm2634_vm3, %v2575_v11, %v2590_v59  ;;  %v2454_v24 = vrot.slane %v7657_v0, 2 }
 0x126   : > { %v7686_v26 = vmax.f32 %v2118_v42, %v2119_v21  ;;  %v2113_v27 = vsel %vm984_vm0, %v1988_v12, -inf  ;;  %v1989_v29 = vmax.f32 %v1869_v13, 0.0  ;;  %v2651_v30 = vsel %vm2634_vm3, %v2590_v59, %v2605_v16  ;;  %v6704_v31 = vpop.f32.mrb[24].mxu0 }
 0x127   : > { %v2114_v33 = vmax.f32 %v2112_v45, %v2113_v27  ;;  %v2122_v36 = vsel %vm984_vm0, %v1991_v22, -inf  ;;  %v7692_v37 = vpack.c.bf16 %v2651_v30, %v2666_v23  ;;  %v1747_v38 = vmul.f32 %v6704_v31, %v7442_v60  ;;  %v1307_v34 = vpop.f32.mrb[25].mxu0  ;;  %v7052_v45 = vld [vmem:[%s10952_s4 + $0x58] sm:$0xff]  }
 0x128   : > { %v2300_v39 = vrot.slane %v7686_v26, 1  ;;  %v2123_v41 = vmax.f32 %v2121_v49, %v2122_v36  ;;  %v2116_v42 = vsel %vm984_vm0, %v1989_v29, -inf  ;;  %v1745_v43 = vmul.f32 %v7442_v60, %v1307_v34  ;;  %v6705_v28 = vpop.f32.mrb[26].mxu0  ;;  %3974 = vmatpush1.bf16.msra.mxu1 %v7052_v45 }
 0x129   : > { %11048 = vst [vmem:[#allocation15_spill] sm:$0xff] %v7692_v37  ;;  %v2270_v46 = vrot.slane %v2114_v33, 1  ;;  %v2117_v47 = vmax.f32 %v2115_v2, %v2116_v42  ;;  %2995 = vrot.lane.b32.xlu1 %v7670_v1, %s7173_s20  ;;  %3055 = vrot.lane.b32.xlu0 %v7692_v37, %s7172_s28  ;;  %v1874_v51 = vadd.f32 %v7450_v3, %v1747_v38  ;;  %v1310_v52 = vpop.f32.mrb[27].mxu0  ;;  %v2469_v56 = vrot.slane %v7629_v44, 2 }
 0x12a   : > { %v2636_v49 = vsel %vm2634_vm3, %v2605_v16, %v2620_v17  ;;  %v2315_v53 = vrot.slane %v2123_v41, 1  ;;  %v1872_v54 = vadd.f32 %v7450_v3, %v1745_v43  ;;  %v2681_v55 = vsel %vm2634_vm3, %v2620_v17, %v2575_v11  ;;  %3975 = vmatprep.subr.bf16.mxu1 %v7170_v10 }
 0x12b   : > { %v2285_v32 = vrot.slane %v2117_v47, 1  ;;  %v1994_v58 = vmax.f32 %v1874_v51, 0.0  ;;  %v7713_v61 = vpack.c.bf16 %v2681_v55, %v2636_v49  ;;  %v2484_v62 = vrot.slane %v7645_v57, 2 }
 0x12c   : > { %v2378_v63 = vsel %vm2330_vm1, %v2315_v53, %v2270_v46  ;;  %v1992_v59 = vmax.f32 %v1872_v54, 0.0  ;;  %v2545_v2 = vsel %vm2513_vm2, %v2454_v24, %v2469_v56  ;;  %v1748_v44 = vmul.f32 %v6705_v28, %v7442_v60  ;;  %3976 = vmatpush1.bf16.msra.mxu1 %v7053_v5 }
 0x12d   : > { %11049 = vst [vmem:[#allocation16_spill] sm:$0xff] %v7713_v61  ;;  %v7727_v7 = vmax.f32 %v2123_v41, %v2378_v63  ;;  %v2348_v57 = vsel %vm2330_vm1, %v2285_v32, %v2300_v39  ;;  %v2363_v8 = vsel %vm2330_vm1, %v2270_v46, %v2285_v32  ;;  %v2130_v9 = vsel %vm984_vm0, %v1994_v58, -inf  ;;  %3057 = vrot.lane.b32.xlu0 %v7713_v61, %s7172_s28 }
 0x12e   : > { %v7736_v11 = vmax.f32 %v2114_v33, %v2363_v8  ;;  %v7738_v12 = vmax.f32 %v2117_v47, %v2348_v57  ;;  %v2124_v13 = vsel %vm984_vm0, %v1992_v59, -inf  ;;  %v2530_v16 = vsel %vm2513_vm2, %v2469_v56, %v2484_v62  ;;  %v6708_v17 = vpop.f32.mrb[28].mxu0  ;;  %3977 = vmatprep.subr.bf16.mxu1 %v7170_v10  ;;  %v7054_v47 = vld [vmem:[%s10952_s4 + $0x68] sm:$0xff]  }
 0x12f   : > { %v2621_v20 = vrot.slane %v7727_v7, 4  ;;  %v7744_v21 = vpack.c.bf16 %v2530_v16, %v2545_v2  ;;  %v1875_v22 = vadd.f32 %v7450_v3, %v1748_v44  ;;  %v1746_v23 = vmul.f32 %v7442_v60, %v1310_v52  ;;  %v1323_v27 = vpop.f32.mrb[29].mxu0  ;;  %v7055_v44 = vld [vmem:[%s10952_s4 + $0x70] sm:$0xff]  }
 0x130   : > { %v2591_v29 = vrot.slane %v7738_v12, 4  ;;  %v1751_v30 = vmul.f32 %v6708_v17, %v7442_v60  ;;  %v1749_v31 = vmul.f32 %v7442_v60, %v1323_v27  ;;  %v6709_v33 = vpop.f32.mrb[30].mxu0  ;;  %v2499_v36 = vrot.slane %v7622_v40, 2  ;;  %3978 = vmatpush1.bf16.msra.mxu1 %v7054_v47 }
 0x131   : > { %11050 = vst [vmem:[#allocation17_spill] sm:$0xff] %v7744_v21  ;;  %2819 = vrot.lane.b32.xlu1 %v7744_v21, %s7172_s28  ;;  %v1995_v38 = vmax.f32 %v1875_v22, 0.0  ;;  %v1873_v34 = vadd.f32 %v7450_v3, %v1746_v23  ;;  %v1752_v41 = vmul.f32 %v6709_v33, %v7442_v60  ;;  %v2333_v42 = vsel %vm2330_vm1, %v2300_v39, %v2315_v53  ;;  %v1326_v43 = vpop.f32.mrb[31].mxu0 }
 0x132   : > { %v1878_v28 = vadd.f32 %v7450_v3, %v1751_v30  ;;  %v1876_v45 = vadd.f32 %v7450_v3, %v1749_v31  ;;  %v2515_v46 = vsel %vm2513_vm2, %v2484_v62, %v2499_v36  ;;  %v2560_v40 = vsel %vm2513_vm2, %v2499_v36, %v2454_v24  ;;  %3979 = vmatprep.subr.bf16.mxu1 %v7170_v10 }
 0x133   : > { %v2133_v51 = vsel %vm984_vm0, %v1995_v38, -inf  ;;  %v1993_v39 = vmax.f32 %v1873_v34, 0.0  ;;  %v1879_v49 = vadd.f32 %v7450_v3, %v1752_v41  ;;  %v7772_v52 = vpack.c.bf16 %v2560_v40, %v2515_v46 }
 0x134   : > { %v1998_v53 = vmax.f32 %v1878_v28, 0.0  ;;  %v1996_v54 = vmax.f32 %v1876_v45, 0.0  ;;  %v2401_v55 = vmax.f32 %v7686_v26, %v2333_v42  ;;  %v1750_v0 = vmul.f32 %v7442_v60, %v1326_v43  ;;  %3980 = vmatpush1.bf16.msra.mxu1 %v7055_v44 }
 0x135   : > { %11051 = vst [vmem:[#allocation18_spill] sm:$0xff] %v7772_v52  ;;  %v2127_v24 = vsel %vm984_vm0, %v1993_v39, -inf  ;;  %2909 = vrot.lane.b32.xlu1 %v7692_v37, %s7171_s19  ;;  %v1999_v56 = vmax.f32 %v1879_v49, 0.0  ;;  %v2576_v32 = vrot.slane %v7736_v11, 4  ;;  %v2455_v58 = vrot.slane %v7736_v11, 2  ;;  %3981 = vmatprep.subr.bf16.mxu1 %v7170_v10 }
 0x136   : > { %v2131_v62 = vsel %vm984_vm0, %v1998_v53, -inf  ;;  %v2125_v63 = vsel %vm984_vm0, %v1996_v54, -inf  ;;  %v7785_v26 = vpack.c.bf16 %v7727_v7, %v2401_v55  ;;  %v1877_v59 = vadd.f32 %v7450_v3, %v1750_v0  ;;  %v6712_v2 = vpop.f32.mrb[32].mxu0 }
 0x137   : > { %v7791_v5 = vmax.f32 %v2130_v9, %v2131_v62  ;;  %v2126_v57 = vmax.f32 %v2124_v13, %v2125_v63  ;;  %v2134_v8 = vsel %vm984_vm0, %v1999_v56, -inf  ;;  %v2606_v16 = vrot.slane %v2401_v55, 4  ;;  %v1339_v17 = vpop.f32.mrb[33].mxu0 }
 0x138   : > { %v7794_v22 = vmax.f32 %v2133_v51, %v2134_v8  ;;  %3117 = vrot.lane.b32.xlu0 %v7785_v26, %s7171_s19  ;;  %v1997_v23 = vmax.f32 %v1877_v59, 0.0  ;;  %v2667_v27 = vsel %vm2634_vm3, %v2576_v32, %v2591_v29  ;;  %v2682_v30 = vsel %vm2634_vm3, %v2621_v20, %v2576_v32  ;;  %v6713_v31 = vpop.f32.mrb[34].mxu0 }
 0x139   : > { %v2301_v9 = vrot.slane %v7791_v5, 1  ;;  %v2271_v13 = vrot.slane %v2126_v57, 1  ;;  %2821 = vrot.lane.b32.xlu1 %v7772_v52, %s7172_s28  ;;  %v2637_v33 = vsel %vm2634_vm3, %v2606_v16, %v2621_v20  ;;  %v2652_v36 = vsel %vm2634_vm3, %v2591_v29, %v2606_v16  ;;  %v1342_v38 = vpop.f32.mrb[35].mxu0  ;;  %v7056_v29 = vld [vmem:[%s10952_s4 + $0x78] sm:$0xff]  }
 0x13a   : > { %v2316_v34 = vrot.slane %v7794_v22, 1  ;;  %v2128_v41 = vsel %vm984_vm0, %v1997_v23, -inf  ;;  %v7812_v42 = vpack.c.bf16 %v2652_v36, %v2667_v27  ;;  %v2470_v43 = vrot.slane %v7738_v12, 2  ;;  %3982 = vmatpush1.bf16.msra.mxu1 %v7056_v29 }
 0x13b   : > { %v2129_v28 = vmax.f32 %v2127_v24, %v2128_v41  ;;  %v2485_v45 = vrot.slane %v2401_v55, 2  ;;  %v7815_v46 = vpack.c.bf16 %v2682_v30, %v2637_v33  ;;  %v2500_v20 = vrot.slane %v7727_v7, 2 }
 0x13c   : > { %v2379_v10 = vsel %vm2330_vm1, %v2316_v34, %v2271_v13  ;;  %6810 = vmatprep.mubr.msk.bf16.mxu0 %vm984_vm0, %v7812_v42  ;;  %v2546_v40 = vsel %vm2513_vm2, %v2455_v58, %v2470_v43  ;;  %v1755_v47 = vmul.f32 %v6712_v2, %v7442_v60  ;;  %v1753_v51 = vmul.f32 %v7442_v60, %v1339_v17 }
 0x13d   : > { %v7830_v39 = vmax.f32 %v7794_v22, %v2379_v10  ;;  %v2286_v7 = vrot.slane %v2129_v28, 1  ;;  %2911 = vrot.lane.b32.xlu1 %v7713_v61, %s7171_s19  ;;  %v2531_v49 = vsel %vm2513_vm2, %v2470_v43, %v2485_v45  ;;  %6811 = vmatmul.mubr.msk.bf16.vlgmr.msra.gmra.mrb[128].mxu0 %vm984_vm0, %v7815_v46  ;;  %v2516_v53 = vsel %vm2513_vm2, %v2485_v45, %v2500_v20 }
 0x13e   : > { %v7840_v54 = vpack.c.bf16 %v2531_v49, %v2546_v40  ;;  %v2561_v55 = vsel %vm2513_vm2, %v2500_v20, %v2455_v58  ;;  %v1882_v0 = vadd.f32 %v7450_v3, %v1755_v47  ;;  %v1880_v24 = vadd.f32 %v7450_v3, %v1753_v51  ;;  %v6716_v56 = vpop.f32.mrb[36].mxu0 }
 0x13f   : > { %v2622_v32 = vrot.slane %v7830_v39, 4  ;;  %v2349_v62 = vsel %vm2330_vm1, %v2286_v7, %v2301_v9  ;;  %v2364_v63 = vsel %vm2330_vm1, %v2271_v13, %v2286_v7  ;;  %v7851_v59 = vpack.c.bf16 %v2561_v55, %v2516_v53  ;;  %v1355_v2 = vpop.f32.mrb[37].mxu0 }
 0x140   : > { %v7853_v44 = vmax.f32 %v2126_v57, %v2364_v63  ;;  %v7855_v58 = vmax.f32 %v2129_v28, %v2349_v62  ;;  %3175 = vrot.lane.b32.xlu0 %v7840_v54, %s7173_s20  ;;  %v2002_v8 = vmax.f32 %v1882_v0, 0.0  ;;  %v2000_v16 = vmax.f32 %v1880_v24, 0.0  ;;  %v6717_v17 = vpop.f32.mrb[38].mxu0 }
 0x141   : > { %3001 = vrot.lane.b32.xlu1 %v7785_v26, %s7173_s20  ;;  %v1756_v22 = vmul.f32 %v6713_v31, %v7442_v60  ;;  %v7864_v23 = vpack.c.bf16 %v7738_v12, %v7736_v11  ;;  %v1754_v57 = vmul.f32 %v7442_v60, %v1342_v38  ;;  %v1759_v27 = vmul.f32 %v6716_v56, %v7442_v60  ;;  %v1358_v30 = vpop.f32.mrb[39].mxu0 }
 0x142   : > { %v2592_v13 = vrot.slane %v7855_v58, 4  ;;  %v2142_v33 = vsel %vm984_vm0, %v2002_v8, -inf  ;;  %v2136_v36 = vsel %vm984_vm0, %v2000_v16, -inf  ;;  %v1757_v41 = vmul.f32 %v7442_v60, %v1355_v2 }
 0x143   : > { %v1883_v43 = vadd.f32 %v7450_v3, %v1756_v22  ;;  %v1881_v31 = vadd.f32 %v7450_v3, %v1754_v57  ;;  %v1886_v11 = vadd.f32 %v7450_v3, %v1759_v27  ;;  %v1760_v12 = vmul.f32 %v6717_v17, %v7442_v60 }
 0x144   : > { %3177 = vrot.lane.b32.xlu0 %v7851_v59, %s7173_s20  ;;  %v1884_v38 = vadd.f32 %v7450_v3, %v1757_v41  ;;  %v1758_v28 = vmul.f32 %v7442_v60, %v1358_v30  ;;  %v2334_v45 = vsel %vm2330_vm1, %v2301_v9, %v2316_v34  ;;  %v2577_v20 = vrot.slane %v7853_v44, 4 }
 0x145   : > { %v2003_v29 = vmax.f32 %v1883_v43, 0.0  ;;  %3115 = vrot.lane.b32.xlu1 %v7864_v23, %s7171_s19  ;;  %v2001_v10 = vmax.f32 %v1881_v31, 0.0  ;;  %v2006_v40 = vmax.f32 %v1886_v11, 0.0  ;;  %v1887_v47 = vadd.f32 %v7450_v3, %v1760_v12 }
 0x146   : > { %v2004_v51 = vmax.f32 %v1884_v38, 0.0  ;;  %v1885_v7 = vadd.f32 %v7450_v3, %v1758_v28  ;;  %v7888_v49 = vmax.f32 %v7791_v5, %v2334_v45  ;;  %v2668_v53 = vsel %vm2634_vm3, %v2577_v20, %v2592_v13  ;;  %v6720_v9 = vpop.f32.mrb[40].mxu0 }
 0x147   : > { %v2145_v34 = vsel %vm984_vm0, %v2003_v29, -inf  ;;  %v2139_v55 = vsel %vm984_vm0, %v2001_v10, -inf  ;;  %v2143_v0 = vsel %vm984_vm0, %v2006_v40, -inf  ;;  %v2007_v24 = vmax.f32 %v1887_v47, 0.0  ;;  %v1371_v56 = vpop.f32.mrb[41].mxu0 }
 0x148   : > { %3059 = vrot.lane.b32.xlu0 %v7812_v42, %s7172_s28  ;;  %v2144_v62 = vmax.f32 %v2142_v33, %v2143_v0  ;;  %v2137_v63 = vsel %vm984_vm0, %v2004_v51, -inf  ;;  %v2005_v5 = vmax.f32 %v1885_v7, 0.0  ;;  %v7900_v2 = vpack.c.bf16 %v7830_v39, %v7888_v49  ;;  %v6721_v8 = vpop.f32.mrb[42].mxu0 }
 0x149   : > { %v2138_v16 = vmax.f32 %v2136_v36, %v2137_v63  ;;  %v2146_v17 = vsel %vm984_vm0, %v2007_v24, -inf  ;;  %2999 = vrot.lane.b32.xlu1 %v7864_v23, %s7173_s20  ;;  %v2607_v22 = vrot.slane %v7888_v49, 4  ;;  %v2683_v57 = vsel %vm2634_vm3, %v2622_v32, %v2577_v20  ;;  %v1374_v27 = vpop.f32.mrb[43].mxu0 }
 0x14a   : > { %11052 = vst [vmem:[#allocation19_spill] sm:$0xff] %v7900_v2  ;;  %v2302_v30 = vrot.slane %v2144_v62, 1  ;;  %v2147_v33 = vmax.f32 %v2145_v34, %v2146_v17  ;;  %v2140_v41 = vsel %vm984_vm0, %v2005_v5, -inf  ;;  %v7913_v36 = vpack.c.bf16 %v7855_v58, %v7853_v44 }
 0x14b   : > { %v2272_v43 = vrot.slane %v2138_v16, 1  ;;  %v2141_v31 = vmax.f32 %v2139_v55, %v2140_v41  ;;  %v2653_v11 = vsel %vm2634_vm3, %v2592_v13, %v2607_v22  ;;  %v2638_v12 = vsel %vm2634_vm3, %v2607_v22, %v2622_v32 }
 0x14c   : > { %11053 = vst [vmem:[#allocation20_spill] sm:$0xff] %v7913_v36  ;;  %v2317_v38 = vrot.slane %v2147_v33, 1  ;;  %3061 = vrot.lane.b32.xlu0 %v7815_v46, %s7172_s28  ;;  %v7923_v28 = vpack.c.bf16 %v2653_v11, %v2668_v53  ;;  %v7925_v45 = vpack.c.bf16 %v2683_v57, %v2638_v12  ;;  %v1763_v20 = vmul.f32 %v6720_v9, %v7442_v60 }
 0x14d   : > { %v2287_v29 = vrot.slane %v2141_v31, 1  ;;  %2823 = vrot.lane.b32.xlu1 %v7840_v54, %s7172_s28  ;;  %v2456_v13 = vrot.slane %v7853_v44, 2  ;;  %v2471_v10 = vrot.slane %v7855_v58, 2  ;;  %v2486_v32 = vrot.slane %v7888_v49, 2 }
 0x14e   : > { %v2335_v40 = vsel %vm2330_vm1, %v2302_v30, %v2317_v38  ;;  %v2380_v47 = vsel %vm2330_vm1, %v2317_v38, %v2272_v43  ;;  %6814 = vmatprep.mubr.msk.bf16.mxu0 %vm984_vm0, %v7923_v28  ;;  %v1890_v51 = vadd.f32 %v7450_v3, %v1763_v20  ;;  %v1761_v7 = vmul.f32 %v7442_v60, %v1371_v56  ;;  %v6724_v53 = vpop.f32.mrb[44].mxu0 }
 0x14f   : > { %v7941_v9 = vmax.f32 %v2144_v62, %v2335_v40  ;;  %v7943_v44 = vmax.f32 %v2147_v33, %v2380_v47  ;;  %v2350_v58 = vsel %vm2330_vm1, %v2287_v29, %v2302_v30  ;;  %v2365_v49 = vsel %vm2330_vm1, %v2272_v43, %v2287_v29  ;;  %6815 = vmatmul.mubr.msk.bf16.gmra.mrb[132].mxu0 %vm984_vm0, %v7925_v45  ;;  %v1387_v34 = vpop.f32.mrb[45].mxu0 }
 0x150   : > { %v7951_v55 = vmax.f32 %v2138_v16, %v2365_v49  ;;  %v7953_v0 = vmax.f32 %v2141_v31, %v2350_v58  ;;  %3121 = vrot.lane.b32.xlu0 %v7900_v2, %s7171_s19  ;;  %v2010_v24 = vmax.f32 %v1890_v51, 0.0  ;;  %v2532_v56 = vsel %vm2513_vm2, %v2471_v10, %v2486_v32  ;;  %v6725_v62 = vpop.f32.mrb[46].mxu0 }
 0x151   : > { %v2623_v63 = vrot.slane %v7943_v44, 4  ;;  %2913 = vrot.lane.b32.xlu1 %v7812_v42, %s7171_s19  ;;  %v2547_v5 = vsel %vm2513_vm2, %v2456_v13, %v2471_v10  ;;  %v1888_v16 = vadd.f32 %v7450_v3, %v1761_v7  ;;  %v1764_v17 = vmul.f32 %v6721_v8, %v7442_v60  ;;  %v1390_v22 = vpop.f32.mrb[47].mxu0 }
 0x152   : > { %v2593_v57 = vrot.slane %v7953_v0, 4  ;;  %v2154_v30 = vsel %vm984_vm0, %v2010_v24, -inf  ;;  %v7968_v33 = vpack.c.bf16 %v2532_v56, %v2547_v5  ;;  %v1762_v41 = vmul.f32 %v7442_v60, %v1374_v27 }
 0x153   : > { %v2008_v43 = vmax.f32 %v1888_v16, 0.0  ;;  %v1891_v31 = vadd.f32 %v7450_v3, %v1764_v17  ;;  %v1767_v42 = vmul.f32 %v6724_v53, %v7442_v60  ;;  %v2501_v11 = vrot.slane %v7830_v39, 2 }
 0x154   : > { %11054 = vst [vmem:[#allocation21_spill] sm:$0xff] %v7968_v33  ;;  %3119 = vrot.lane.b32.xlu0 %v7913_v36, %s7171_s19  ;;  %v1889_v8 = vadd.f32 %v7450_v3, %v1762_v41  ;;  %v1765_v12 = vmul.f32 %v7442_v60, %v1387_v34  ;;  %v1768_v38 = vmul.f32 %v6725_v62, %v7442_v60  ;;  %v2578_v62 = vrot.slane %v7951_v55, 4 }
 0x155   : > { %v1766_v20 = vmul.f32 %v7442_v60, %v1390_v22  ;;  %2825 = vrot.lane.b32.xlu1 %v7851_v59, %s7172_s28  ;;  %v2148_v27 = vsel %vm984_vm0, %v2008_v43, -inf  ;;  %v2011_v29 = vmax.f32 %v1891_v31, 0.0  ;;  %v1894_v10 = vadd.f32 %v7450_v3, %v1767_v42 }
 0x156   : > { %v2517_v39 = vsel %vm2513_vm2, %v2486_v32, %v2501_v11  ;;  %v2009_v40 = vmax.f32 %v1889_v8, 0.0  ;;  %v2562_v47 = vsel %vm2513_vm2, %v2501_v11, %v2456_v13  ;;  %v1892_v51 = vadd.f32 %v7450_v3, %v1765_v12  ;;  %v6728_v60 = vpop.f32.mrb[48].mxu0 }
 0x157   : > { %v1895_v7 = vadd.f32 %v7450_v3, %v1768_v38  ;;  %v2157_v53 = vsel %vm984_vm0, %v2011_v29, -inf  ;;  %v2014_v58 = vmax.f32 %v1894_v10, 0.0  ;;  %v7991_v49 = vpack.c.bf16 %v2562_v47, %v2517_v39  ;;  %v1403_v24 = vpop.f32.mrb[49].mxu0 }
 0x158   : > { %v1893_v34 = vadd.f32 %v7450_v3, %v1766_v20  ;;  %3179 = vrot.lane.b32.xlu0 %v7968_v33, %s7173_s20  ;;  %v2151_v32 = vsel %vm984_vm0, %v2009_v40, -inf  ;;  %v2012_v56 = vmax.f32 %v1892_v51, 0.0  ;;  %v6729_v5 = vpop.f32.mrb[50].mxu0  ;;  %v2608_v22 = vrot.slane %v7941_v9, 4 }
 0x159   : > { %11055 = vst [vmem:[#allocation22_spill] sm:$0xff] %v7991_v49  ;;  %v2015_v13 = vmax.f32 %v1895_v7, 0.0  ;;  %v2155_v16 = vsel %vm984_vm0, %v2014_v58, -inf  ;;  %2915 = vrot.lane.b32.xlu1 %v7815_v46, %s7171_s19  ;;  %v8004_v3 = vpack.c.bf16 %v7943_v44, %v7941_v9  ;;  %v1406_v41 = vpop.f32.mrb[51].mxu0  ;;  %v2669_v11 = vsel %vm2634_vm3, %v2578_v62, %v2593_v57  ;;  %v8038_v7 = vld [vmem:[%s10950_s2] ss:$0 sm:$0xff] }
 0x15a   : > { %v2013_v17 = vmax.f32 %v1893_v34, 0.0  ;;  %v2156_v43 = vmax.f32 %v2154_v30, %v2155_v16  ;;  %v2149_v31 = vsel %vm984_vm0, %v2012_v56, -inf  ;;  %v2654_v38 = vsel %vm2634_vm3, %v2593_v57, %v2608_v22 }
 0x15b   : > { %11056 = vst [vmem:[#allocation23_spill] sm:$0xff] %v8004_v3  ;;  %v2158_v42 = vsel %vm984_vm0, %v2015_v13, -inf  ;;  %v2150_v8 = vmax.f32 %v2148_v27, %v2149_v31  ;;  %v8015_v30 = vpack.c.bf16 %v2654_v38, %v2669_v11  ;;  %v2639_v10 = vsel %vm2634_vm3, %v2608_v22, %v2623_v63 }
 0x15c   : > { %v2159_v12 = vmax.f32 %v2157_v53, %v2158_v42  ;;  %v2152_v46 = vsel %vm984_vm0, %v2013_v17, -inf  ;;  %v2303_v20 = vrot.slane %v2156_v43, 1  ;;  %3181 = vrot.lane.b32.xlu0 %v7991_v49, %s7173_s20  ;;  %v2684_v57 = vsel %vm2634_vm3, %v2623_v63, %v2578_v62 }
 0x15d   : > { %v2153_v29 = vmax.f32 %v2151_v32, %v2152_v46  ;;  %v2273_v39 = vrot.slane %v2150_v8, 1  ;;  %3005 = vrot.lane.b32.xlu1 %v7900_v2, %s7173_s20  ;;  %v8029_v40 = vpack.c.bf16 %v7953_v0, %v7951_v55  ;;  %6818 = vmatprep.mubr.msk.bf16.mxu0 %vm984_vm0, %v8015_v30  ;;  %v8033_v51 = vpack.c.bf16 %v2684_v57, %v2639_v10 }
 0x15e   : > { %v2318_v27 = vrot.slane %v2159_v12, 1  ;;  %v1771_v53 = vmul.f32 %v8038_v7, %v6728_v60  ;;  %v2457_v58 = vrot.slane %v7951_v55, 2  ;;  %v6732_v63 = vpop.f32.mrb[52].mxu0  ;;  %v2472_v56 = vrot.slane %v7953_v0, 2 }
 0x15f   : > { %11057 = vst [vmem:[#allocation24_spill] sm:$0xff] %v8029_v40  ;;  %v2288_v47 = vrot.slane %v2153_v29, 1  ;;  %v2487_v13 = vrot.slane %v7941_v9, 2  ;;  %v1419_v62 = vpop.f32.mrb[53].mxu0  ;;  %6819 = vmatmul.mubr.msk.bf16.gmra.mrb[136].mxu0 %vm984_vm0, %v8033_v51  ;;  %v8069_v9 = vld [vmem:[%s10951_s3] ss:$0 sm:$0xff]  ;;  %v1769_v38 = vmul.f32 %v8038_v7, %v1403_v24 }
 0x160   : > { %v2336_v34 = vsel %vm2330_vm1, %v2303_v20, %v2318_v27  ;;  %v2381_v32 = vsel %vm2330_vm1, %v2318_v27, %v2273_v39  ;;  %3063 = vrot.lane.b32.xlu0 %v7923_v28, %s7172_s28  ;;  %v6733_v22 = vpop.f32.mrb[54].mxu0  ;;  %v2502_v42 = vrot.slane %v7943_v44, 2  ;;  %v2548_v46 = vsel %vm2513_vm2, %v2457_v58, %v2472_v56 }
 0x161   : > { %v8048_v16 = vmax.f32 %v2156_v43, %v2336_v34  ;;  %v8050_v17 = vmax.f32 %v2159_v12, %v2381_v32  ;;  %v2351_v60 = vsel %vm2330_vm1, %v2288_v47, %v2303_v20  ;;  %v2366_v55 = vsel %vm2330_vm1, %v2273_v39, %v2288_v47  ;;  %3003 = vrot.lane.b32.xlu1 %v7913_v36, %s7173_s20  ;;  %v1422_v11 = vpop.f32.mrb[55].mxu0 }
 0x162   : > { %v8058_v31 = vmax.f32 %v2150_v8, %v2366_v55  ;;  %v8060_v0 = vmax.f32 %v2153_v29, %v2351_v60  ;;  %v1898_v43 = vadd.f32 %v8069_v9, %v1771_v53  ;;  %v2533_v12 = vsel %vm2513_vm2, %v2472_v56, %v2487_v13 }
 0x163   : > { %v2624_v8 = vrot.slane %v8050_v17, 4  ;;  %v8080_v10 = vpack.c.bf16 %v2533_v12, %v2548_v46  ;;  %v1772_v39 = vmul.f32 %v8038_v7, %v6729_v5  ;;  %v1896_v44 = vadd.f32 %v8069_v9, %v1769_v38 }
 0x164   : > { %v2594_v20 = vrot.slane %v8060_v0, 4  ;;  %v2018_v29 = vmax.f32 %v1898_v43, 0.0  ;;  %3065 = vrot.lane.b32.xlu0 %v7925_v45, %s7172_s28  ;;  %v1770_v27 = vmul.f32 %v8038_v7, %v1406_v41  ;;  %v2579_v57 = vrot.slane %v8058_v31, 4 }
 0x165   : > { %11058 = vst [vmem:[#allocation25_spill] sm:$0xff] %v8080_v10  ;;  %v2609_v47 = vrot.slane %v8048_v16, 4  ;;  %2827 = vrot.lane.b32.xlu1 %v7968_v33, %s7172_s28  ;;  %v1899_v24 = vadd.f32 %v8069_v9, %v1772_v39  ;;  %v1775_v53 = vmul.f32 %v8038_v7, %v6732_v63  ;;  %v2518_v5 = vsel %vm2513_vm2, %v2487_v13, %v2502_v42 }
 0x166   : > { %v2016_v34 = vmax.f32 %v1896_v44, 0.0  ;;  %v1897_v32 = vadd.f32 %v8069_v9, %v1770_v27  ;;  %v2670_v56 = vsel %vm2634_vm3, %v2579_v57, %v2594_v20  ;;  %v6736_v60 = vpop.f32.mrb[56].mxu0  ;;  %v2166_v13 = vsel %vm984_vm0, %v2018_v29, -inf }
 0x167   : > { %v2655_v41 = vsel %vm2634_vm3, %v2594_v20, %v2609_v47  ;;  %v2019_v55 = vmax.f32 %v1899_v24, 0.0  ;;  %v1902_v12 = vadd.f32 %v8069_v9, %v1775_v53  ;;  %v2640_v63 = vsel %vm2634_vm3, %v2609_v47, %v2624_v8  ;;  %v1435_v46 = vpop.f32.mrb[57].mxu0 }
 0x168   : > { %v8100_v43 = vpack.c.bf16 %v2655_v41, %v2670_v56  ;;  %3125 = vrot.lane.b32.xlu0 %v8004_v3, %s7171_s19  ;;  %v2160_v38 = vsel %vm984_vm0, %v2016_v34, -inf  ;;  %v2685_v20 = vsel %vm2634_vm3, %v2624_v8, %v2579_v57  ;;  %v2563_v39 = vsel %vm2513_vm2, %v2502_v42, %v2457_v58  ;;  %v6737_v44 = vpop.f32.mrb[58].mxu0 }
 0x169   : > { %2917 = vrot.lane.b32.xlu1 %v7923_v28, %s7171_s19  ;;  %v2017_v27 = vmax.f32 %v1897_v32, 0.0  ;;  %v2022_v47 = vmax.f32 %v1902_v12, 0.0  ;;  %v8117_v24 = vpack.c.bf16 %v2685_v20, %v2640_v63  ;;  %v8119_v29 = vpack.c.bf16 %v2563_v39, %v2518_v5  ;;  %v1438_v53 = vpop.f32.mrb[59].mxu0 }
 0x16a   : > { %6822 = vmatprep.mubr.msk.bf16.mxu0 %vm984_vm0, %v8100_v43  ;;  %v2169_v34 = vsel %vm984_vm0, %v2019_v55, -inf  ;;  %v1773_v8 = vmul.f32 %v8038_v7, %v1419_v62  ;;  %v1776_v58 = vmul.f32 %v8038_v7, %v6733_v22  ;;  %v1774_v42 = vmul.f32 %v8038_v7, %v1422_v11 }
 0x16b   : > { %11059 = vst [vmem:[#allocation26_spill] sm:$0xff] %v8119_v29  ;;  %v2167_v28 = vsel %vm984_vm0, %v2022_v47, -inf  ;;  %6823 = vmatmul.mubr.msk.bf16.gmra.mrb[140].mxu0 %vm984_vm0, %v8117_v24  ;;  %v8130_v57 = vpack.c.bf16 %v8050_v17, %v8048_v16  ;;  %v8134_v5 = vpack.c.bf16 %v8060_v0, %v8058_v31  ;;  %v1779_v32 = vmul.f32 %v8038_v7, %v6736_v60 }
 0x16c   : > { %3123 = vrot.lane.b32.xlu0 %v8029_v40, %s7171_s19  ;;  %v2168_v62 = vmax.f32 %v2166_v13, %v2167_v28  ;;  %v1900_v22 = vadd.f32 %v8069_v9, %v1773_v8  ;;  %v1903_v11 = vadd.f32 %v8069_v9, %v1776_v58  ;;  %v1901_v41 = vadd.f32 %v8069_v9, %v1774_v42 }
 0x16d   : > { %11060 = vst [vmem:[#allocation27_spill] sm:$0xff] %v8130_v57  ;;  %11061 = vst [vmem:[#allocation28_spill] sm:$0xff] %v8134_v5  ;;  %2829 = vrot.lane.b32.xlu1 %v7991_v49, %s7172_s28  ;;  %v2163_v56 = vsel %vm984_vm0, %v2017_v27, -inf  ;;  %v10969_v55 = vrot.slane %v8058_v31, 2  ;;  %v2473_v12 = vrot.slane %v8060_v0, 2  ;;  %v2488_v60 = vrot.slane %v8048_v16, 2 }
 0x16e   : > { %v2020_v63 = vmax.f32 %v1900_v22, 0.0  ;;  %v2023_v20 = vmax.f32 %v1903_v11, 0.0  ;;  %v2021_v13 = vmax.f32 %v1901_v41, 0.0  ;;  %v1906_v39 = vadd.f32 %v8069_v9, %v1779_v32  ;;  %v6740_v47 = vpop.f32.mrb[60].mxu0 }
 0x16f   : > { %v2534_v8 = vsel %vm2513_vm2, %v2473_v12, %v2488_v60  ;;  %v2549_v27 = vsel %vm2513_vm2, %v10969_v55, %v2473_v12  ;;  %v1777_v58 = vmul.f32 %v8038_v7, %v1435_v46  ;;  %v1451_v42 = vpop.f32.mrb[61].mxu0  ;;  %v2304_v11 = vrot.slane %v2168_v62, 1 }
 0x170   : > { %3183 = vrot.lane.b32.xlu0 %v8080_v10, %s7173_s20  ;;  %v2161_v16 = vsel %vm984_vm0, %v2020_v63, -inf  ;;  %v2170_v0 = vsel %vm984_vm0, %v2023_v20, -inf  ;;  %v2164_v28 = vsel %vm984_vm0, %v2021_v13, -inf  ;;  %v8161_v32 = vpack.c.bf16 %v2534_v8, %v2549_v27  ;;  %v6741_v22 = vpop.f32.mrb[62].mxu0 }
 0x171   : > { %2919 = vrot.lane.b32.xlu1 %v7925_v45, %s7171_s19  ;;  %v2162_v41 = vmax.f32 %v2160_v38, %v2161_v16  ;;  %v2171_v12 = vmax.f32 %v2169_v34, %v2170_v0  ;;  %v2165_v46 = vmax.f32 %v2163_v56, %v2164_v28  ;;  %v1454_v55 = vpop.f32.mrb[63].mxu0  ;;  %v2026_v35 = vmax.f32 %v1906_v39, 0.0 }
 0x172   : > { %11062 = vst [vmem:[#allocation29_spill] sm:$0xff] %v8161_v32  ;;  %v1780_v4 = vmul.f32 %v8038_v7, %v6737_v44  ;;  %v1778_v63 = vmul.f32 %v8038_v7, %v1438_v53  ;;  %v1783_v20 = vmul.f32 %v8038_v7, %v6740_v47  ;;  %v1904_v27 = vadd.f32 %v8069_v9, %v1777_v58 }
 0x173   : > { %v2274_v61 = vrot.slane %v2162_v41, 1  ;;  %v2319_v13 = vrot.slane %v2171_v12, 1  ;;  %v2289_v8 = vrot.slane %v2165_v46, 1  ;;  %v2503_v44 = vrot.slane %v8050_v17, 2 }
 0x174   : > { %3185 = vrot.lane.b32.xlu0 %v8119_v29, %s7173_s20  ;;  %v1907_v45 = vadd.f32 %v8069_v9, %v1780_v4  ;;  %v1905_v38 = vadd.f32 %v8069_v9, %v1778_v63  ;;  %v1910_v34 = vadd.f32 %v8069_v9, %v1783_v20  ;;  %v2178_v28 = vsel %vm984_vm0, %v2026_v35, -inf }
 0x175   : > { %v2337_v53 = vsel %vm2330_vm1, %v2304_v11, %v2319_v13  ;;  %v2382_v56 = vsel %vm2330_vm1, %v2319_v13, %v2274_v61  ;;  %v2352_v39 = vsel %vm2330_vm1, %v2289_v8, %v2304_v11  ;;  %v2367_v47 = vsel %vm2330_vm1, %v2274_v61, %v2289_v8  ;;  %3009 = vrot.lane.b32.xlu1 %v8004_v3, %s7173_s20 }
 0x176   : > { %v8185_v4 = vmax.f32 %v2168_v62, %v2337_v53  ;;  %v8187_v58 = vmax.f32 %v2171_v12, %v2382_v56  ;;  %v8189_v17 = vmax.f32 %v2162_v41, %v2367_v47  ;;  %v8191_v16 = vmax.f32 %v2165_v46, %v2352_v39  ;;  %v6744_v0 = vpop.f32.mrb[64].mxu0 }
 0x177   : > { %v2024_v63 = vmax.f32 %v1904_v27, 0.0  ;;  %v2030_v20 = vmax.f32 %v1910_v34, 0.0  ;;  %v1467_v11 = vpop.f32.mrb[65].mxu0  ;;  %v2027_v46 = vmax.f32 %v1907_v45, 0.0  ;;  %v2025_v35 = vmax.f32 %v1905_v38, 0.0 }
 0x178   : > { %v2625_v13 = vrot.slane %v8187_v58, 4  ;;  %v2595_v61 = vrot.slane %v8191_v16, 4  ;;  %3067 = vrot.lane.b32.xlu0 %v8015_v30, %s7172_s28  ;;  %v2580_v62 = vrot.slane %v8189_v17, 4  ;;  %v2610_v41 = vrot.slane %v8185_v4, 4  ;;  %v6745_v12 = vpop.f32.mrb[66].mxu0 }
 0x179   : > { %3007 = vrot.lane.b32.xlu1 %v8029_v40, %s7173_s20  ;;  %v2179_v8 = vsel %vm984_vm0, %v2030_v20, -inf  ;;  %v2519_v27 = vsel %vm2513_vm2, %v2488_v60, %v2503_v44  ;;  %v1470_v34 = vpop.f32.mrb[67].mxu0  ;;  %v11063_v38 = vrot.slane %v8058_v31, 2  ;;  %v1781_v20 = vmul.f32 %v8038_v7, %v1451_v42 }
 0x17a   : > { %v2656_v53 = vsel %vm2634_vm3, %v2595_v61, %v2610_v41  ;;  %v2671_v56 = vsel %vm2634_vm3, %v2580_v62, %v2595_v61  ;;  %v8209_v39 = vmax.f32 %v2178_v28, %v2179_v8  ;;  %v2641_v47 = vsel %vm2634_vm3, %v2610_v41, %v2625_v13 }
 0x17b   : > { %v8213_v3 = vpack.c.bf16 %v2656_v53, %v2671_v56  ;;  %v2686_v45 = vsel %vm2634_vm3, %v2625_v13, %v2580_v62  ;;  %v2564_v60 = vsel %vm2513_vm2, %v2503_v44, %v11063_v38  ;;  %v1784_v41 = vmul.f32 %v8038_v7, %v6741_v22 }
 0x17c   : > { %3069 = vrot.lane.b32.xlu0 %v8033_v51, %s7172_s28  ;;  %v8224_v28 = vpack.c.bf16 %v2686_v45, %v2641_v47  ;;  %v8226_v61 = vpack.c.bf16 %v2564_v60, %v2519_v27  ;;  %v2172_v13 = vsel %vm984_vm0, %v2024_v63, -inf  ;;  %v2181_v31 = vsel %vm984_vm0, %v2027_v46, -inf }
 0x17d   : > { %2831 = vrot.lane.b32.xlu1 %v8080_v10, %s7172_s28  ;;  %6826 = vmatprep.mubr.msk.bf16.mxu0 %vm984_vm0, %v8213_v3  ;;  %v1908_v42 = vadd.f32 %v8069_v9, %v1781_v20  ;;  %v1782_v44 = vmul.f32 %v8038_v7, %v1454_v55  ;;  %v2175_v62 = vsel %vm984_vm0, %v2025_v35, -inf  ;;  %v1911_v22 = vadd.f32 %v8069_v9, %v1784_v41 }
 0x17e   : > { %11064 = vst [vmem:[#allocation30_spill] sm:$0xff] %v8226_v61  ;;  %6827 = vmatmul.mubr.msk.bf16.gmra.mrb[144].mxu0 %vm984_vm0, %v8224_v28  ;;  %v8243_v8 = vpack.c.bf16 %v8187_v58, %v8185_v4  ;;  %v8247_v63 = vpack.c.bf16 %v8191_v16, %v8189_v17  ;;  %v6748_v46 = vpop.f32.mrb[68].mxu0  ;;  %v1787_v55 = vmul.f32 %v8038_v7, %v6744_v0  ;;  %v2459_v35 = vrot.slane %v8189_v17, 2 }
 0x17f   : > { %v2028_v27 = vmax.f32 %v1908_v42, 0.0  ;;  %v1909_v53 = vadd.f32 %v8069_v9, %v1782_v44  ;;  %v8252_v56 = vpop.f32.mrb[69].mxu0  ;;  %v2031_v47 = vmax.f32 %v1911_v22, 0.0  ;;  %v2474_v45 = vrot.slane %v8191_v16, 2 }
 0x180   : > { %11065 = vst [vmem:[#allocation31_spill] sm:$0xff] %v8243_v8  ;;  %11066 = vst [vmem:[#allocation32_spill] sm:$0xff] %v8247_v63  ;;  %3129 = vrot.lane.b32.xlu0 %v8130_v57, %s7171_s19  ;;  %v2489_v38 = vrot.slane %v8185_v4, 2  ;;  %v1785_v60 = vmul.f32 %v8038_v7, %v1467_v11  ;;  %v8259_v20 = vpop.f32.mrb[70].mxu0  ;;  %v1914_v41 = vadd.f32 %v8069_v9, %v1787_v55 }
 0x181   : > { %2921 = vrot.lane.b32.xlu1 %v8015_v30, %s7171_s19  ;;  %v2173_v0 = vsel %vm984_vm0, %v2028_v27, -inf  ;;  %v2029_v17 = vmax.f32 %v1909_v53, 0.0  ;;  %v1788_v42 = vmul.f32 %v8038_v7, %v6745_v12  ;;  %v8266_v44 = vpop.f32.mrb[71].mxu0  ;;  %v2182_v16 = vsel %vm984_vm0, %v2031_v47, -inf }
 0x182   : > { %v2174_v22 = vmax.f32 %v2172_v13, %v2173_v0  ;;  %v2535_v4 = vsel %vm2513_vm2, %v2474_v45, %v2489_v38  ;;  %v2550_v11 = vsel %vm2513_vm2, %v2459_v35, %v2474_v45  ;;  %v2305_v30 = vrot.slane %v8209_v39, 1 }
 0x183   : > { %v2183_v37 = vmax.f32 %v2181_v31, %v2182_v16  ;;  %v2176_v27 = vsel %vm984_vm0, %v2029_v17, -inf  ;;  %v8275_v53 = vpack.c.bf16 %v2535_v4, %v2550_v11  ;;  %v2034_v47 = vmax.f32 %v1914_v41, 0.0 }
 0x184   : > { %3127 = vrot.lane.b32.xlu0 %v8134_v5, %s7171_s19  ;;  %v2275_v12 = vrot.slane %v2174_v22, 1  ;;  %v2177_v13 = vmax.f32 %v2175_v62, %v2176_v27  ;;  %v1786_v0 = vmul.f32 %v8038_v7, %v1470_v34  ;;  %v1791_v45 = vmul.f32 %v8038_v7, %v6748_v46 }
 0x185   : > { %11067 = vst [vmem:[#allocation33_spill] sm:$0xff] %v8275_v53  ;;  %2833 = vrot.lane.b32.xlu1 %v8119_v29, %s7172_s28  ;;  %v2320_v55 = vrot.slane %v2183_v37, 1  ;;  %v1912_v31 = vadd.f32 %v8069_v9, %v1785_v60  ;;  %v1915_v17 = vadd.f32 %v8069_v9, %v1788_v42  ;;  %v2504_v16 = vrot.slane %v8187_v58, 2 }
 0x186   : > { %v2290_v50 = vrot.slane %v2177_v13, 1  ;;  %v6752_v4 = vpop.f32.mrb[72].mxu0  ;;  %v1913_v41 = vadd.f32 %v8069_v9, %v1786_v0  ;;  %v1918_v34 = vadd.f32 %v8069_v9, %v1791_v45 }
 0x187   : > { %v2338_v62 = vsel %vm2330_vm1, %v2305_v30, %v2320_v55  ;;  %v2383_v11 = vsel %vm2330_vm1, %v2320_v55, %v2275_v12  ;;  %v1499_v27 = vpop.f32.mrb[73].mxu0  ;;  %v8309_v48 = vpop.permute.xlu1 %2905 }
 0x188   : > { %3187 = vrot.lane.b32.xlu0 %v8161_v32, %s7173_s20  ;;  %v8295_v46 = vmax.f32 %v8209_v39, %v2338_v62  ;;  %v8297_v60 = vmax.f32 %v2183_v37, %v2383_v11  ;;  %v2353_v58 = vsel %vm2330_vm1, %v2290_v50, %v2305_v30  ;;  %v2368_v42 = vsel %vm2330_vm1, %v2275_v12, %v2290_v50  ;;  %v8303_v55 = vpop.f32.mrb[74].mxu0 }
 0x189   : > { %2923 = vrot.lane.b32.xlu1 %v8033_v51, %s7171_s19  ;;  %v8307_v0 = vmax.f32 %v2174_v22, %v2368_v42  ;;  %v2420_v45 = vmax.f32 %v2177_v13, %v2353_v58  ;;  %v2190_v39 = vsel %vm984_vm0, %v2034_v47, -inf  ;;  %v8312_v37 = vpop.f32.mrb[75].mxu0  ;;  %v2032_v30 = vmax.f32 %v1912_v31, 0.0 }
 0x18a   : > { %v2626_v62 = vrot.slane %v8297_v60, 4  ;;  %v2611_v11 = vrot.slane %v8295_v46, 4  ;;  %v2038_v50 = vmax.f32 %v1918_v34, 0.0  ;;  %v2520_v51 = vsel %vm2513_vm2, %v2489_v38, %v2504_v16 }
 0x18b   : > { %v2596_v12 = vrot.slane %v2420_v45, 4  ;;  %v2581_v40 = vrot.slane %v8307_v0, 4  ;;  %v2565_v22 = vsel %vm2513_vm2, %v2504_v16, %v2459_v35  ;;  %v2035_v13 = vmax.f32 %v1915_v17, 0.0 }
 0x18c   : > { %3189 = vrot.lane.b32.xlu0 %v8226_v61, %s7173_s20  ;;  %v2033_v47 = vmax.f32 %v1913_v41, 0.0  ;;  %v2191_v58 = vsel %vm984_vm0, %v2038_v50, -inf  ;;  %v2642_v31 = vsel %vm2634_vm3, %v2611_v11, %v2626_v62  ;;  %v8340_v42 = vpack.c.bf16 %v2565_v22, %v2520_v51 }
 0x18d   : > { %3013 = vrot.lane.b32.xlu1 %v8130_v57, %s7173_s20  ;;  %v2657_v34 = vsel %vm2634_vm3, %v2596_v12, %v2611_v11  ;;  %v2672_v38 = vsel %vm2634_vm3, %v2581_v40, %v2596_v12  ;;  %v8332_v35 = vmax.f32 %v2190_v39, %v2191_v58  ;;  %v2687_v17 = vsel %vm2634_vm3, %v2626_v62, %v2581_v40 }
 0x18e   : > { %v8336_v16 = vpack.c.bf16 %v2657_v34, %v2672_v38  ;;  %v8338_v41 = vpack.c.bf16 %v2687_v17, %v2642_v31  ;;  %11068 = vst [vmem:[#allocation34_spill] sm:$0xff] %v8340_v42  ;;  %v1789_v50 = vmul.f32 %v8038_v7, %v8252_v56  ;;  %v6756_v57 = vpop.f32.mrb[76].mxu0  ;;  %v2184_v11 = vsel %vm984_vm0, %v2032_v30, -inf }
 0x18f   : > { %v8344_v2 = vpop.permute.xlu1 %2817  ;;  %v1792_v39 = vmul.f32 %v8038_v7, %v8259_v20  ;;  %v1790_v40 = vmul.f32 %v8038_v7, %v8266_v44  ;;  %v8353_v62 = vpack.c.bf16 %v8297_v60, %v8295_v46  ;;  %v8355_v12 = vpop.f32.mrb[77].mxu0  ;;  %v2193_v56 = vsel %vm984_vm0, %v2035_v13, -inf }
 0x190   : > { %3071 = vrot.lane.b32.xlu0 %v8100_v43, %s7172_s28  ;;  %6830 = vmatprep.mubr.msk.bf16.mxu0 %vm984_vm0, %v8336_v16  ;;  %v1916_v30 = vadd.f32 %v8069_v9, %v1789_v50  ;;  %v8364_v20 = vpack.c.bf16 %v2420_v45, %v8307_v0  ;;  %v8367_v51 = vpop.f32.mrb[78].mxu0  ;;  %v1795_v58 = vmul.f32 %v8038_v7, %v6752_v4  ;;  %v2475_v31 = vrot.slane %v2420_v45, 2 }
 0x191   : > { %11069 = vst [vmem:[#allocation35_spill] sm:$0xff] %v8353_v62  ;;  %3011 = vrot.lane.b32.xlu1 %v8134_v5, %s7173_s20  ;;  %6831 = vmatmul.mubr.msk.bf16.gmra.mrb[148].mxu0 %vm984_vm0, %v8338_v41  ;;  %v1919_v22 = vadd.f32 %v8069_v9, %v1792_v39  ;;  %v1917_v13 = vadd.f32 %v8069_v9, %v1790_v40  ;;  %v8376_v34 = vpop.f32.mrb[79].mxu0  ;;  %v2187_v38 = vsel %vm984_vm0, %v2033_v47, -inf  ;;  %v2490_v50 = vrot.slane %v8295_v46, 2 }
 0x192   : > { %11070 = vst [vmem:[#allocation36_spill] sm:$0xff] %v8364_v20  ;;  %v2036_v17 = vmax.f32 %v1916_v30, 0.0  ;;  %v1793_v44 = vmul.f32 %v8038_v7, %v1499_v27  ;;  %v1922_v39 = vadd.f32 %v8069_v9, %v1795_v58  ;;  %v11071_v40 = vrot.slane %v8307_v0, 2 }
 0x193   : > { %v8381_v5 = vpop.permute.xlu1 %2907  ;;  %v2039_v29 = vmax.f32 %v1919_v22, 0.0  ;;  %v2037_v10 = vmax.f32 %v1917_v13, 0.0  ;;  %v2536_v46 = vsel %vm2513_vm2, %v2475_v31, %v2490_v50  ;;  %v1796_v27 = vmul.f32 %v8038_v7, %v8303_v55 }
 0x194   : > { %v2551_v4 = vsel %vm2513_vm2, %v11071_v40, %v2475_v31  ;;  %3073 = vrot.lane.b32.xlu0 %v8117_v24, %s7172_s28  ;;  %v2185_v45 = vsel %vm984_vm0, %v2036_v17, -inf  ;;  %v8400_v13 = vadd.f32 %v8069_v9, %v1793_v44  ;;  %v2306_v58 = vrot.slane %v8332_v35, 1 }
 0x195   : > { %2835 = vrot.lane.b32.xlu1 %v8161_v32, %s7172_s28  ;;  %v2186_v47 = vmax.f32 %v2184_v11, %v2185_v45  ;;  %v2194_v30 = vsel %vm984_vm0, %v2039_v29, -inf  ;;  %v2188_v22 = vsel %vm984_vm0, %v2037_v10, -inf  ;;  %v8403_v36 = vpack.c.bf16 %v2536_v46, %v2551_v4  ;;  %v2816_v32 = vpop.permute.xlu0 %2815 }
 0x196   : > { %v2195_v17 = vmax.f32 %v2193_v56, %v2194_v30  ;;  %v2189_v40 = vmax.f32 %v2187_v38, %v2188_v22  ;;  %v8405_v31 = vpop.f32.mrb[80].mxu0  ;;  %v8409_v55 = vpack.c.bf16 %v7532_v19, %v7530_v18  ;;  %v2042_v45 = vmax.f32 %v1922_v39, 0.0 }
 0x197   : > { %11072 = vst [vmem:[#allocation37_spill] sm:$0xff] %v8403_v36  ;;  %v8411_v11 = vpop.permute.xlu1 %2997  ;;  %v2276_v29 = vrot.slane %v2186_v47, 1  ;;  %v8413_v10 = vpop.f32.mrb[81].mxu0  ;;  %v1794_v38 = vmul.f32 %v8038_v7, %v8312_v37  ;;  %v1799_v4 = vmul.f32 %v8038_v7, %v6756_v57  ;;  %v8424_v18 = vpack.c.bf16 %v7524_v15, %v7522_v14 }
 0x198   : > { %11073 = vst [vmem:[#allocation38_spill] sm:$0xff] %v8409_v55  ;;  %3133 = vrot.lane.b32.xlu0 %v8243_v8, %s7171_s19  ;;  %v2321_v44 = vrot.slane %v2195_v17, 1  ;;  %v2291_v56 = vrot.slane %v2189_v40, 1  ;;  %v8420_v46 = vpop.f32.mrb[82].mxu0  ;;  %v2040_v19 = vmax.f32 %v8400_v13, 0.0  ;;  %v1923_v39 = vadd.f32 %v8069_v9, %v1796_v27 }
 0x199   : > { %11074 = vst [vmem:[#allocation39_spill] sm:$0xff] %v8424_v18  ;;  %2925 = vrot.lane.b32.xlu1 %v8100_v43, %s7171_s19  ;;  %v2505_v30 = vrot.slane %v8297_v60, 2  ;;  %v8431_v22 = vpop.f32.mrb[83].mxu0  ;;  %v1926_v49 = vadd.f32 %v8069_v9, %v1799_v4 }
 0x19a   : > { %v2339_v57 = vsel %vm2330_vm1, %v2306_v58, %v2321_v44  ;;  %v2384_v37 = vsel %vm2330_vm1, %v2321_v44, %v2276_v29  ;;  %v2354_v14 = vsel %vm2330_vm1, %v2291_v56, %v2306_v58  ;;  %v2369_v15 = vsel %vm2330_vm1, %v2276_v29, %v2291_v56 }
 0x19b   : > { %v8442_v43 = vmax.f32 %v8332_v35, %v2339_v57  ;;  %v8444_v27 = vmax.f32 %v2195_v17, %v2384_v37  ;;  %v8446_v60 = vmax.f32 %v2186_v47, %v2369_v15  ;;  %v8448_v13 = vmax.f32 %v2189_v40, %v2354_v14  ;;  %v8459_v47 = vpop.permute.xlu1 %2995 }
 0x19c   : > { %3131 = vrot.lane.b32.xlu0 %v8247_v63, %s7171_s19  ;;  %v2202_v44 = vsel %vm984_vm0, %v2042_v45, -inf  ;;  %v1921_v58 = vadd.f32 %v8069_v9, %v1794_v38  ;;  %v1797_v35 = vmul.f32 %v8038_v7, %v8355_v12  ;;  %v2043_v56 = vmax.f32 %v1923_v39, 0.0 }
 0x19d   : > { %2837 = vrot.lane.b32.xlu1 %v8226_v61, %s7172_s28  ;;  %v2627_v17 = vrot.slane %v8444_v27, 4  ;;  %v2597_v40 = vrot.slane %v8448_v13, 4  ;;  %v2582_v29 = vrot.slane %v8446_v60, 4  ;;  %v2612_v45 = vrot.slane %v8442_v43, 4 }
 0x19e   : > { %v2046_v38 = vmax.f32 %v1926_v49, 0.0  ;;  %v2521_v4 = vsel %vm2513_vm2, %v2490_v50, %v2505_v30  ;;  %v11075_v12 = vrot.slane %v8307_v0, 2  ;;  %v8471_v37 = vpop.f32.mrb[84].mxu0  ;;  %v3056_v0 = vpop.permute.xlu0 %3055 }
 0x19f   : > { %v2658_v14 = vsel %vm2634_vm3, %v2597_v40, %v2612_v45  ;;  %v2673_v15 = vsel %vm2634_vm3, %v2582_v29, %v2597_v40  ;;  %v2643_v39 = vsel %vm2634_vm3, %v2612_v45, %v2627_v17  ;;  %v2688_v49 = vsel %vm2634_vm3, %v2627_v17, %v2582_v29  ;;  %v8481_v50 = vpop.f32.mrb[85].mxu0 }
 0x1a0   : > { %v2566_v57 = vsel %vm2513_vm2, %v2505_v30, %v11075_v12  ;;  %3191 = vrot.lane.b32.xlu0 %v8275_v53, %s7173_s20  ;;  %v2041_v30 = vmax.f32 %v1921_v58, 0.0  ;;  %v8485_v12 = vpack.c.bf16 %v2658_v14, %v2673_v15  ;;  %v2203_v61 = vsel %vm984_vm0, %v2046_v38, -inf  ;;  %v8490_v40 = vpop.f32.mrb[86].mxu0 }
 0x1a1   : > { %v8488_v33 = vpack.c.bf16 %v2688_v49, %v2643_v39  ;;  %2927 = vrot.lane.b32.xlu1 %v8117_v24, %s7171_s19  ;;  %v8494_v45 = vmax.f32 %v2202_v44, %v2203_v61  ;;  %v8496_v17 = vpack.c.bf16 %v2566_v57, %v2521_v4  ;;  %v1924_v29 = vadd.f32 %v8069_v9, %v1797_v35  ;;  %v8501_v14 = vpop.f32.mrb[87].mxu0 }
 0x1a2   : > { %11076 = vst [vmem:[#allocation40_spill] sm:$0xff] %v8485_v12  ;;  %v1800_v58 = vmul.f32 %v8038_v7, %v8367_v51  ;;  %v3237_v38 = vsel %vm984_vm0, %v8409_v55, %v2816_v32  ;;  %v3240_v15 = vsel %vm984_vm0, %v8424_v18, %v8344_v2  ;;  %6834 = vmatprep.mubr.msk.bf16.mxu0 %vm984_vm0, %v8485_v12  ;;  %v2196_v44 = vsel %vm984_vm0, %v2040_v19, -inf  ;;  %v3058_v49 = vpop.permute.xlu0 %3057 }
 0x1a3   : > { %11077 = vst [vmem:[#allocation41_spill] sm:$0xff] %v8488_v33  ;;  %11078 = vst [vmem:[#allocation42_spill] sm:$0xff] %v8496_v17  ;;  %v1798_v24 = vmul.f32 %v8038_v7, %v8376_v34  ;;  %v2820_v61 = vpop.permute.xlu1 %2819  ;;  %6835 = vmatmul.mubr.msk.bf16.gmra.mrb[152].mxu0 %vm984_vm0, %v8488_v33  ;;  %v2044_v51 = vmax.f32 %v1924_v29, 0.0  ;;  %v1803_v35 = vmul.f32 %v8038_v7, %v8405_v31  ;;  %v2205_v34 = vsel %vm984_vm0, %v2043_v56, -inf }
 0x1a4   : > { %v1927_v32 = vadd.f32 %v8069_v9, %v1800_v58  ;;  %v8520_v2 = vsel %vm3325_vm4, %v3240_v15, %v8381_v5  ;;  %v8524_v4 = vsel %vm984_vm0, %v7744_v21, %v3056_v0  ;;  %3193 = vrot.lane.b32.xlu0 %v8340_v42, %s7173_s20  ;;  %v2199_v31 = vsel %vm984_vm0, %v2041_v30, -inf }
 0x1a5   : > { %v1925_v19 = vadd.f32 %v8069_v9, %v1798_v24  ;;  %3017 = vrot.lane.b32.xlu1 %v8243_v8, %s7173_s20  ;;  %v2197_v57 = vsel %vm984_vm0, %v2044_v51, -inf  ;;  %v1801_v39 = vmul.f32 %v8038_v7, %v8413_v10  ;;  %v1804_v58 = vmul.f32 %v8038_v7, %v8420_v46 }
 0x1a6   : > { %v2047_v5 = vmax.f32 %v1927_v32, 0.0  ;;  %v2198_v0 = vmax.f32 %v2196_v44, %v2197_v57  ;;  %v8540_v56 = vpack.c.bf16 %v8444_v27, %v8442_v43  ;;  %v6768_v15 = vpop.f32.mrb[88].mxu0  ;;  %v2307_v30 = vrot.slane %v8494_v45, 1 }
 0x1a7   : > { %v2045_v29 = vmax.f32 %v1925_v19, 0.0  ;;  %v8542_v24 = vpop.permute.xlu1 %2909  ;;  %v1930_v32 = vadd.f32 %v8069_v9, %v1803_v35  ;;  %v1928_v10 = vadd.f32 %v8069_v9, %v1801_v39  ;;  %v1563_v44 = vpop.f32.mrb[89].mxu0  ;;  %v1802_v21 = vmul.f32 %v8038_v7, %v8431_v22 }
 0x1a8   : > { %11079 = vst [vmem:[#allocation43_spill] sm:$0xff] %v8540_v56  ;;  %v2206_v51 = vsel %vm984_vm0, %v2047_v5, -inf  ;;  %3075 = vrot.lane.b32.xlu0 %v8213_v3, %s7172_s28  ;;  %v2277_v46 = vrot.slane %v2198_v0, 1  ;;  %v6769_v18 = vpop.f32.mrb[90].mxu0  ;;  %v8555_v55 = vsel %vm984_vm0, %v7772_v52, %v3058_v49  ;;  %v3327_v35 = vsel %vm3325_vm4, %v3237_v38, %v8309_v48 }
 0x1a9   : > { %v2207_v19 = vmax.f32 %v2205_v34, %v2206_v51  ;;  %v2200_v57 = vsel %vm984_vm0, %v2045_v29, -inf  ;;  %3015 = vrot.lane.b32.xlu1 %v8247_v63, %s7173_s20  ;;  %v8561_v39 = vpop.f32.mrb[91].mxu0  ;;  %v8565_v29 = vsel %vm3386_vm5, %v3327_v35, %v8459_v47  ;;  %v1931_v22 = vadd.f32 %v8069_v9, %v1804_v58 }
 0x1aa   : > { %v2201_v5 = vmax.f32 %v2199_v31, %v2200_v57  ;;  %v1807_v49 = vmul.f32 %v8038_v7, %v8471_v37  ;;  %v8572_v51 = vsel %vm984_vm0, %v7670_v1, %v2820_v61  ;;  %v2050_v38 = vmax.f32 %v1930_v32, 0.0  ;;  %v3118_v47 = vpop.permute.xlu0 %3117 }
 0x1ab   : > { %v2322_v34 = vrot.slane %v2207_v19, 1  ;;  %v8574_v52 = vpop.permute.xlu1 %2821  ;;  %v1805_v31 = vmul.f32 %v8038_v7, %v8481_v50  ;;  %v2048_v57 = vmax.f32 %v1928_v10, 0.0  ;;  %v1929_v61 = vadd.f32 %v8069_v9, %v1802_v21 }
 0x1ac   : > { %v2292_v48 = vrot.slane %v2201_v5, 1  ;;  %3077 = vrot.lane.b32.xlu0 %v8224_v28, %s7172_s28  ;;  %v2051_v10 = vmax.f32 %v1931_v22, 0.0  ;;  %v1934_v21 = vadd.f32 %v8069_v9, %v1807_v49  ;;  %v1806_v49 = vmul.f32 %v8038_v7, %v8501_v14 }
 0x1ad   : > { %v2340_v58 = vsel %vm2330_vm1, %v2307_v30, %v2322_v34  ;;  %v2385_v37 = vsel %vm2330_vm1, %v2322_v34, %v2277_v46  ;;  %2839 = vrot.lane.b32.xlu1 %v8275_v53, %s7172_s28 }
 0x1ae   : > { %v8588_v32 = vmax.f32 %v8494_v45, %v2340_v58  ;;  %v8590_v50 = vmax.f32 %v2207_v19, %v2385_v37  ;;  %v2355_v35 = vsel %vm2330_vm1, %v2292_v48, %v2307_v30  ;;  %v2370_v1 = vsel %vm2330_vm1, %v2277_v46, %v2292_v48  ;;  %v8601_v63 = vpop.f32.mrb[92].mxu0 }
 0x1af   : > { %v8596_v8 = vmax.f32 %v2198_v0, %v2370_v1  ;;  %v8598_v34 = vmax.f32 %v2201_v5, %v2355_v35  ;;  %v8603_v53 = vpop.permute.xlu1 %2911  ;;  %v2214_v45 = vsel %vm984_vm0, %v2050_v38, -inf  ;;  %v1932_v19 = vadd.f32 %v8069_v9, %v1805_v31  ;;  %v8613_v0 = vpop.f32.mrb[93].mxu0 }
 0x1b0   : > { %v1808_v30 = vmul.f32 %v8038_v7, %v8490_v40  ;;  %v8611_v1 = vpack.c.bf16 %v8448_v13, %v8446_v60  ;;  %3137 = vrot.lane.b32.xlu0 %v8353_v62, %s7171_s19  ;;  %v2208_v46 = vsel %vm984_vm0, %v2048_v57, -inf  ;;  %v2049_v5 = vmax.f32 %v1929_v61, 0.0  ;;  %v8620_v48 = vpop.f32.mrb[94].mxu0 }
 0x1b1   : > { %11080 = vst [vmem:[#allocation44_spill] sm:$0xff] %v8598_v34  ;;  %v2054_v22 = vmax.f32 %v1934_v21, 0.0  ;;  %2929 = vrot.lane.b32.xlu1 %v8213_v3, %s7171_s19  ;;  %v2052_v40 = vmax.f32 %v1932_v19, 0.0  ;;  %v1811_v31 = vmul.f32 %v8038_v7, %v6768_v15  ;;  %v1809_v58 = vmul.f32 %v8038_v7, %v1563_v44  ;;  %v8627_v37 = vpop.f32.mrb[95].mxu0 }
 0x1b2   : > { %11081 = vst [vmem:[#allocation45_spill] sm:$0xff] %v8611_v1  ;;  %v1935_v38 = vadd.f32 %v8069_v9, %v1808_v30  ;;  %v3176_v57 = vpop.permute.xlu0 %3175  ;;  %v8632_v61 = vsel %vm3386_vm5, %v8520_v2, %v8411_v11  ;;  %v2217_v14 = vsel %vm984_vm0, %v2051_v10, -inf  ;;  %v1933_v3 = vadd.f32 %v8069_v9, %v1806_v49 }
 0x1b3   : > { %v2215_v35 = vsel %vm984_vm0, %v2054_v22, -inf  ;;  %v8637_v21 = vpop.permute.xlu1 %3001  ;;  %v2209_v15 = vsel %vm984_vm0, %v2052_v40, -inf  ;;  %v1812_v30 = vmul.f32 %v8038_v7, %v6769_v18  ;;  %v2211_v11 = vsel %vm984_vm0, %v2049_v5, -inf }
 0x1b4   : > { %v2216_v19 = vmax.f32 %v2214_v45, %v2215_v35  ;;  %v2055_v44 = vmax.f32 %v1935_v38, 0.0  ;;  %3135 = vrot.lane.b32.xlu0 %v8364_v20, %s7171_s19  ;;  %v2210_v2 = vmax.f32 %v2208_v46, %v2209_v15  ;;  %v2053_v33 = vmax.f32 %v1933_v3, 0.0 }
 0x1b5   : > { %v1938_v10 = vadd.f32 %v8069_v9, %v1811_v31  ;;  %2841 = vrot.lane.b32.xlu1 %v8340_v42, %s7172_s28  ;;  %v1936_v45 = vadd.f32 %v8069_v9, %v1809_v58  ;;  %v2476_v18 = vrot.slane %v8448_v13, 2  ;;  %v3570_v31 = vsel %vm3325_vm4, %v8555_v55, %v3118_v47 }
 0x1b6   : > { %v2218_v22 = vsel %vm984_vm0, %v2055_v44, -inf  ;;  %v3178_v40 = vpop.permute.xlu0 %3177  ;;  %v2308_v38 = vrot.slane %v2216_v19, 1  ;;  %v2278_v35 = vrot.slane %v2210_v2, 1  ;;  %v2212_v46 = vsel %vm984_vm0, %v2053_v33, -inf  ;;  %v8652_v5 = vpop.f32.mrb[96].mxu0 }
 0x1b7   : > { %v2219_v12 = vmax.f32 %v2217_v14, %v2218_v22  ;;  %v3116_v3 = vpop.permute.xlu1 %3115  ;;  %v2598_v15 = vrot.slane %v8598_v34, 4  ;;  %v2213_v44 = vmax.f32 %v2211_v11, %v2212_v46  ;;  %v1939_v58 = vadd.f32 %v8069_v9, %v1812_v30  ;;  %v8658_v49 = vpop.f32.mrb[97].mxu0 }
 0x1b8   : > { %3195 = vrot.lane.b32.xlu0 %v8403_v36, %s7173_s20  ;;  %v3568_v13 = vsel %vm3325_vm4, %v8524_v4, %v3116_v3  ;;  %v2058_v14 = vmax.f32 %v1938_v10, 0.0  ;;  %v11009_v22 = vrot.slane %v8442_v43, 2  ;;  %v8665_v42 = vpop.f32.mrb[98].mxu0  ;;  %v2056_v30 = vmax.f32 %v1936_v45, 0.0 }
 0x1b9   : > { %v2323_v33 = vrot.slane %v2219_v12, 1  ;;  %2931 = vrot.lane.b32.xlu1 %v8224_v28, %s7171_s19  ;;  %v3628_v55 = vsel %vm3386_vm5, %v3568_v13, %v3176_v57  ;;  %v2293_v47 = vrot.slane %v2213_v44, 1  ;;  %v11082_v11 = vrot.slane %v8446_v60, 2  ;;  %v8674_v34 = vpop.f32.mrb[99].mxu0 }
 0x1ba   : > { %v3060_v4 = vpop.permute.xlu0 %3059  ;;  %3983 = vmatprep.mubr.bf16.mxu1 %v3628_v55  ;;  %v3631_v10 = vsel %vm3386_vm5, %v3570_v31, %v3178_v40  ;;  %v2537_v57 = vsel %vm2513_vm2, %v2476_v18, %v11009_v22  ;;  %v2059_v31 = vmax.f32 %v1939_v58, 0.0 }
 0x1bb   : > { %v2552_v46 = vsel %vm2513_vm2, %v11082_v11, %v2476_v18  ;;  %v2341_v3 = vsel %vm2330_vm1, %v2308_v38, %v2323_v33  ;;  %v2386_v28 = vsel %vm2330_vm1, %v2323_v33, %v2278_v35  ;;  %v3000_v45 = vpop.permute.xlu1 %2999  ;;  %3984 = vmatmul.mubr.bf16.vlgmr.msra.gmra.mrb[0].mxu1 %v8565_v29  ;;  %v2356_v40 = vsel %vm2330_vm1, %v2293_v47, %v2308_v38 }
 0x1bc   : > { %v8686_v13 = vmax.f32 %v2216_v19, %v2341_v3  ;;  %v8688_v11 = vmax.f32 %v2219_v12, %v2386_v28  ;;  %3197 = vrot.lane.b32.xlu0 %v8496_v17, %s7173_s20  ;;  %3991 = vmatprep.mubr.bf16.mxu1 %v3631_v10  ;;  %v2371_v33 = vsel %vm2330_vm1, %v2278_v35, %v2293_v47  ;;  %v2583_v19 = vrot.slane %v8596_v8, 4 }
 0x1bd   : > { %v8696_v55 = vmax.f32 %v2213_v44, %v2356_v40  ;;  %v1810_v29 = vmul.f32 %v8038_v7, %v8561_v39  ;;  %v3246_v12 = vsel %vm984_vm0, %v7664_v6, %v8574_v52  ;;  %v2628_v18 = vrot.slane %v8590_v50, 4  ;;  %3021 = vrot.lane.b32.xlu1 %v8353_v62, %s7173_s20 }
 0x1be   : > { %v8707_v38 = vmax.f32 %v2210_v2, %v2371_v33  ;;  %v8709_v58 = vpack.c.bf16 %v2537_v57, %v2552_v46  ;;  %v3331_v35 = vsel %vm3325_vm4, %v8572_v51, %v8542_v24  ;;  %v8716_v39 = vsel %vm3325_vm4, %v3246_v12, %v8603_v53  ;;  %v8718_v44 = vpop.permute.xlu0 %3061  ;;  %v8723_v10 = vpop.f32.mrb[100].mxu0 }
 0x1bf   : > { %v2226_v52 = vsel %vm984_vm0, %v2058_v14, -inf  ;;  %v1815_v47 = vmul.f32 %v8038_v7, %v8601_v63  ;;  %v8725_v2 = vpop.permute.xlu1 %2823  ;;  %v2220_v46 = vsel %vm984_vm0, %v2056_v30, -inf  ;;  %v1813_v24 = vmul.f32 %v8038_v7, %v8613_v0  ;;  %v8733_v3 = vpop.f32.mrb[101].mxu0  ;;  %v8743_v7 = vld [vmem:[%s10950_s2] ss:$0 sm:$0xff] }
 0x1c0   : > { %11083 = vst [vmem:[#allocation46_spill] sm:$0xff] %v8709_v58  ;;  %v2613_v51 = vrot.slane %v8588_v32, 4  ;;  %v2674_v53 = vsel %vm2634_vm3, %v2583_v19, %v2598_v15  ;;  %3079 = vrot.lane.b32.xlu0 %v8336_v16, %s7172_s28  ;;  %v2229_v63 = vsel %vm984_vm0, %v2059_v31, -inf  ;;  %v1937_v14 = vadd.f32 %v8069_v9, %v1810_v29  ;;  %v8747_v30 = vpop.f32.mrb[102].mxu0 }
 0x1c1   : > { %v1942_v28 = vadd.f32 %v8069_v9, %v1815_v47  ;;  %v1816_v0 = vmul.f32 %v8743_v7, %v8620_v48  ;;  %3019 = vrot.lane.b32.xlu1 %v8364_v20, %s7173_s20  ;;  %v1940_v57 = vadd.f32 %v8069_v9, %v1813_v24  ;;  %v2689_v33 = vsel %vm2634_vm3, %v2628_v18, %v2583_v19  ;;  %v8758_v29 = vpop.f32.mrb[103].mxu0 }
 0x1c2   : > { %v2659_v40 = vsel %vm2634_vm3, %v2598_v15, %v2613_v51  ;;  %v2644_v31 = vsel %vm2634_vm3, %v2613_v51, %v2628_v18  ;;  %v3485_v48 = vsel %vm984_vm0, %v7840_v54, %v3060_v4  ;;  %v8762_v12 = vpop.permute.xlu0 %3121  ;;  %v3394_v15 = vsel %vm3386_vm5, %v3331_v35, %v3000_v45 }
 0x1c3   : > { %v2062_v47 = vmax.f32 %v1942_v28, 0.0  ;;  %v8764_v22 = vpack.c.bf16 %v2659_v40, %v2674_v53  ;;  %v1943_v24 = vadd.f32 %v8069_v9, %v1816_v0  ;;  %v8767_v6 = vpop.permute.xlu1 %2913  ;;  %3992 = vmatmul.mubr.bf16.gmra.mrb[4].mxu1 %v8632_v61  ;;  %v2060_v51 = vmax.f32 %v1940_v57, 0.0  ;;  %v8800_v40 = vld [vmem:[%s10951_s3] ss:$0 sm:$0xff] }
 0x1c4   : > { %v8771_v19 = vpack.c.bf16 %v2689_v33, %v2644_v31  ;;  %v2506_v18 = vrot.slane %v8444_v27, 2  ;;  %3081 = vrot.lane.b32.xlu0 %v8338_v41, %s7172_s28  ;;  %v2057_v54 = vmax.f32 %v1937_v14, 0.0  ;;  %v1814_v61 = vmul.f32 %v8743_v7, %v8627_v37 }
 0x1c5   : > { %v2227_v4 = vsel %vm984_vm0, %v2062_v47, -inf  ;;  %6838 = vmatprep.mubr.msk.bf16.mxu0 %vm984_vm0, %v8764_v22  ;;  %v2063_v9 = vmax.f32 %v1943_v24, 0.0  ;;  %2843 = vrot.lane.b32.xlu1 %v8403_v36, %s7172_s28  ;;  %v2221_v35 = vsel %vm984_vm0, %v2060_v51, -inf  ;;  %v11085_v27 = vrot.slane %v8442_v43, 2 }
 0x1c6   : > { %11084 = vst [vmem:[#allocation47_spill] sm:$0xff] %v8771_v19  ;;  %v2228_v45 = vmax.f32 %v2226_v52, %v2227_v4  ;;  %6839 = vmatmul.mubr.msk.bf16.gmra.mrb[156].mxu0 %vm984_vm0, %v8771_v19  ;;  %v11086_v14 = vrot.slane %v8446_v60, 2  ;;  %v3120_v37 = vpop.permute.xlu0 %3119  ;;  %v2222_v0 = vmax.f32 %v2220_v46, %v2221_v35  ;;  %v1941_v43 = vadd.f32 %v8800_v40, %v1814_v61  ;;  %v8803_v31 = vpop.f32.mrb[104].mxu0 }
 0x1c7   : > { %v2522_v53 = vsel %vm2513_vm2, %v11085_v27, %v2506_v18  ;;  %v2230_v57 = vsel %vm984_vm0, %v2063_v9, -inf  ;;  %v8805_v33 = vpop.permute.xlu1 %2825  ;;  %v1819_v46 = vmul.f32 %v8743_v7, %v8652_v5  ;;  %v8810_v51 = vpop.f32.mrb[105].mxu0  ;;  %v2223_v4 = vsel %vm984_vm0, %v2057_v54, -inf }
 0x1c8   : > { %v2567_v28 = vsel %vm2513_vm2, %v2506_v18, %v11086_v14  ;;  %v2309_v47 = vrot.slane %v2228_v45, 1  ;;  %v2231_v24 = vmax.f32 %v2229_v63, %v2230_v57  ;;  %3141 = vrot.lane.b32.xlu0 %v8540_v56, %s7171_s19  ;;  %v2279_v9 = vrot.slane %v2222_v0, 1  ;;  %v8816_v35 = vpop.f32.mrb[106].mxu0 }
 0x1c9   : > { %v8795_v52 = vpack.c.bf16 %v2567_v28, %v2522_v53  ;;  %v2061_v61 = vmax.f32 %v1941_v43, 0.0  ;;  %2933 = vrot.lane.b32.xlu1 %v8336_v16, %s7171_s19  ;;  %v1946_v27 = vadd.f32 %v8800_v40, %v1819_v46  ;;  %v1817_v5 = vmul.f32 %v8743_v7, %v8658_v49  ;;  %v8825_v14 = vpop.f32.mrb[107].mxu0 }
 0x1ca   : > { %v2324_v63 = vrot.slane %v2231_v24, 1  ;;  %v1820_v53 = vmul.f32 %v8743_v7, %v8665_v42  ;;  %v3572_v54 = vsel %vm3325_vm4, %v3485_v48, %v3120_v37  ;;  %v3180_v28 = vpop.permute.xlu0 %3179  ;;  %v1818_v43 = vmul.f32 %v8743_v7, %v8674_v34 }
 0x1cb   : > { %v2224_v57 = vsel %vm984_vm0, %v2061_v61, -inf  ;;  %v1823_v16 = vmul.f32 %v8743_v7, %v8723_v10  ;;  %v3634_v46 = vsel %vm3386_vm5, %v3572_v54, %v3180_v28  ;;  %v8834_v60 = vpop.permute.xlu1 %2915  ;;  %v3488_v37 = vsel %vm984_vm0, %v7851_v59, %v8718_v44 }
 0x1cc   : > { %v2342_v42 = vsel %vm2330_vm1, %v2309_v47, %v2324_v63  ;;  %v2387_v49 = vsel %vm2330_vm1, %v2324_v63, %v2279_v9  ;;  %v2225_v48 = vmax.f32 %v2223_v4, %v2224_v57  ;;  %3999 = vmatprep.mubr.bf16.mxu1 %v3634_v46  ;;  %3139 = vrot.lane.b32.xlu0 %v8611_v1, %s7171_s19  ;;  %v2066_v61 = vmax.f32 %v1946_v27, 0.0 }
 0x1cd   : > { %v8845_v34 = vmax.f32 %v2228_v45, %v2342_v42  ;;  %v8847_v10 = vmax.f32 %v2231_v24, %v2387_v49  ;;  %4000 = vmatmul.mubr.bf16.gmra.mrb[8].mxu1 %v3394_v15  ;;  %2845 = vrot.lane.b32.xlu1 %v8496_v17, %s7172_s28  ;;  %v1944_v4 = vadd.f32 %v8800_v40, %v1817_v5 }
 0x1ce   : > { %v2294_v54 = vrot.slane %v2225_v48, 1  ;;  %v1947_v63 = vadd.f32 %v8800_v40, %v1820_v53  ;;  %v1821_v59 = vmul.f32 %v8743_v7, %v8733_v3  ;;  %v3574_v44 = vsel %vm3325_vm4, %v3488_v37, %v8762_v12  ;;  %v3182_v24 = vpop.permute.xlu0 %3181  ;;  %v8860_v28 = vpop.f32.mrb[108].mxu0 }
 0x1cf   : > { %v1945_v27 = vadd.f32 %v8800_v40, %v1818_v43  ;;  %v1950_v15 = vadd.f32 %v8800_v40, %v1823_v16  ;;  %v3637_v57 = vsel %vm3386_vm5, %v3574_v44, %v3182_v24  ;;  %v8863_v5 = vpop.permute.xlu1 %3005  ;;  %v2064_v12 = vmax.f32 %v1944_v4, 0.0  ;;  %v8869_v46 = vpop.f32.mrb[109].mxu0 }
 0x1d0   : > { %v2357_v53 = vsel %vm2330_vm1, %v2294_v54, %v2309_v47  ;;  %v2372_v3 = vsel %vm2330_vm1, %v2279_v9, %v2294_v54  ;;  %v3249_v43 = vsel %vm984_vm0, %v7864_v23, %v8725_v2  ;;  %4007 = vmatprep.mubr.bf16.mxu1 %v3637_v57  ;;  %3199 = vrot.lane.b32.xlu0 %v8709_v58, %s7173_s20  ;;  %v2238_v47 = vsel %vm984_vm0, %v2066_v61, -inf  ;;  %v8881_v49 = vpop.f32.mrb[110].mxu0 }
 0x1d1   : > { %v8876_v16 = vmax.f32 %v2222_v0, %v2372_v3  ;;  %v8878_v42 = vmax.f32 %v2225_v48, %v2357_v53  ;;  %2935 = vrot.lane.b32.xlu1 %v8338_v41, %s7171_s19  ;;  %v2067_v9 = vmax.f32 %v1947_v63, 0.0  ;;  %v2070_v37 = vmax.f32 %v1950_v15, 0.0  ;;  %v8888_v2 = vpop.f32.mrb[111].mxu0 }
 0x1d2   : > { %v1948_v54 = vadd.f32 %v8800_v40, %v1821_v59  ;;  %v1824_v23 = vmul.f32 %v8743_v7, %v8747_v30  ;;  %v8892_v0 = vsel %vm3325_vm4, %v3249_v43, %v8767_v6  ;;  %v3252_v48 = vsel %vm984_vm0, %v7785_v26, %v8805_v33  ;;  %v3064_v41 = vpop.permute.xlu0 %3063 }
 0x1d3   : > { %v2065_v4 = vmax.f32 %v1945_v27, 0.0  ;;  %v8898_v63 = vpop.permute.xlu1 %3003  ;;  %v2232_v59 = vsel %vm984_vm0, %v2064_v12, -inf  ;;  %v2239_v30 = vsel %vm984_vm0, %v2070_v37, -inf  ;;  %v3397_v6 = vsel %vm3386_vm5, %v8716_v39, %v8637_v21 }
 0x1d4   : > { %v2068_v44 = vmax.f32 %v1948_v54, 0.0  ;;  %v1951_v24 = vadd.f32 %v8800_v40, %v1824_v23  ;;  %3201 = vrot.lane.b32.xlu0 %v8795_v52, %s7173_s20  ;;  %v8908_v26 = vmax.f32 %v2238_v47, %v2239_v30  ;;  %v1822_v33 = vmul.f32 %v8743_v7, %v8758_v29 }
 0x1d5   : > { %v1827_v27 = vmul.f32 %v8743_v7, %v8803_v31  ;;  %4008 = vmatmul.mubr.bf16.gmra.mrb[12].mxu1 %v3397_v6  ;;  %v2241_v15 = vsel %vm984_vm0, %v2067_v9, -inf  ;;  %3025 = vrot.lane.b32.xlu1 %v8540_v56, %s7173_s20  ;;  %v8920_v21 = vpack.c.bf16 %v8590_v50, %v8588_v32  ;;  %v8924_v39 = vsel %vm3325_vm4, %v3252_v48, %v8834_v60  ;;  %v11088_v48 = vld [vmem:[#allocation40_spill] sm:$0xff]  ;;  %v11089_v6 = vld [vmem:[#allocation21_spill] sm:$0xff] }
 0x1d6   : > { %v2233_v57 = vsel %vm984_vm0, %v2068_v44, -inf  ;;  %v2071_v53 = vmax.f32 %v1951_v24, 0.0  ;;  %v3066_v29 = vpop.permute.xlu0 %3065  ;;  %v2235_v31 = vsel %vm984_vm0, %v2065_v4, -inf  ;;  %v1949_v12 = vadd.f32 %v8800_v40, %v1822_v33  ;;  %v8928_v43 = vpop.f32.mrb[112].mxu0  ;;  %v11090_v56 = vld [vmem:[#allocation41_spill] sm:$0xff] }
 0x1d7   : > { %11087 = vst [vmem:[#allocation48_spill] sm:$0xff] %v8920_v21  ;;  %v2234_v3 = vmax.f32 %v2232_v59, %v2233_v57  ;;  %v2310_v47 = vrot.slane %v8908_v26, 1  ;;  %v2828_v9 = vpop.permute.xlu1 %2827  ;;  %v1825_v54 = vmul.f32 %v8743_v7, %v8810_v51  ;;  %v1828_v60 = vmul.f32 %v8743_v7, %v8816_v35  ;;  %v8936_v23 = vpop.f32.mrb[113].mxu0 }
 0x1d8   : > { %v2242_v37 = vsel %vm984_vm0, %v2071_v53, -inf  ;;  %3083 = vrot.lane.b32.xlu0 %v11088_v48, %s7172_s28  ;;  %v2069_v30 = vmax.f32 %v1949_v12, 0.0  ;;  %v1954_v44 = vadd.f32 %v8800_v40, %v1827_v27  ;;  %v8941_v24 = vpop.f32.mrb[114].mxu0  ;;  %v1826_v35 = vmul.f32 %v8743_v7, %v8825_v14 }
 0x1d9   : > { %v2280_v4 = vrot.slane %v2234_v3, 1  ;;  %v2243_v59 = vmax.f32 %v2241_v15, %v2242_v37  ;;  %3023 = vrot.lane.b32.xlu1 %v8611_v1, %s7173_s20  ;;  %v8950_v57 = vpop.f32.mrb[115].mxu0  ;;  %v2584_v12 = vrot.slane %v8707_v38, 4  ;;  %v2614_v37 = vrot.slane %v8686_v13, 4 }
 0x1da   : > { %v3126_v15 = vpop.permute.xlu0 %3125  ;;  %v2236_v27 = vsel %vm984_vm0, %v2069_v30, -inf  ;;  %v3491_v45 = vsel %vm984_vm0, %v11089_v6, %v3064_v41  ;;  %v1952_v14 = vadd.f32 %v8800_v40, %v1825_v54  ;;  %v2074_v1 = vmax.f32 %v1954_v44, 0.0 }
 0x1db   : > { %v2325_v53 = vrot.slane %v2243_v59, 1  ;;  %v2237_v33 = vmax.f32 %v2235_v31, %v2236_v27  ;;  %v8958_v18 = vpop.permute.xlu1 %2917  ;;  %v1955_v62 = vadd.f32 %v8800_v40, %v1828_v60  ;;  %v1953_v54 = vadd.f32 %v8800_v40, %v1826_v35 }
 0x1dc   : > { %3085 = vrot.lane.b32.xlu0 %v11090_v56, %s7172_s28  ;;  %v11093_v60 = vrot.slane %v8688_v11, 4  ;;  %v2072_v19 = vmax.f32 %v1952_v14, 0.0 }
 0x1dd   : > { %v2343_v61 = vsel %vm2330_vm1, %v2310_v47, %v2325_v53  ;;  %v2388_v30 = vsel %vm2330_vm1, %v2325_v53, %v2280_v4  ;;  %v2295_v6 = vrot.slane %v2237_v33, 1  ;;  %2847 = vrot.lane.b32.xlu1 %v8709_v58, %s7172_s28  ;;  %v11091_v53 = vrot.slane %v8696_v55, 4  ;;  %v11095_v58 = vld [vmem:[#allocation20_spill] sm:$0xff] }
 0x1de   : > { %v8969_v41 = vmax.f32 %v8908_v26, %v2343_v61  ;;  %v8971_v31 = vmax.f32 %v2243_v59, %v2388_v30  ;;  %v3124_v27 = vpop.permute.xlu0 %3123  ;;  %v1831_v26 = vmul.f32 %v8743_v7, %v8860_v28  ;;  %v2645_v59 = vsel %vm2634_vm3, %v2614_v37, %v11093_v60  ;;  %v8990_v35 = vpop.f32.mrb[116].mxu0  ;;  %v11094_v30 = vld [vmem:[#allocation22_spill] sm:$0xff] }
 0x1df   : > { %v2660_v51 = vsel %vm2634_vm3, %v11091_v53, %v2614_v37  ;;  %v11092_v44 = vmov %v11091_v53  ;;  %v3494_v20 = vsel %vm984_vm0, %v11094_v30, %v3066_v29  ;;  %v8996_v53 = vsel %vm984_vm0, %v11095_v58, %v2828_v9  ;;  %v9002_v17 = vpop.permute.xlu1 %2829  ;;  %v9004_v36 = vpop.f32.mrb[117].mxu0 }
 0x1e0   : > { %v2675_v61 = vsel %vm2634_vm3, %v2584_v12, %v11092_v44  ;;  %v2358_v44 = vsel %vm2330_vm1, %v2295_v6, %v2310_v47  ;;  %v2373_v28 = vsel %vm2330_vm1, %v2280_v4, %v2295_v6  ;;  %v2075_v29 = vmax.f32 %v1955_v62, 0.0  ;;  %3145 = vrot.lane.b32.xlu0 %v8920_v21, %s7171_s19  ;;  %v9012_v58 = vpop.f32.mrb[118].mxu0 }
 0x1e1   : > { %v9006_v37 = vmax.f32 %v2234_v3, %v2373_v28  ;;  %v9008_v60 = vmax.f32 %v2237_v33, %v2358_v44  ;;  %v3578_v47 = vsel %vm3325_vm4, %v3494_v20, %v3126_v15  ;;  %v9015_v9 = vpack.c.bf16 %v2660_v51, %v2675_v61  ;;  %2937 = vrot.lane.b32.xlu1 %v11088_v48, %s7171_s19  ;;  %v9024_v62 = vpop.f32.mrb[119].mxu0 }
 0x1e2   : > { %v1958_v4 = vadd.f32 %v8800_v40, %v1831_v26  ;;  %v11096_v6 = vrot.slane %v8688_v11, 4  ;;  %v2250_v33 = vsel %vm984_vm0, %v2074_v1, -inf  ;;  %v3576_v14 = vsel %vm3325_vm4, %v3491_v45, %v3124_v27  ;;  %v3184_v51 = vpop.permute.xlu0 %3183  ;;  %v11097_v45 = vld [vmem:[#allocation44_spill] sm:$0xff] }
 0x1e3   : > { %v2073_v30 = vmax.f32 %v1953_v54, 0.0  ;;  %6842 = vmatprep.mubr.msk.bf16.mxu0 %vm984_vm0, %v9015_v9  ;;  %v1832_v48 = vmul.f32 %v8743_v7, %v8881_v49  ;;  %v3640_v61 = vsel %vm3386_vm5, %v3576_v14, %v3184_v51  ;;  %v9037_v26 = vpop.permute.xlu1 %2919  ;;  %v2244_v1 = vsel %vm984_vm0, %v2072_v19, -inf }
 0x1e4   : > { %v2690_v3 = vsel %vm2634_vm3, %v11096_v6, %v2584_v12  ;;  %v2078_v15 = vmax.f32 %v1958_v4, 0.0  ;;  %v1829_v12 = vmul.f32 %v8743_v7, %v8869_v46  ;;  %4015 = vmatprep.mubr.bf16.mxu1 %v3640_v61  ;;  %v9044_v54 = vpack.c.bf16 %v11097_v45, %v8596_v8 }
 0x1e5   : > { %v9028_v20 = vpack.c.bf16 %v2690_v3, %v2645_v59  ;;  %v1830_v46 = vmul.f32 %v8743_v7, %v8888_v2  ;;  %v1835_v49 = vmul.f32 %v8743_v7, %v8928_v43  ;;  %v1959_v19 = vadd.f32 %v8800_v40, %v1832_v48  ;;  %2849 = vrot.lane.b32.xlu1 %v8795_v52, %s7172_s28 }
 0x1e6   : > { %v2251_v27 = vsel %vm984_vm0, %v2078_v15, -inf  ;;  %v1956_v59 = vadd.f32 %v8800_v40, %v1829_v12  ;;  %v3400_v44 = vsel %vm3386_vm5, %v8892_v0, %v8898_v63  ;;  %v2253_v28 = vsel %vm984_vm0, %v2075_v29, -inf  ;;  %3143 = vrot.lane.b32.xlu0 %v9044_v54, %s7171_s19  ;;  %v3186_v6 = vpop.permute.xlu0 %3185  ;;  %v6800_v3 = vpop.f32.mrb[120].mxu0 }
 0x1e7   : > { %6843 = vmatmul.mubr.msk.bf16.gmra.mrb[160].mxu0 %vm984_vm0, %v9028_v20  ;;  %v2247_v2 = vsel %vm984_vm0, %v2073_v30, -inf  ;;  %v2252_v4 = vmax.f32 %v2250_v33, %v2251_v27  ;;  %v1957_v43 = vadd.f32 %v8800_v40, %v1830_v46  ;;  %4016 = vmatmul.mubr.bf16.gmra.mrb[16].mxu1 %v3400_v44  ;;  %v2079_v51 = vmax.f32 %v1959_v19, 0.0  ;;  %v9066_v15 = vpop.permute.xlu1 %3009  ;;  %v1691_v29 = vpop.f32.mrb[121].mxu0 }
 0x1e8   : > { %v2076_v14 = vmax.f32 %v1956_v59, 0.0  ;;  %v1833_v0 = vmul.f32 %v8743_v7, %v8936_v23  ;;  %v11020_v63 = vrot.slane %v8596_v8, 2  ;;  %v1962_v33 = vadd.f32 %v8800_v40, %v1835_v49  ;;  %v6801_v61 = vpop.f32.mrb[122].mxu0 }
 0x1e9   : > { %v2077_v30 = vmax.f32 %v1957_v43, 0.0  ;;  %v1836_v12 = vmul.f32 %v8743_v7, %v8941_v24  ;;  %v2477_v48 = vrot.slane %v11097_v45, 2  ;;  %v2254_v27 = vsel %vm984_vm0, %v2079_v51, -inf  ;;  %2939 = vrot.lane.b32.xlu1 %v11090_v56, %s7171_s19  ;;  %v1693_v19 = vpop.f32.mrb[123].mxu0 }
 0x1ea   : > { %v2245_v46 = vsel %vm984_vm0, %v2076_v14, -inf  ;;  %v1960_v23 = vadd.f32 %v8800_v40, %v1833_v0  ;;  %v3643_v59 = vsel %vm3386_vm5, %v3578_v47, %v3186_v6  ;;  %v2311_v44 = vrot.slane %v2252_v4, 1  ;;  %v9079_v45 = vpop.permute.xlu0 %3067 }
 0x1eb   : > { %v2246_v49 = vmax.f32 %v2244_v1, %v2245_v46  ;;  %v2255_v43 = vmax.f32 %v2253_v28, %v2254_v27  ;;  %v2248_v24 = vsel %vm984_vm0, %v2077_v30, -inf  ;;  %4023 = vmatprep.mubr.bf16.mxu1 %v3643_v59  ;;  %v9084_v3 = vsel %vm3325_vm4, %v8996_v53, %v8958_v18  ;;  %v9088_v56 = vpop.permute.xlu1 %3007 }
 0x1ec   : > { %v2249_v14 = vmax.f32 %v2247_v2, %v2248_v24  ;;  %v1963_v47 = vadd.f32 %v8800_v40, %v1836_v12  ;;  %v11021_v6 = vrot.slane %v8588_v32, 2  ;;  %v2553_v28 = vsel %vm2513_vm2, %v11020_v63, %v2477_v48 }
 0x1ed   : > { %v2281_v51 = vrot.slane %v2246_v49, 1  ;;  %v2326_v1 = vrot.slane %v2255_v43, 1  ;;  %v1834_v0 = vmul.f32 %v8743_v7, %v8950_v57  ;;  %v2082_v18 = vmax.f32 %v1962_v33, 0.0  ;;  %3029 = vrot.lane.b32.xlu1 %v8920_v21, %s7173_s20 }
 0x1ee   : > { %v2296_v29 = vrot.slane %v2249_v14, 1  ;;  %v2080_v53 = vmax.f32 %v1960_v23, 0.0  ;;  %v2538_v2 = vsel %vm2513_vm2, %v2477_v48, %v11021_v6  ;;  %v9109_v33 = vpop.permute.xlu0 %3069  ;;  %v6804_v46 = vpop.f32.mrb[124].mxu0 }
 0x1ef   : > { %v2344_v30 = vsel %vm2330_vm1, %v2311_v44, %v2326_v1  ;;  %v2389_v12 = vsel %vm2330_vm1, %v2326_v1, %v2281_v51  ;;  %v9106_v61 = vpack.c.bf16 %v2538_v2, %v2553_v28  ;;  %v1961_v57 = vadd.f32 %v8800_v40, %v1834_v0  ;;  %v9119_v19 = vpop.permute.xlu1 %2831  ;;  %v1703_v24 = vpop.f32.mrb[125].mxu0 }
 0x1f0   : > { %v9111_v27 = vmax.f32 %v2252_v4, %v2344_v30  ;;  %v9113_v23 = vmax.f32 %v2255_v43, %v2389_v12  ;;  %v2359_v48 = vsel %vm2330_vm1, %v2296_v29, %v2311_v44  ;;  %v2374_v59 = vsel %vm2330_vm1, %v2281_v51, %v2296_v29  ;;  %v6805_v4 = vpop.f32.mrb[126].mxu0 }
 0x1f1   : > { %v9122_v28 = vmax.f32 %v2246_v49, %v2374_v59  ;;  %v9124_v0 = vmax.f32 %v2249_v14, %v2359_v48  ;;  %v2083_v2 = vmax.f32 %v1963_v47, 0.0  ;;  %3203 = vrot.lane.b32.xlu0 %v9106_v61, %s7173_s20  ;;  %v2631_v43 = vrot.slane %v8971_v31, 4  ;;  %3027 = vrot.lane.b32.xlu1 %v9044_v54, %s7173_s20  ;;  %v1705_v49 = vpop.f32.mrb[127].mxu0 }
 0x1f2   : > { %v2601_v44 = vrot.slane %v9008_v60, 4  ;;  %v2585_v51 = vrot.slane %v8876_v16, 4  ;;  %v2615_v29 = vrot.slane %v8845_v34, 4  ;;  %v2262_v14 = vsel %vm984_vm0, %v2082_v18, -inf  ;;  %v9138_v46 = vpop.permute.xlu0 %3129 }
 0x1f3   : > { %v2256_v47 = vsel %vm984_vm0, %v2080_v53, -inf  ;;  %v2081_v30 = vmax.f32 %v1961_v57, 0.0  ;;  %v1839_v12 = vmul.f32 %v8743_v7, %v8990_v35  ;;  %v11098_v48 = vrot.slane %v8878_v42, 4  ;;  %v9156_v49 = vpop.permute.xlu1 %2921 }
 0x1f4   : > { %v11100_v18 = vrot.slane %v8847_v10, 4  ;;  %v2265_v1 = vsel %vm984_vm0, %v2083_v2, -inf }
 0x1f5   : > { %v2661_v59 = vsel %vm2634_vm3, %v11098_v48, %v2615_v29  ;;  %v11099_v24 = vmov %v11098_v48  ;;  %v1966_v63 = vadd.f32 %v8800_v40, %v1839_v12  ;;  %2851 = vrot.lane.b32.xlu1 %v9106_v61, %s7172_s28  ;;  %v2259_v2 = vsel %vm984_vm0, %v2081_v30, -inf }
 0x1f6   : > { %v2676_v4 = vsel %vm2634_vm3, %v2585_v51, %v11099_v24  ;;  %v2646_v53 = vsel %vm2634_vm3, %v2615_v29, %v11100_v18  ;;  %v11101_v57 = vmov %v11100_v18  ;;  %v1837_v24 = vmul.f32 %v8743_v7, %v9004_v36 }
 0x1f7   : > { %v2691_v35 = vsel %vm2634_vm3, %v11101_v57, %v2585_v51  ;;  %v9159_v48 = vpack.c.bf16 %v2661_v59, %v2676_v4  ;;  %v1840_v29 = vmul.f32 %v8743_v7, %v9012_v58  ;;  %v2507_v18 = vrot.slane %v8590_v50, 2  ;;  %v3128_v59 = vpop.permute.xlu0 %3127 }
 0x1f8   : > { %v9162_v6 = vpack.c.bf16 %v2691_v35, %v2646_v53  ;;  %v1838_v51 = vmul.f32 %v8743_v7, %v9024_v62  ;;  %v2086_v12 = vmax.f32 %v1966_v63, 0.0  ;;  %v3403_v36 = vsel %vm3386_vm5, %v8924_v39, %v8863_v5  ;;  %v9192_v39 = vpop.permute.xlu1 %2833 }
 0x1f9   : > { %6846 = vmatprep.mubr.msk.bf16.mxu0 %vm984_vm0, %v9159_v48  ;;  %v2586_v58 = vrot.slane %v9006_v37, 4  ;;  %v1964_v50 = vadd.f32 %v8800_v40, %v1837_v24  ;;  %v1967_v7 = vadd.f32 %v8800_v40, %v1840_v29  ;;  %v11102_v62 = vrot.slane %v8588_v32, 2  ;;  %4024 = vmatmul.mubr.bf16.gmra.mrb[20].mxu1 %v3403_v36 }
 0x1fa   : > { %6847 = vmatmul.mubr.msk.bf16.gmra.mrb[164].mxu0 %vm984_vm0, %v9162_v6  ;;  %v11103_v63 = vrot.slane %v8596_v8, 2  ;;  %v2263_v4 = vsel %vm984_vm0, %v2086_v12, -inf  ;;  %v1965_v57 = vadd.f32 %v8800_v40, %v1838_v51  ;;  %v2616_v35 = vrot.slane %v8969_v41, 4  ;;  %2941 = vrot.lane.b32.xlu1 %v8764_v22, %s7171_s19 }
 0x1fb   : > { %v2523_v30 = vsel %vm2513_vm2, %v11102_v62, %v2507_v18  ;;  %v2264_v32 = vmax.f32 %v2262_v14, %v2263_v4  ;;  %v2084_v24 = vmax.f32 %v1964_v50, 0.0  ;;  %v2087_v29 = vmax.f32 %v1967_v7, 0.0  ;;  %v3188_v51 = vpop.permute.xlu0 %3187 }
 0x1fc   : > { %v2568_v5 = vsel %vm2513_vm2, %v2507_v18, %v11103_v63  ;;  %v2677_v8 = vsel %vm2634_vm3, %v2586_v58, %v2601_v44  ;;  %v2085_v18 = vmax.f32 %v1965_v57, 0.0  ;;  %v2662_v12 = vsel %vm2634_vm3, %v2601_v44, %v2616_v35 }
 0x1fd   : > { %v9195_v53 = vpack.c.bf16 %v2568_v5, %v2523_v30  ;;  %v2647_v40 = vsel %vm2634_vm3, %v2616_v35, %v2631_v43  ;;  %v2692_v14 = vsel %vm2634_vm3, %v2631_v43, %v2586_v58  ;;  %v2312_v36 = vrot.slane %v2264_v32, 1  ;;  %v9215_v30 = vpop.permute.xlu1 %2923  ;;  %v11104_v58 = vld [vmem:[#allocation25_spill] sm:$0xff] }
 0x1fe   : > { %v2257_v50 = vsel %vm984_vm0, %v2084_v24, -inf  ;;  %v2266_v7 = vsel %vm984_vm0, %v2087_v29, -inf  ;;  %v9213_v62 = vpack.c.bf16 %v2662_v12, %v2677_v8  ;;  %v2260_v44 = vsel %vm984_vm0, %v2085_v18, -inf }
 0x1ff   : > { %3205 = vrot.lane.b32.xlu0 %v9195_v53, %s7173_s20  ;;  %v2258_v63 = vmax.f32 %v2256_v47, %v2257_v50  ;;  %v2267_v5 = vmax.f32 %v2265_v1, %v2266_v7  ;;  %v9218_v4 = vpack.c.bf16 %v2692_v14, %v2647_v40  ;;  %v2632_v57 = vrot.slane %v9113_v23, 4  ;;  %v11105_v1 = vld [vmem:[#allocation26_spill] sm:$0xff]  ;;  %v3190_v12 = vpop.permute.xlu0 %3189  ;;  %2853 = vrot.lane.b32.xlu1 %v9195_v53, %s7172_s28 }
 0x200   : > { %v2602_v43 = vrot.slane %v9124_v0, 4  ;;  %v3497_v35 = vsel %vm984_vm0, %v11104_v58, %v9079_v45  ;;  %v2261_v24 = vmax.f32 %v2259_v2, %v2260_v44  ;;  %6850 = vmatprep.mubr.msk.bf16.mxu0 %vm984_vm0, %v9213_v62  ;;  %v3500_v47 = vsel %vm984_vm0, %v11105_v1, %v9109_v33 }
 0x201   : > { %v2282_v29 = vrot.slane %v2258_v63, 1  ;;  %v2327_v8 = vrot.slane %v2267_v5, 1  ;;  %v9234_v18 = vpack.c.bf16 %v8688_v11, %v8686_v13  ;;  %v3580_v2 = vsel %vm3325_vm4, %v3497_v35, %v3128_v59  ;;  %v9243_v14 = vpop.permute.xlu1 %3013 }
 0x202   : > { %v2297_v45 = vrot.slane %v2261_v24, 1  ;;  %6851 = vmatmul.mubr.msk.bf16.gmra.mrb[168].mxu0 %vm984_vm0, %v9218_v4  ;;  %v2587_v40 = vrot.slane %v9122_v28, 4  ;;  %v2617_v33 = vrot.slane %v9111_v27, 4  ;;  %v3646_v7 = vsel %vm3386_vm5, %v3580_v2, %v3188_v51  ;;  %v11106_v51 = vld [vmem:[#allocation47_spill] sm:$0xff] }
 0x203   : > { %3087 = vrot.lane.b32.xlu0 %v8764_v22, %s7172_s28  ;;  %v2345_v22 = vsel %vm2330_vm1, %v2312_v36, %v2327_v8  ;;  %v2390_v50 = vsel %vm2330_vm1, %v2327_v8, %v2282_v29  ;;  %v9252_v44 = vpack.c.bf16 %v8696_v55, %v8707_v38  ;;  %4031 = vmatprep.mubr.bf16.mxu1 %v3646_v7  ;;  %v9272_v2 = vpop.permute.xlu0 %3071 }
 0x204   : > { %v9254_v58 = vmax.f32 %v2264_v32, %v2345_v22  ;;  %v9256_v59 = vmax.f32 %v2267_v5, %v2390_v50  ;;  %v2360_v35 = vsel %vm2330_vm1, %v2297_v45, %v2312_v36  ;;  %v2375_v1 = vsel %vm2330_vm1, %v2282_v29, %v2297_v45  ;;  %v11107_v36 = vld [vmem:[#allocation19_spill] sm:$0xff]  ;;  %2943 = vrot.lane.b32.xlu1 %v11106_v51, %s7171_s19 }
 0x205   : > { %v9262_v21 = vmax.f32 %v2258_v63, %v2375_v1  ;;  %v9264_v8 = vmax.f32 %v2261_v24, %v2360_v35  ;;  %v2663_v32 = vsel %vm2634_vm3, %v2602_v43, %v2617_v33  ;;  %v2678_v5 = vsel %vm2634_vm3, %v2587_v40, %v2602_v43  ;;  %v9285_v22 = vpop.permute.xlu1 %3011 }
 0x206   : > { %v3258_v29 = vsel %vm984_vm0, %v11107_v36, %v9002_v17  ;;  %v3582_v63 = vsel %vm3325_vm4, %v3500_v47, %v9138_v46  ;;  %v9279_v24 = vpack.c.bf16 %v2663_v32, %v2678_v5  ;;  %v2648_v45 = vsel %vm2634_vm3, %v2617_v33, %v2632_v57 }
 0x207   : > { %3089 = vrot.lane.b32.xlu0 %v11106_v51, %s7172_s28  ;;  %v2633_v43 = vrot.slane %v9256_v59, 4  ;;  %v2603_v50 = vrot.slane %v9264_v8, 4  ;;  %v2693_v17 = vsel %vm2634_vm3, %v2632_v57, %v2587_v40  ;;  %v3406_v46 = vsel %vm3386_vm5, %v9084_v3, %v9088_v56  ;;  %v9308_v40 = vpop.permute.xlu0 %3073 }
 0x208   : > { %v2480_v47 = vrot.slane %v9008_v60, 2  ;;  %6854 = vmatprep.mubr.msk.bf16.mxu0 %vm984_vm0, %v9279_v24  ;;  %v9297_v33 = vpack.c.bf16 %v2693_v17, %v2648_v45  ;;  %4032 = vmatmul.mubr.bf16.gmra.mrb[24].mxu1 %v3406_v46  ;;  %v3649_v7 = vsel %vm3386_vm5, %v3582_v63, %v3190_v12  ;;  %v2463_v35 = vrot.slane %v8707_v38, 2 }
 0x209   : > { %v3341_v1 = vsel %vm3325_vm4, %v3258_v29, %v9037_v26  ;;  %4039 = vmatprep.mubr.bf16.mxu1 %v3649_v7  ;;  %v2493_v3 = vrot.slane %v8686_v13, 2  ;;  %v2588_v56 = vrot.slane %v9262_v21, 4  ;;  %v2618_v57 = vrot.slane %v9254_v58, 4  ;;  %v9322_v5 = vpop.permute.xlu1 %2835  ;;  %3033 = vrot.lane.b32.xlu1 %v9234_v18, %s7173_s20 }
 0x20a   : > { %v2511_v51 = vrot.slane %v9113_v23, 2  ;;  %v2481_v12 = vrot.slane %v9124_v0, 2  ;;  %6855 = vmatmul.mubr.msk.bf16.gmra.mrb[172].mxu0 %vm984_vm0, %v9297_v33  ;;  %v11108_v38 = vrot.slane %v8696_v55, 2  ;;  %v11109_v13 = vrot.slane %v8688_v11, 2 }
 0x20b   : > { %3149 = vrot.lane.b32.xlu0 %v9234_v18, %s7171_s19  ;;  %v2664_v63 = vsel %vm2634_vm3, %v2603_v50, %v2618_v57  ;;  %v2679_v45 = vsel %vm2634_vm3, %v2588_v56, %v2603_v50  ;;  %v2649_v17 = vsel %vm2634_vm3, %v2618_v57, %v2633_v43  ;;  %v2694_v55 = vsel %vm2634_vm3, %v2633_v43, %v2588_v56  ;;  %v11112_v50 = vld [vmem:[#allocation24_spill] sm:$0xff] }
 0x20c   : > { %v2554_v26 = vsel %vm2513_vm2, %v2463_v35, %v11108_v38  ;;  %v2569_v32 = vsel %vm2513_vm2, %v11109_v13, %v2463_v35  ;;  %v11110_v36 = vmov %v11108_v38  ;;  %v9338_v7 = vpack.c.bf16 %v2664_v63, %v2679_v45 }
 0x20d   : > { %v2539_v29 = vsel %vm2513_vm2, %v11110_v36, %v2493_v3  ;;  %v11111_v35 = vmov %v11109_v13  ;;  %v3261_v13 = vsel %vm984_vm0, %v11112_v50, %v9119_v19  ;;  %v9351_v57 = vpack.c.bf16 %v2694_v55, %v2649_v17  ;;  %v9355_v36 = vpop.permute.xlu0 %3133  ;;  %v9366_v19 = vpop.permute.xlu1 %2925  ;;  %3031 = vrot.lane.b32.xlu1 %v9252_v44, %s7173_s20 }
 0x20e   : > { %v9336_v46 = vpack.c.bf16 %v2539_v29, %v2554_v26  ;;  %v2524_v38 = vsel %vm2513_vm2, %v2493_v3, %v11111_v35  ;;  %v9359_v43 = vpack.c.bf16 %v8847_v10, %v8845_v34  ;;  %v3343_v3 = vsel %vm3325_vm4, %v3261_v13, %v9156_v49  ;;  %6858 = vmatprep.mubr.msk.bf16.mxu0 %vm984_vm0, %v9338_v7 }
 0x20f   : > { %3147 = vrot.lane.b32.xlu0 %v9252_v44, %s7171_s19  ;;  %v9353_v26 = vpack.c.bf16 %v2569_v32, %v2524_v38  ;;  %v9370_v56 = vpack.c.bf16 %v8878_v42, %v8876_v16  ;;  %v2464_v32 = vrot.slane %v8876_v16, 2  ;;  %v2482_v29 = vrot.slane %v9264_v8, 2 }
 0x210   : > { %11113 = vst [vmem:[#allocation40_spill] sm:$0xff] %v9359_v43  ;;  %v3409_v63 = vsel %vm3386_vm5, %v3341_v1, %v9066_v15  ;;  %v2494_v49 = vrot.slane %v8845_v34, 2  ;;  %v9381_v45 = vpack.c.bf16 %v8971_v31, %v8969_v41  ;;  %v11116_v17 = vrot.slane %v8878_v42, 2 }
 0x211   : > { %11114 = vst [vmem:[#allocation21_spill] sm:$0xff] %v9370_v56  ;;  %4040 = vmatmul.mubr.bf16.gmra.mrb[28].mxu1 %v3409_v63  ;;  %v11117_v55 = vrot.slane %v8847_v10, 2  ;;  %v9393_v1 = vpack.c.bf16 %v9008_v60, %v9006_v37  ;;  %v2465_v34 = vrot.slane %v9006_v37, 2  ;;  %v3132_v35 = vpop.permute.xlu0 %3131  ;;  %v2495_v63 = vrot.slane %v8969_v41, 2  ;;  %v11122_v37 = vld [vmem:[#allocation29_spill] sm:$0xff]  ;;  %2855 = vrot.lane.b32.xlu1 %v9336_v46, %s7172_s28 }
 0x212   : > { %11115 = vst [vmem:[#allocation41_spill] sm:$0xff] %v9381_v45  ;;  %v2555_v16 = vsel %vm2513_vm2, %v2464_v32, %v11116_v17  ;;  %v11119_v38 = vmov %v11116_v17  ;;  %v9409_v17 = vpack.c.bf16 %v9124_v0, %v9122_v28  ;;  %6859 = vmatmul.mubr.msk.bf16.gmra.mrb[176].mxu0 %vm984_vm0, %v9351_v57  ;;  %v3503_v42 = vsel %vm984_vm0, %v11122_v37, %v9272_v2  ;;  %v9431_v2 = vpop.f32.mrb[128].mxu0 }
 0x213   : > { %v2570_v15 = vsel %vm2513_vm2, %v11117_v55, %v2464_v32  ;;  %11118 = vst [vmem:[#allocation22_spill] sm:$0xff] %v9393_v1  ;;  %3207 = vrot.lane.b32.xlu0 %v9336_v46, %s7173_s20  ;;  %v2540_v50 = vsel %vm2513_vm2, %v11119_v38, %v2494_v49  ;;  %v11120_v13 = vmov %v11117_v55  ;;  %v9416_v55 = vpop.permute.xlu1 %2837  ;;  %v2556_v41 = vsel %vm2513_vm2, %v2465_v34, %v2480_v47  ;;  %v9442_v37 = vpop.f32.mrb[129].mxu0 }
 0x214   : > { %v2525_v32 = vsel %vm2513_vm2, %v2494_v49, %v11120_v13  ;;  %11121 = vst [vmem:[#allocation20_spill] sm:$0xff] %v9409_v17  ;;  %v9418_v38 = vpack.c.bf16 %v2540_v50, %v2555_v16  ;;  %v11123_v49 = vld [vmem:[#allocation9_spill] sm:$0xff]  ;;  %v3584_v13 = vsel %vm3325_vm4, %v3503_v42, %v3132_v35  ;;  %v2541_v16 = vsel %vm2513_vm2, %v2480_v47, %v2495_v63 }
 0x215   : > { %v9420_v10 = vpack.c.bf16 %v2570_v15, %v2525_v32  ;;  %6862 = vmatprep.mubr.msk.bf16.mxu0 %vm984_vm0, %v11123_v49  ;;  %v11124_v15 = vrot.slane %v8971_v31, 2  ;;  %v2466_v32 = vrot.slane %v9122_v28, 2  ;;  %v9444_v35 = vpack.c.bf16 %v2541_v16, %v2556_v41  ;;  %v9457_v28 = vpop.f32.mrb[130].mxu0  ;;  %2945 = vrot.lane.b32.xlu1 %v9015_v9, %s7171_s19 }
 0x216   : > { %v2496_v60 = vrot.slane %v9111_v27, 2  ;;  %v9453_v47 = vpack.c.bf16 %v9113_v23, %v9111_v27  ;;  %v9471_v27 = vpack.c.bf16 %v9256_v59, %v9254_v58  ;;  %v2467_v23 = vrot.slane %v9262_v21, 2 }
 0x217   : > { %v2526_v50 = vsel %vm2513_vm2, %v2495_v63, %v11124_v15  ;;  %v11125_v42 = vmov %v11124_v15  ;;  %3209 = vrot.lane.b32.xlu0 %v9353_v26, %s7173_s20  ;;  %v3192_v63 = vpop.permute.xlu0 %3191  ;;  %v2557_v31 = vsel %vm2513_vm2, %v2466_v32, %v2481_v12  ;;  %v9474_v16 = vpop.permute.xlu1 %2927 }
 0x218   : > { %v2571_v11 = vsel %vm2513_vm2, %v11125_v42, %v2465_v34  ;;  %11126 = vst [vmem:[#allocation44_spill] sm:$0xff] %v9453_v47  ;;  %v2572_v34 = vsel %vm2513_vm2, %v2511_v51, %v2466_v32  ;;  %v3652_v41 = vsel %vm3386_vm5, %v3584_v13, %v3192_v63  ;;  %v2527_v32 = vsel %vm2513_vm2, %v2496_v60, %v2511_v51 }
 0x219   : > { %v9459_v15 = vpack.c.bf16 %v2571_v11, %v2526_v50  ;;  %v9476_v11 = vpop.f32.mrb[131].mxu0  ;;  %v2542_v50 = vsel %vm2513_vm2, %v2481_v12, %v2496_v60  ;;  %v9488_v42 = vpack.c.bf16 %v9264_v8, %v9262_v21  ;;  %4047 = vmatprep.mubr.bf16.mxu1 %v3652_v41  ;;  %v3412_v13 = vsel %vm3386_vm5, %v3343_v3, %v9285_v22  ;;  %v11127_v12 = vld [vmem:[#allocation30_spill] sm:$0xff]  ;;  %v11132_v8 = vld [vmem:[#allocation23_spill] sm:$0xff] }
 0x21a   : > { %v9494_v0 = vpack.c.bf16 %v2542_v50, %v2557_v31  ;;  %v9496_v63 = vpack.c.bf16 %v2572_v34, %v2527_v32  ;;  %v3506_v51 = vsel %vm984_vm0, %v11127_v12, %v9308_v40  ;;  %4048 = vmatmul.mubr.bf16.gmra.mrb[32].mxu1 %v3412_v13  ;;  %v2497_v60 = vrot.slane %v9254_v58, 2  ;;  %v11129_v31 = vld [vmem:[#allocation12_spill] sm:$0xff]  ;;  %v11131_v32 = vld [vmem:[#allocation15_spill] sm:$0xff]  ;;  %2857 = vrot.lane.b32.xlu1 %v9353_v26, %s7172_s28 }
 0x21b   : > { %3091 = vrot.lane.b32.xlu0 %v9015_v9, %s7172_s28  ;;  %v3586_v41 = vsel %vm3325_vm4, %v3506_v51, %v9355_v36  ;;  %v3194_v22 = vpop.permute.xlu0 %3193  ;;  %v2558_v3 = vsel %vm2513_vm2, %v2467_v23, %v2482_v29  ;;  %v11128_v21 = vrot.slane %v9256_v59, 2  ;;  %6863 = vmatmul.mubr.msk.bf16.gmra.mrb[180].mxu0 %vm984_vm0, %v11129_v31  ;;  %v3018_v9 = vpop.permute.xlu1 %3017 }
 0x21c   : > { %v3655_v58 = vsel %vm3386_vm5, %v3586_v41, %v3194_v22  ;;  %v2543_v36 = vsel %vm2513_vm2, %v2482_v29, %v2497_v60  ;;  %6866 = vmatprep.mubr.msk.bf16.mxu0 %vm984_vm0, %v11131_v32  ;;  %v3264_v29 = vsel %vm984_vm0, %v11132_v8, %v9192_v39  ;;  %v11133_v39 = vld [vmem:[#allocation16_spill] sm:$0xff] }
 0x21d   : > { %v2573_v40 = vsel %vm2513_vm2, %v11128_v21, %v2467_v23  ;;  %v11130_v34 = vmov %v11128_v21  ;;  %4055 = vmatprep.mubr.bf16.mxu1 %v3655_v58  ;;  %v9528_v13 = vpack.c.bf16 %v2543_v36, %v2558_v3  ;;  %v3345_v12 = vsel %vm3325_vm4, %v3264_v29, %v9215_v30  ;;  %v11135_v32 = vld [vmem:[#allocation28_spill] sm:$0xff] }
 0x21e   : > { %v2528_v50 = vsel %vm2513_vm2, %v2497_v60, %v11130_v34  ;;  %v3415_v60 = vsel %vm3386_vm5, %v3345_v12, %v9243_v14  ;;  %2947 = vrot.lane.b32.xlu1 %v9028_v20, %s7171_s19  ;;  %v11134_v34 = vld [vmem:[#allocation33_spill] sm:$0xff]  ;;  %v3267_v8 = vsel %vm984_vm0, %v11135_v32, %v9322_v5 }
 0x21f   : > { %v9530_v23 = vpack.c.bf16 %v2573_v40, %v2528_v50  ;;  %3093 = vrot.lane.b32.xlu0 %v9028_v20, %s7172_s28  ;;  %v3076_v59 = vpop.permute.xlu0 %3075  ;;  %v3016_v51 = vpop.permute.xlu1 %3015 }
 0x220   : > { %v3509_v50 = vsel %vm984_vm0, %v11134_v34, %v3076_v59  ;;  %v11136_v34 = vld [vmem:[#allocation34_spill] sm:$0xff] }
 0x222   : > { %4056 = vmatmul.mubr.bf16.gmra.mrb[36].mxu1 %v3415_v60  ;;  %3037 = vrot.lane.b32.xlu1 %v9359_v43, %s7173_s20  ;;  %v9555_v14 = vpop.f32.mrb[132].mxu0  ;;  %v3347_v60 = vsel %vm3325_vm4, %v3267_v8, %v9366_v19 }
 0x223   : > { %3153 = vrot.lane.b32.xlu0 %v9359_v43, %s7171_s19  ;;  %v3078_v41 = vpop.permute.xlu0 %3077  ;;  %6867 = vmatmul.mubr.msk.bf16.gmra.mrb[184].mxu0 %vm984_vm0, %v11133_v39  ;;  %v9549_v22 = vpop.permute.xlu1 %2839  ;;  %v3418_v59 = vsel %vm3386_vm5, %v3347_v60, %v3016_v51  ;;  %v11137_v51 = vld [vmem:[#allocation27_spill] sm:$0xff] }
 0x224   : > { %v9557_v20 = vpop.f32.mrb[133].mxu0 }
 0x225   : > { %v9559_v21 = vpop.f32.mrb[134].mxu0 }
 0x226   : > { %3035 = vrot.lane.b32.xlu1 %v9370_v56, %s7173_s20  ;;  %v9563_v40 = vpop.f32.mrb[135].mxu0 }
 0x227   : > { %3151 = vrot.lane.b32.xlu0 %v9370_v56, %s7171_s19  ;;  %v3138_v30 = vpop.permute.xlu0 %3137  ;;  %v2930_v3 = vpop.permute.xlu1 %2929  ;;  %v3512_v56 = vsel %vm984_vm0, %v11136_v34, %v3078_v41  ;;  %v3270_v41 = vsel %vm984_vm0, %v11137_v51, %v9416_v55 }
 0x228   : > { %v3590_v5 = vsel %vm3325_vm4, %v3512_v56, %v3138_v30 }
 0x22a   : > { %2859 = vrot.lane.b32.xlu1 %v9418_v38, %s7172_s28 }
 0x22b   : > { %3211 = vrot.lane.b32.xlu0 %v9418_v38, %s7173_s20  ;;  %v3136_v58 = vpop.permute.xlu0 %3135  ;;  %v9567_v36 = vpop.permute.xlu1 %2841 }
 0x22c   : > { %v3588_v29 = vsel %vm3325_vm4, %v3509_v50, %v3136_v58 }
 0x22e   : > { %2949 = vrot.lane.b32.xlu1 %v9159_v48, %s7171_s19 }
 0x22f   : > { %3213 = vrot.lane.b32.xlu0 %v9420_v10, %s7173_s20  ;;  %v3196_v12 = vpop.permute.xlu0 %3195  ;;  %v9582_v43 = vpop.permute.xlu1 %2931 }
 0x230   : > { %v3658_v39 = vsel %vm3386_vm5, %v3588_v29, %v3196_v12 }
 0x231   : > { %4063 = vmatprep.mubr.bf16.mxu1 %v3658_v39 }
 0x232   : > { %4064 = vmatmul.mubr.bf16.gmra.mrb[40].mxu1 %v3418_v59  ;;  %2861 = vrot.lane.b32.xlu1 %v9420_v10, %s7172_s28  ;;  %v9602_v30 = vpop.f32.mrb[136].mxu0 }
 0x233   : > { %3095 = vrot.lane.b32.xlu0 %v9159_v48, %s7172_s28  ;;  %v3198_v19 = vpop.permute.xlu0 %3197  ;;  %v3022_v50 = vpop.permute.xlu1 %3021  ;;  %v3349_v48 = vsel %vm3325_vm4, %v3270_v41, %v9474_v16 }
 0x234   : > { %v3661_v58 = vsel %vm3386_vm5, %v3590_v5, %v3198_v19  ;;  %v3421_v8 = vsel %vm3386_vm5, %v3349_v48, %v3018_v9  ;;  %v9607_v29 = vpop.f32.mrb[137].mxu0  ;;  %v11143_v48 = vld [vmem:[#allocation32_spill] sm:$0xff] }
 0x235   : > { %4071 = vmatprep.mubr.bf16.mxu1 %v3661_v58  ;;  %v9611_v12 = vpop.f32.mrb[138].mxu0  ;;  %v11141_v58 = vld [vmem:[#allocation37_spill] sm:$0xff] }
 0x236   : > { %3039 = vrot.lane.b32.xlu1 %v9393_v1, %s7173_s20  ;;  %v9613_v60 = vpop.f32.mrb[139].mxu0 }
 0x237   : > { %3097 = vrot.lane.b32.xlu0 %v9162_v6, %s7172_s28  ;;  %v3080_v32 = vpop.permute.xlu0 %3079  ;;  %v3020_v56 = vpop.permute.xlu1 %3019 }
 0x238   : > { %v3515_v51 = vsel %vm984_vm0, %v11141_v58, %v3080_v32 }
 0x23a   : > { %4072 = vmatmul.mubr.bf16.gmra.mrb[44].mxu1 %v3421_v8  ;;  %2951 = vrot.lane.b32.xlu1 %v9162_v6, %s7171_s19  ;;  %v3273_v8 = vsel %vm984_vm0, %v11143_v48, %v9549_v22 }
 0x23b   : > { %3157 = vrot.lane.b32.xlu0 %v9381_v45, %s7171_s19  ;;  %v3082_v55 = vpop.permute.xlu0 %3081  ;;  %v9615_v16 = vpop.permute.xlu1 %2843 }
 0x23e   : > { %3041 = vrot.lane.b32.xlu1 %v9381_v45, %s7173_s20  ;;  %v9627_v34 = vpop.f32.mrb[140].mxu0 }
 0x23f   : > { %3155 = vrot.lane.b32.xlu0 %v9393_v1, %s7171_s19  ;;  %v3142_v9 = vpop.permute.xlu0 %3141  ;;  %v9621_v39 = vpop.permute.xlu1 %2933  ;;  %11138 = vst [vmem:[#allocation25_spill] sm:$0xff] %v9627_v34 }
 0x240   : > { %v9631_v19 = vpop.f32.mrb[141].mxu0 }
 0x241   : > { %11139 = vst [vmem:[#allocation26_spill] sm:$0xff] %v9631_v19  ;;  %v9633_v6 = vpop.f32.mrb[142].mxu0 }
 0x242   : > { %11140 = vst [vmem:[#allocation47_spill] sm:$0xff] %v9633_v6  ;;  %2863 = vrot.lane.b32.xlu1 %v9444_v35, %s7172_s28  ;;  %v9639_v41 = vpop.f32.mrb[143].mxu0  ;;  %v3351_v6 = vsel %vm3325_vm4, %v3273_v8, %v2930_v3 }
 0x243   : > { %3215 = vrot.lane.b32.xlu0 %v9444_v35, %s7173_s20  ;;  %v3140_v59 = vpop.permute.xlu0 %3139  ;;  %v9629_v5 = vpop.permute.xlu1 %2845  ;;  %11142 = vst [vmem:[#allocation19_spill] sm:$0xff] %v9639_v41  ;;  %v3424_v58 = vsel %vm3386_vm5, %v3351_v6, %v3020_v56  ;;  %v11144_v41 = vld [vmem:[#allocation42_spill] sm:$0xff]  ;;  %v11145_v56 = vld [vmem:[#allocation31_spill] sm:$0xff] }
 0x244   : > { %v3592_v45 = vsel %vm3325_vm4, %v3515_v51, %v3140_v59  ;;  %v3518_v19 = vsel %vm984_vm0, %v11144_v41, %v3082_v55  ;;  %v3276_v55 = vsel %vm984_vm0, %v11145_v56, %v9567_v36 }
 0x245   : > { %v3594_v22 = vsel %vm3325_vm4, %v3518_v19, %v3142_v9 }
 0x246   : > { %2953 = vrot.lane.b32.xlu1 %v9213_v62, %s7171_s19 }
 0x247   : > { %3217 = vrot.lane.b32.xlu0 %v9459_v15, %s7173_s20  ;;  %v3200_v1 = vpop.permute.xlu0 %3199  ;;  %v9649_v32 = vpop.permute.xlu1 %2935 }
 0x248   : > { %v3664_v34 = vsel %vm3386_vm5, %v3592_v45, %v3200_v1 }
 0x249   : > { %4079 = vmatprep.mubr.bf16.mxu1 %v3664_v34 }
 0x24a   : > { %4080 = vmatmul.mubr.bf16.gmra.mrb[48].mxu1 %v3424_v58  ;;  %3043 = vrot.lane.b32.xlu1 %v9409_v17, %s7173_s20 }
 0x24b   : > { %3099 = vrot.lane.b32.xlu0 %v9213_v62, %s7172_s28  ;;  %v3202_v3 = vpop.permute.xlu0 %3201  ;;  %v9660_v1 = vpop.permute.xlu1 %3025  ;;  %v3353_v62 = vsel %vm3325_vm4, %v3276_v55, %v9582_v43  ;;  %v11151_v55 = vld [vmem:[#allocation36_spill] sm:$0xff] }
 0x24c   : > { %v3667_v45 = vsel %vm3386_vm5, %v3594_v22, %v3202_v3  ;;  %v3427_v34 = vsel %vm3386_vm5, %v3353_v62, %v3022_v50  ;;  %v11149_v22 = vld [vmem:[#allocation38_spill] sm:$0xff]  ;;  %v3279_v62 = vsel %vm984_vm0, %v11151_v55, %v9615_v16 }
 0x24d   : > { %4087 = vmatprep.mubr.bf16.mxu1 %v3667_v45  ;;  %v11150_v45 = vld [vmem:[#allocation46_spill] sm:$0xff] }
 0x24e   : > { %2865 = vrot.lane.b32.xlu1 %v9459_v15, %s7172_s28 }
 0x24f   : > { %3101 = vrot.lane.b32.xlu0 %v9218_v4, %s7172_s28  ;;  %v3084_v59 = vpop.permute.xlu0 %3083  ;;  %v3024_v9 = vpop.permute.xlu1 %3023 }
 0x250   : > { %v3521_v56 = vsel %vm984_vm0, %v11150_v45, %v3084_v59 }
 0x251   : > { %v9680_v6 = vpop.f32.mrb[144].mxu0 }
 0x252   : > { %4088 = vmatmul.mubr.bf16.gmra.mrb[52].mxu1 %v3427_v34  ;;  %2955 = vrot.lane.b32.xlu1 %v9218_v4, %s7171_s19  ;;  %11146 = vst [vmem:[#allocation24_spill] sm:$0xff] %v9680_v6  ;;  %v9684_v43 = vpop.f32.mrb[145].mxu0  ;;  %v11152_v34 = vld [vmem:[#allocation10_spill] sm:$0xff] }
 0x253   : > { %3159 = vrot.lane.b32.xlu0 %v9409_v17, %s7171_s19  ;;  %v9676_v19 = vpop.permute.xlu1 %2847  ;;  %v3086_v36 = vpop.permute.xlu0 %3085 }
 0x254   : > { %v9688_v51 = vpop.f32.mrb[146].mxu0 }
 0x255   : > { %11147 = vst [vmem:[#allocation29_spill] sm:$0xff] %v9688_v51  ;;  %v9690_v41 = vpop.f32.mrb[147].mxu0  ;;  %v3355_v51 = vsel %vm3325_vm4, %v3279_v62, %v9621_v39 }
 0x256   : > { %11148 = vst [vmem:[#allocation9_spill] sm:$0xff] %v9690_v41  ;;  %3045 = vrot.lane.b32.xlu1 %v9453_v47, %s7173_s20  ;;  %v3430_v59 = vsel %vm3386_vm5, %v3355_v51, %v3024_v9 }
 0x257   : > { %3219 = vrot.lane.b32.xlu0 %v9494_v0, %s7173_s20  ;;  %v9686_v50 = vpop.permute.xlu1 %2937  ;;  %v3146_v4 = vpop.permute.xlu0 %3145 }
 0x25a   : > { %2867 = vrot.lane.b32.xlu1 %v9494_v0, %s7172_s28 }
 0x25b   : > { %3161 = vrot.lane.b32.xlu0 %v9453_v47, %s7171_s19  ;;  %v9696_v48 = vpop.permute.xlu1 %2849  ;;  %v3144_v58 = vpop.permute.xlu0 %3143 }
 0x25c   : > { %v3596_v47 = vsel %vm3325_vm4, %v3521_v56, %v3144_v58  ;;  %v11153_v58 = vld [vmem:[#allocation39_spill] sm:$0xff] }
 0x25e   : > { %2957 = vrot.lane.b32.xlu1 %v9279_v24, %s7171_s19 }
 0x25f   : > { %3221 = vrot.lane.b32.xlu0 %v9496_v63, %s7173_s20  ;;  %v9702_v8 = vpop.permute.xlu1 %2939 }
 0x262   : > { %2869 = vrot.lane.b32.xlu1 %v9496_v63, %s7172_s28 }
 0x263   : > { %3167 = vrot.lane.b32.xlu0 %v11149_v22, %s7171_s19  ;;  %v9708_v3 = vpop.permute.xlu1 %3029  ;;  %v3204_v17 = vpop.permute.xlu0 %3203 }
 0x264   : > { %v3670_v6 = vsel %vm3386_vm5, %v3596_v47, %v3204_v17  ;;  %v9724_v45 = vpop.f32.mrb[148].mxu0  ;;  %v3524_v47 = vsel %vm984_vm0, %v8795_v52, %v3086_v36 }
 0x265   : > { %4095 = vmatprep.mubr.bf16.mxu1 %v3670_v6  ;;  %v9728_v16 = vpop.f32.mrb[149].mxu0  ;;  %v11155_v6 = vld [vmem:[#allocation35_spill] sm:$0xff]  ;;  %v3598_v55 = vsel %vm3325_vm4, %v3524_v47, %v3146_v4  ;;  %v7057_v47 = vld [vmem:[%s10955_s7 + $0x40] sm:$0xff]  }
 0x266   : > { %4096 = vmatmul.mubr.bf16.gmra.mrb[56].mxu1 %v3430_v59  ;;  %2959 = vrot.lane.b32.xlu1 %v9297_v33, %s7171_s19  ;;  %v9732_v56 = vpop.f32.mrb[150].mxu0  ;;  %v3282_v51 = vsel %vm984_vm0, %v11155_v6, %v9629_v5  ;;  %v7058_v6 = vld [vmem:[%s10955_s7] sm:$0xff]  }
 0x267   : > { %3227 = vrot.lane.b32.xlu0 %v11152_v34, %s7173_s20  ;;  %v3028_v41 = vpop.permute.xlu1 %3027  ;;  %11154 = vst [vmem:[#allocation30_spill] sm:$0xff] %v9732_v56  ;;  %v9736_v17 = vpop.f32.mrb[151].mxu0  ;;  %v3357_v59 = vsel %vm3325_vm4, %v3282_v51, %v9649_v32  ;;  %6472 = vmatprep.subr.bf16.mxu1 %v7057_v47 }
 0x268   : > { %v3433_v52 = vsel %vm3386_vm5, %v3357_v59, %v9660_v1  ;;  %6473 = vmatpush3.bf16.msra.mxu1 %v7058_v6 }
 0x26a   : > { %3047 = vrot.lane.b32.xlu1 %v9488_v42, %s7173_s20 }
 0x26b   : > { %3169 = vrot.lane.b32.xlu0 %v11153_v58, %s7171_s19  ;;  %v9734_v39 = vpop.permute.xlu1 %2851 }
 0x26e   : > { %3049 = vrot.lane.b32.xlu1 %v9471_v27, %s7173_s20 }
 0x26f   : > { %3103 = vrot.lane.b32.xlu0 %v9279_v24, %s7172_s28  ;;  %v9744_v9 = vpop.permute.xlu1 %2941 }
 0x271   : > { %v3206_v62 = vpop.permute.xlu0 %3205 }
 0x272   : > { %v3673_v56 = vsel %vm3386_vm5, %v3598_v55, %v3206_v62  ;;  %3051 = vrot.lane.b32.xlu1 %v11149_v22, %s7173_s20  ;;  %v11160_v62 = vld [vmem:[#allocation11_spill] sm:$0xff] }
 0x273   : > { %4103 = vmatprep.mubr.bf16.mxu1 %v3673_v56  ;;  %3105 = vrot.lane.b32.xlu0 %v9297_v33, %s7172_s28  ;;  %v9759_v5 = vpop.permute.xlu1 %2853 }
 0x274   : > { %4104 = vmatmul.mubr.bf16.gmra.mrb[60].mxu1 %v3433_v52 }
 0x275   : > { %v3088_v24 = vpop.permute.xlu0 %3087 }
 0x276   : > { %2871 = vrot.lane.b32.xlu1 %v9528_v13, %s7172_s28  ;;  %v9771_v33 = vpop.f32.mrb[152].mxu0  ;;  %v3527_v52 = vsel %vm984_vm0, %v9106_v61, %v3088_v24 }
 0x277   : > { %3165 = vrot.lane.b32.xlu0 %v9471_v27, %s7171_s19  ;;  %v9767_v36 = vpop.permute.xlu1 %2943  ;;  %11156 = vst [vmem:[#allocation12_spill] sm:$0xff] %v9771_v33  ;;  %v9773_v1 = vpop.f32.mrb[153].mxu0 }
 0x278   : > { %11157 = vst [vmem:[#allocation15_spill] sm:$0xff] %v9773_v1  ;;  %v9775_v56 = vpop.f32.mrb[154].mxu0 }
 0x279   : > { %v3090_v32 = vpop.permute.xlu0 %3089  ;;  %11158 = vst [vmem:[#allocation23_spill] sm:$0xff] %v9775_v56  ;;  %v9779_v22 = vpop.f32.mrb[155].mxu0  ;;  %v11161_v56 = vld [vmem:[#allocation45_spill] sm:$0xff] }
 0x27a   : > { %2961 = vrot.lane.b32.xlu1 %v9338_v7, %s7171_s19  ;;  %11159 = vst [vmem:[#allocation16_spill] sm:$0xff] %v9779_v22  ;;  %v3285_v33 = vsel %vm984_vm0, %v11161_v56, %v9676_v19  ;;  %v3530_v19 = vsel %vm984_vm0, %v9195_v53, %v3090_v32 }
 0x27b   : > { %3163 = vrot.lane.b32.xlu0 %v9488_v42, %s7171_s19  ;;  %v9789_v51 = vpop.permute.xlu1 %3033  ;;  %v3359_v47 = vsel %vm3325_vm4, %v3285_v33, %v9686_v50 }
 0x27c   : > { %v3436_v61 = vsel %vm3386_vm5, %v3359_v47, %v3028_v41  ;;  %v11162_v41 = vld [vmem:[#allocation43_spill] sm:$0xff] }
 0x27d   : > { %v3150_v4 = vpop.permute.xlu0 %3149 }
 0x27e   : > { %2873 = vrot.lane.b32.xlu1 %v9530_v23, %s7172_s28  ;;  %v3602_v56 = vsel %vm3325_vm4, %v3530_v19, %v3150_v4 }
 0x27f   : > { %3223 = vrot.lane.b32.xlu0 %v9528_v13, %s7173_s20  ;;  %v3032_v59 = vpop.permute.xlu1 %3031 }
 0x281   : > { %v3148_v55 = vpop.permute.xlu0 %3147 }
 0x282   : > { %v3600_v22 = vsel %vm3325_vm4, %v3527_v52, %v3148_v55  ;;  %2963 = vrot.lane.b32.xlu1 %v9351_v57, %s7171_s19 }
 0x283   : > { %3229 = vrot.lane.b32.xlu0 %v11160_v62, %s7173_s20  ;;  %v9809_v24 = vpop.permute.xlu1 %2855 }
 0x285   : > { %v3208_v1 = vpop.permute.xlu0 %3207 }
 0x286   : > { %v3676_v6 = vsel %vm3386_vm5, %v3600_v22, %v3208_v1  ;;  %3053 = vrot.lane.b32.xlu1 %v11153_v58, %s7173_s20  ;;  %v3288_v22 = vsel %vm984_vm0, %v11162_v41, %v9696_v48 }
 0x287   : > { %4111 = vmatprep.mubr.bf16.mxu1 %v3676_v6  ;;  %3225 = vrot.lane.b32.xlu0 %v9530_v23, %s7173_s20  ;;  %v9819_v1 = vpop.permute.xlu1 %2945  ;;  %v3361_v32 = vsel %vm3325_vm4, %v3288_v22, %v9702_v8 }
 0x288   : > { %4112 = vmatmul.mubr.bf16.gmra.mrb[64].mxu1 %v3436_v61  ;;  %v3439_v58 = vsel %vm3386_vm5, %v3361_v32, %v9708_v3  ;;  %v11163_v3 = vld [vmem:[#allocation14_spill] sm:$0xff]  ;;  %v3291_v32 = vsel %vm984_vm0, %v9044_v54, %v9734_v39  ;;  %v9871_v39 = vld [vmem:[%s10953_s5] ss:$0 sm:$0xff] }
 0x289   : > { %v3210_v50 = vpop.permute.xlu0 %3209 }
 0x28a   : > { %v3679_v33 = vsel %vm3386_vm5, %v3602_v56, %v3210_v50  ;;  %v11164_v50 = vld [vmem:[#allocation17_spill] sm:$0xff] }
 0x28b   : > { %4119 = vmatprep.mubr.bf16.mxu1 %v3679_v33  ;;  %3107 = vrot.lane.b32.xlu0 %v9338_v7, %s7172_s28 }
 0x28c   : > { %v9830_v4 = vpop.permute.xlu1 %2857 }
 0x28d   : > { %v3092_v53 = vpop.permute.xlu0 %3091 }
 0x28e   : > { %v3985_v55 = vpop.f32.mrb[0].mxu1  ;;  %v3533_v33 = vsel %vm984_vm0, %v9336_v46, %v3092_v53  ;;  %v3363_v46 = vsel %vm3325_vm4, %v3291_v32, %v9744_v9  ;;  %v11166_v32 = vld [vmem:[#allocation48_spill] sm:$0xff] }
 0x28f   : > { %3111 = vrot.lane.b32.xlu0 %v11123_v49, %s7172_s28  ;;  %v4247_v48 = vadd.f32 %v9442_v37, %v3985_v55  ;;  %v3987_v47 = vpop.f32.mrb[1].mxu1  ;;  %v3442_v54 = vsel %vm3386_vm5, %v3363_v46, %v3032_v59 }
 0x290   : > { %4120 = vmatmul.mubr.bf16.gmra.mrb[68].mxu1 %v3439_v58  ;;  %v9834_v52 = vpop.permute.xlu1 %2947  ;;  %v3988_v6 = vpop.f32.mrb[2].mxu1 }
 0x291   : > { %v3094_v7 = vpop.permute.xlu0 %3093  ;;  %v4250_v49 = vadd.f32 %v9476_v11, %v3988_v6  ;;  %v3990_v61 = vpop.f32.mrb[3].mxu1  ;;  %v7059_v11 = vld [vmem:[%s10955_s7 + $0x48] sm:$0xff]  }
 0x292   : > { %6474 = vmatprep.subr.bf16.mxu1 %v7059_v11  ;;  %v3536_v9 = vsel %vm984_vm0, %v9353_v26, %v3094_v7  ;;  %v11165_v11 = vld [vmem:[#allocation13_spill] sm:$0xff]  ;;  %v9891_v26 = vld [vmem:[%s10954_s6] ss:$0 sm:$0xff] }
 0x293   : > { %3109 = vrot.lane.b32.xlu0 %v9351_v57, %s7172_s28  ;;  %v4480_v7 = vmul.f32 %v9871_v39, %v4250_v49  ;;  %v11167_v49 = vld [vmem:[#allocation18_spill] sm:$0xff] }
 0x294   : > { %v9840_v19 = vpop.permute.xlu1 %3037 }
 0x295   : > { %v3154_v8 = vpop.permute.xlu0 %3153 }
 0x296   : > { %v3993_v57 = vpop.f32.mrb[4].mxu1 }
 0x297   : > { %3171 = vrot.lane.b32.xlu0 %v11163_v3, %s7171_s19  ;;  %v4255_v41 = vadd.f32 %v9431_v2, %v3993_v57  ;;  %v3995_v22 = vpop.f32.mrb[5].mxu1  ;;  %v7060_v3 = vld [vmem:[%s10955_s7 + $0x8] sm:$0xff]   ;;  %v3606_v57 = vsel %vm3325_vm4, %v3536_v9, %v3154_v8 }
 0x298   : > { %v9846_v37 = vpop.permute.xlu1 %3035  ;;  %v3996_v47 = vpop.f32.mrb[6].mxu1  ;;  %6475 = vmatpush3.bf16.msra.mxu1 %v7060_v3  ;;  %v4479_v22 = vmul.f32 %v9871_v39, %v4247_v48  ;;  %v4534_v3 = vadd.f32 %v9891_v26, %v4480_v7 }
 0x299   : > { %v3152_v56 = vpop.permute.xlu0 %3151  ;;  %v4258_v2 = vadd.f32 %v9457_v28, %v3996_v47  ;;  %v3998_v6 = vpop.f32.mrb[7].mxu1 }
 0x29a   : > { %v3604_v58 = vsel %vm3325_vm4, %v3533_v33, %v3152_v56  ;;  %v9860_v61 = vpop.f32.mrb[156].mxu0  ;;  %v4533_v46 = vadd.f32 %v9891_v26, %v4479_v22 }
 0x29b   : > { %3231 = vrot.lane.b32.xlu0 %v11164_v50, %s7173_s20  ;;  %v9873_v28 = vpop.f32.mrb[157].mxu0 }
 0x29c   : > { %v9877_v56 = vpop.permute.xlu1 %2859  ;;  %v9879_v50 = vpop.f32.mrb[158].mxu0  ;;  %v4581_v22 = vmax.f32 %v4533_v46, 0.0 }
 0x29d   : > { %v3212_v55 = vpop.permute.xlu0 %3211  ;;  %v9882_v33 = vpop.f32.mrb[159].mxu0 }
 0x29e   : > { %v3682_v53 = vsel %vm3386_vm5, %v3604_v58, %v3212_v55  ;;  %v3294_v58 = vsel %vm984_vm0, %v11166_v32, %v9759_v5  ;;  %v4582_v32 = vmax.f32 %v4534_v3, 0.0 }
 0x29f   : > { %4127 = vmatprep.mubr.bf16.mxu1 %v3682_v53  ;;  %3113 = vrot.lane.b32.xlu0 %v11129_v31, %s7172_s28  ;;  %v3365_v48 = vsel %vm3325_vm4, %v3294_v58, %v9767_v36  ;;  %s7176_s28 = smov [#allocation2]  }
 0x2a0   : > { %4128 = vmatmul.mubr.bf16.gmra.mrb[72].mxu1 %v3442_v54  ;;  %v9894_v8 = vpop.permute.xlu1 %2949  ;;  %v4001_v47 = vpop.f32.mrb[8].mxu1  ;;  %v3445_v54 = vsel %vm3386_vm5, %v3365_v48, %v9789_v51  ;;  %v4482_v51 = vmul.f32 %v9871_v39, %v4258_v2  ;;  %v4632_v3 = vsel %vm3325_vm4, %v4582_v32, -inf  ;;  %v7062_v32 = vld [vmem:[%s10955_s7 + $0x10] sm:$0xff]   ;;  %s7110_s26 = sshll.u32 %s7176_s28, 4  ;;  %s7111_s26 = int_to_ptr.vmem [resolvable:$false] %s7110_s26 }
 0x2a1   : > { %v3214_v31 = vpop.permute.xlu0 %3213  ;;  %v4263_v53 = vadd.f32 %v9557_v20, %v4001_v47  ;;  %v4003_v6 = vpop.f32.mrb[9].mxu1  ;;  %v4481_v20 = vmul.f32 %v9871_v39, %v4255_v41  ;;  %s7112_s23 = scalar_lea.vmem %s7111_s26, 32  ;;  %p7113_p0 = scmp.lt.s32.totalorder %s10908_s29, %s7111_s26 }
 0x2a2   : > { %v3685_v59 = vsel %vm3386_vm5, %v3606_v57, %v3214_v31  ;;  %v4004_v9 = vpop.f32.mrb[10].mxu1  ;;  %p7114_p1 = scmp.lt.s32.totalorder %s7112_s23, %s7106_s30 }
 0x2a3   : > { %4135 = vmatprep.mubr.bf16.mxu1 %v3685_v59  ;;  %3173 = vrot.lane.b32.xlu0 %v11165_v11, %s7171_s19  ;;  %v4483_v5 = vmul.f32 %v9871_v39, %v4263_v53  ;;  %v4266_v36 = vadd.f32 %v9563_v40, %v4004_v9  ;;  %v4006_v31 = vpop.f32.mrb[11].mxu1  ;;  %v4535_v53 = vadd.f32 %v9891_v26, %v4481_v20 }
 0x2a4   : > { %v9909_v57 = vpop.permute.xlu1 %2861  ;;  %p7115_p2 = por %p7114_p1, %p7113_p0 }
 0x2a5   : > { %v3096_v55 = vpop.permute.xlu0 %3095  ;;  %v4537_v11 = vadd.f32 %v9891_v26, %v4483_v5  ;;  %v4484_v7 = vmul.f32 %v9871_v39, %v4266_v36  ;;  %v4536_v36 = vadd.f32 %v9891_v26, %v4482_v51 }
 0x2a6   : > { %p7116_p3 = pnand %p7115_p2, %p7109_p13 }
 0x2a7   : > { %3233 = vrot.lane.b32.xlu0 %v11167_v49, %s7173_s20  ;;  %v4585_v58 = vmax.f32 %v4537_v11, 0.0  ;;  %v4538_v47 = vadd.f32 %v9891_v26, %v4484_v7  ;;  %v4629_v49 = vsel %vm3325_vm4, %v4581_v22, -inf  ;;  %s6370_s20 = sshll.u32 %s7283_s25, 4  ;;  %s6055_s25 = scalar_lea.sflag [#allocation3], %s512_s18 }
 0x2a8   : > { %4136 = vmatmul.mubr.bf16.gmra.mrb[76].mxu1 %v3445_v54  ;;  %v9917_v48 = vpop.permute.xlu1 %3039  ;;  %v4009_v6 = vpop.f32.mrb[12].mxu1 }
 0x2a9   : > { %v3098_v59 = vpop.permute.xlu0 %3097  ;;  %v4630_v41 = vsel %vm3325_vm4, %v4585_v58, -inf  ;;  %v4586_v46 = vmax.f32 %v4538_v47, 0.0  ;;  %v4271_v54 = vadd.f32 %v9555_v14, %v4009_v6  ;;  %v4011_v9 = vpop.f32.mrb[13].mxu1  ;;  %v7061_v14 = vld [vmem:[%s10955_s7 + $0x50] sm:$0xff]   ;;  %v4583_v58 = vmax.f32 %v4535_v53, 0.0 }
 0x2aa   : > { %v4631_v2 = vmax.f32 %v4629_v49, %v4630_v41  ;;  %v4012_v5 = vpop.f32.mrb[14].mxu1  ;;  %6476 = vmatprep.subr.bf16.mxu1 %v7061_v14  ;;  %v4584_v9 = vmax.f32 %v4536_v36, 0.0 }
 0x2ab   : > { %v4633_v31 = vsel %vm3325_vm4, %v4586_v46, -inf  ;;  %v4485_v20 = vmul.f32 %v9871_v39, %v4271_v54  ;;  %v4274_v22 = vadd.f32 %v9559_v21, %v4012_v5  ;;  %v4014_v7 = vpop.f32.mrb[15].mxu1  ;;  %v3297_v21 = vsel %vm984_vm0, %v9252_v44, %v9809_v24  ;;  %6477 = vmatpush3.bf16.msra.mxu1 %v7062_v32 }
 0x2ac   : > { %v9927_v11 = vpop.permute.xlu1 %2951  ;;  %v4634_v51 = vmax.f32 %v4632_v3, %v4633_v31  ;;  %v4701_v41 = vrot.slane %v4631_v2, 2  ;;  %v3539_v54 = vsel %vm984_vm0, %v9418_v38, %v3096_v55  ;;  %v3367_v31 = vsel %vm3325_vm4, %v3297_v21, %v9819_v1 }
 0x2ad   : > { %v3158_v40 = vpop.permute.xlu0 %3157  ;;  %v4539_v6 = vadd.f32 %v9891_v26, %v4485_v20  ;;  %v4486_v49 = vmul.f32 %v9871_v39, %v4274_v22  ;;  %v4635_v20 = vsel %vm3325_vm4, %v4583_v58, -inf  ;;  %v3448_v14 = vsel %vm3386_vm5, %v3367_v31, %v9846_v37 }
 0x2ae   : > { %v4707_v46 = vrot.slane %v4634_v51, 2  ;;  %v3542_v1 = vsel %vm984_vm0, %v9420_v10, %v3098_v59  ;;  %v4638_v58 = vsel %vm3325_vm4, %v4584_v9, -inf  ;;  %v3300_v10 = vsel %vm984_vm0, %v9234_v18, %v9830_v4 }
 0x2af   : > { %v4587_v5 = vmax.f32 %v4539_v6, 0.0  ;;  %v4540_v53 = vadd.f32 %v9891_v26, %v4486_v49 }
 0x2b0   : > { %v9944_v3 = vpop.permute.xlu1 %3041  ;;  %v4737_v24 = vsel %vm2513_vm2, %v4701_v41, %v4707_v46 }
 0x2b1   : > { %v3156_v47 = vpop.permute.xlu0 %3155  ;;  %v4749_v7 = vmax.f32 %v4631_v2, %v4737_v24  ;;  %v4636_v55 = vsel %vm3325_vm4, %v4587_v5, -inf  ;;  %v4588_v36 = vmax.f32 %v4540_v53, 0.0  ;;  %v3610_v2 = vsel %vm3325_vm4, %v3542_v1, %v3158_v40 }
 0x2b2   : > { %v3608_v22 = vsel %vm3325_vm4, %v3539_v54, %v3156_v47  ;;  %v4637_v32 = vmax.f32 %v4635_v20, %v4636_v55  ;;  %v3369_v40 = vsel %vm3325_vm4, %v3300_v10, %v9834_v52 }
 0x2b3   : > { %v4639_v47 = vsel %vm3325_vm4, %v4588_v36, -inf  ;;  %v3451_v36 = vsel %vm3386_vm5, %v3369_v40, %v9840_v19 }
 0x2b4   : > { %v9960_v6 = vpop.permute.xlu1 %2863  ;;  %v4713_v21 = vrot.slane %v4637_v32, 2  ;;  %v4640_v54 = vmax.f32 %v4638_v58, %v4639_v47 }
 0x2b5   : > { %v3216_v44 = vpop.permute.xlu0 %3215 }
 0x2b6   : > { %v3688_v38 = vsel %vm3386_vm5, %v3608_v22, %v3216_v44  ;;  %v4731_v37 = vsel %vm2513_vm2, %v4707_v46, %v4713_v21  ;;  %v4719_v53 = vrot.slane %v4640_v54, 2 }
 0x2b7   : > { %4143 = vmatprep.mubr.bf16.mxu1 %v3688_v38  ;;  %v4750_v59 = vmax.f32 %v4634_v51, %v4731_v37  ;;  %v4775_v51 = vrot.slane %v4749_v7, 4 }
 0x2b8   : > { %4144 = vmatmul.mubr.bf16.gmra.mrb[80].mxu1 %v3448_v14  ;;  %v9969_v9 = vpop.permute.xlu1 %2953  ;;  %v4725_v22 = vsel %vm2513_vm2, %v4713_v21, %v4719_v53  ;;  %v4743_v46 = vsel %vm2513_vm2, %v4719_v53, %v4701_v41 }
 0x2b9   : > { %v3218_v49 = vpop.permute.xlu0 %3217  ;;  %v4751_v24 = vmax.f32 %v4637_v32, %v4725_v22  ;;  %v4752_v38 = vmax.f32 %v4640_v54, %v4743_v46  ;;  %v4781_v55 = vrot.slane %v4750_v59, 4  ;;  %v9990_v58 = vpack.c.bf16 %v4750_v59, %v4749_v7 }
 0x2ba   : > { %v3691_v5 = vsel %vm3386_vm5, %v3610_v2, %v3218_v49  ;;  %v9971_v31 = vpop.f32.mrb[160].mxu0  ;;  %v4017_v18 = vpop.f32.mrb[16].mxu1 }
 0x2bb   : > { %4151 = vmatprep.mubr.bf16.mxu1 %v3691_v5  ;;  %v9979_v44 = vpop.f32.mrb[161].mxu0  ;;  %v9986_v52 = vadd.f32 %v9607_v29, %v4017_v18  ;;  %v4019_v14 = vpop.f32.mrb[17].mxu1  ;;  %11168 = vst [vmem:[#allocation33_spill] sm:$0xff] %v9990_v58  ;;  %v4787_v47 = vrot.slane %v4751_v24, 4  ;;  %v4811_v2 = vsel %vm2634_vm3, %v4775_v51, %v4781_v55  ;;  %v4793_v49 = vrot.slane %v4752_v38, 4 }
 0x2bc   : > { %v9981_v4 = vpop.f32.mrb[162].mxu0  ;;  %v4020_v41 = vpop.f32.mrb[18].mxu1  ;;  %v9996_v21 = vpack.c.bf16 %v4751_v24, %v4750_v59  ;;  %v9999_v5 = vpack.c.bf16 %v4749_v7, %v4752_v38  ;;  %v10013_v46 = vpack.c.bf16 %v4752_v38, %v4751_v24 }
 0x2bd   : > { %v3100_v20 = vpop.permute.xlu0 %3099  ;;  %v9988_v1 = vpop.f32.mrb[163].mxu0  ;;  %v4282_v29 = vadd.f32 %v9613_v60, %v4020_v41  ;;  %v4805_v37 = vsel %vm2634_vm3, %v4781_v55, %v4787_v47  ;;  %v4799_v53 = vsel %vm2634_vm3, %v4787_v47, %v4793_v49  ;;  %v4817_v10 = vsel %vm2634_vm3, %v4793_v49, %v4775_v51  ;;  %v11173_v55 = vld [vmem:[#allocation21_spill] sm:$0xff] }
 0x2be   : > { %v9992_v32 = vpop.permute.xlu1 %3043  ;;  %v4022_v54 = vpop.f32.mrb[19].mxu1  ;;  %11169 = vst [vmem:[#allocation28_spill] sm:$0xff] %v9999_v5  ;;  %v10007_v40 = vpack.c.bf16 %v4805_v37, %v4811_v2  ;;  %v10009_v22 = vpack.c.bf16 %v4817_v10, %v4799_v53  ;;  %11172 = vst [vmem:[#allocation37_spill] sm:$0xff] %v10013_v46  ;;  %v3545_v7 = vsel %vm984_vm0, %v9444_v35, %v3100_v20 }
 0x2bf   : > { %v3303_v51 = vsel %vm984_vm0, %v11173_v55, %v9877_v56 }
 0x2c0   : > { %4152 = vmatmul.mubr.bf16.gmra.mrb[84].mxu1 %v3451_v36  ;;  %11170 = vst [vmem:[#allocation34_spill] sm:$0xff] %v10007_v40  ;;  %11171 = vst [vmem:[#allocation27_spill] sm:$0xff] %v10009_v22  ;;  %4871 = vrot.lane.b32.xlu1 %v10007_v40, %s7171_s19  ;;  %v3371_v24 = vsel %vm3325_vm4, %v3303_v51, %v9894_v8  ;;  %v11175_v8 = vld [vmem:[#allocation40_spill] sm:$0xff] }
 0x2c1   : > { %v3102_v19 = vpop.permute.xlu0 %3101  ;;  %v3454_v35 = vsel %vm3386_vm5, %v3371_v24, %v9917_v48  ;;  %v3306_v54 = vsel %vm984_vm0, %v11175_v8, %v9909_v57  ;;  %v4488_v8 = vmul.f32 %v9871_v39, %v4282_v29 }
 0x2c2   : > { %v10011_v59 = vpop.permute.xlu1 %2865  ;;  %v3548_v47 = vsel %vm984_vm0, %v9459_v15, %v3102_v19 }
 0x2c4   : > { %4873 = vrot.lane.b32.xlu1 %v10009_v22, %s7171_s19  ;;  %v11185_v22 = vld [vmem:[#allocation19_spill] sm:$0xff] }
 0x2c5   : > { %v3160_v60 = vpop.permute.xlu0 %3159 }
 0x2c6   : > { %v10019_v18 = vpop.permute.xlu1 %2955  ;;  %v3612_v36 = vsel %vm3325_vm4, %v3545_v7, %v3160_v60  ;;  %v3373_v60 = vsel %vm3325_vm4, %v3306_v54, %v9927_v11 }
 0x2c7   : > { %v3457_v19 = vsel %vm3386_vm5, %v3373_v60, %v9944_v3  ;;  %v7063_v3 = vld [vmem:[%s10955_s7 + $0x58] sm:$0xff]  }
 0x2c8   : > { %6478 = vmatprep.subr.bf16.mxu1 %v7063_v3 }
 0x2c9   : > { %v3220_v14 = vpop.permute.xlu0 %3219 }
 0x2ca   : > { %v3694_v38 = vsel %vm3386_vm5, %v3612_v36, %v3220_v14  ;;  %v10032_v20 = vpop.permute.xlu1 %3045 }
 0x2cb   : > { %4159 = vmatprep.mubr.bf16.mxu1 %v3694_v38 }
 0x2cc   : > { %4160 = vmatmul.mubr.bf16.gmra.mrb[88].mxu1 %v3454_v35  ;;  %v4025_v2 = vpop.f32.mrb[20].mxu1  ;;  %v4487_v35 = vmul.f32 %v9871_v39, %v9986_v52  ;;  %v4542_v52 = vadd.f32 %v9891_v26, %v4488_v8 }
 0x2cd   : > { %v3162_v41 = vpop.permute.xlu0 %3161  ;;  %v10034_v56 = vpop.f32.mrb[164].mxu0  ;;  %v4287_v48 = vadd.f32 %v9602_v30, %v4025_v2 }
 0x2ce   : > { %11174 = vst [vmem:[#allocation32_spill] sm:$0xff] %v10034_v56  ;;  %v10038_v49 = vpop.permute.xlu1 %2867  ;;  %v3614_v37 = vsel %vm3325_vm4, %v3548_v47, %v3162_v41  ;;  %v4027_v10 = vpop.f32.mrb[21].mxu1  ;;  %v4541_v54 = vadd.f32 %v9891_v26, %v4487_v35 }
 0x2cf   : > { %v4028_v55 = vpop.f32.mrb[22].mxu1  ;;  %v10048_v15 = vpop.f32.mrb[165].mxu0  ;;  %v11183_v10 = vld [vmem:[#allocation26_spill] sm:$0xff] }
 0x2d0   : > { %11176 = vst [vmem:[#allocation42_spill] sm:$0xff] %v10048_v15  ;;  %v4290_v57 = vadd.f32 %v9611_v12, %v4028_v55  ;;  %v4030_v51 = vpop.f32.mrb[23].mxu1  ;;  %v10053_v36 = vpop.f32.mrb[166].mxu0  ;;  %v7064_v12 = vld [vmem:[%s10955_s7 + $0x18] sm:$0xff]   ;;  %v4589_v35 = vmax.f32 %v4541_v54, 0.0 }
 0x2d1   : > { %v3222_v53 = vpop.permute.xlu0 %3221  ;;  %11177 = vst [vmem:[#allocation31_spill] sm:$0xff] %v10053_v36  ;;  %v10055_v30 = vpop.f32.mrb[167].mxu0  ;;  %6479 = vmatpush3.bf16.msra.mxu1 %v7064_v12 }
 0x2d2   : > { %v3697_v7 = vsel %vm3386_vm5, %v3614_v37, %v3222_v53  ;;  %11178 = vst [vmem:[#allocation38_spill] sm:$0xff] %v10055_v30  ;;  %v10061_v24 = vpop.permute.xlu1 %2957 }
 0x2d3   : > { %4167 = vmatprep.mubr.bf16.mxu1 %v3697_v7 }
 0x2d4   : > { %4168 = vmatmul.mubr.bf16.gmra.mrb[92].mxu1 %v3457_v19 }
 0x2d5   : > { %v10057_v14 = vpop.permute.xlu0 %3167  ;;  %v10059_v11 = vpop.f32.mrb[168].mxu0 }
 0x2d6   : > { %11179 = vst [vmem:[#allocation46_spill] sm:$0xff] %v10059_v11  ;;  %v10063_v38 = vpop.f32.mrb[169].mxu0  ;;  %v10084_v55 = vpop.permute.xlu1 %2869 }
 0x2d7   : > { %11180 = vst [vmem:[#allocation36_spill] sm:$0xff] %v10063_v38  ;;  %v10075_v47 = vpop.f32.mrb[170].mxu0 }
 0x2d8   : > { %11181 = vst [vmem:[#allocation10_spill] sm:$0xff] %v10075_v47  ;;  %v10077_v2 = vpop.f32.mrb[171].mxu0 }
 0x2d9   : > { %v10073_v41 = vpop.permute.xlu0 %3227  ;;  %11182 = vst [vmem:[#allocation39_spill] sm:$0xff] %v10077_v2 }
 0x2db   : > { %v4033_v53 = vpop.f32.mrb[24].mxu1 }
 0x2dc   : > { %v4295_v60 = vadd.f32 %v11183_v10, %v4033_v53  ;;  %v4035_v7 = vpop.f32.mrb[25].mxu1  ;;  %v4489_v53 = vmul.f32 %v9871_v39, %v4287_v48 }
 0x2dd   : > { %v10081_v37 = vpop.permute.xlu0 %3169  ;;  %v4036_v19 = vpop.f32.mrb[26].mxu1 }
 0x2de   : > { %v10087_v51 = vpop.f32.mrb[172].mxu0  ;;  %v4491_v3 = vmul.f32 %v9871_v39, %v4295_v60  ;;  %v4298_v29 = vadd.f32 %v11185_v22, %v4036_v19  ;;  %v4038_v12 = vpop.f32.mrb[27].mxu1  ;;  %v4490_v60 = vmul.f32 %v9871_v39, %v4290_v57  ;;  %v4641_v19 = vsel %vm3325_vm4, %v4589_v35, -inf }
 0x2df   : > { %11184 = vst [vmem:[#allocation35_spill] sm:$0xff] %v10087_v51  ;;  %v10091_v40 = vpop.f32.mrb[173].mxu0  ;;  %v4590_v51 = vmax.f32 %v4542_v52, 0.0 }
 0x2e0   : > { %11186 = vst [vmem:[#allocation11_spill] sm:$0xff] %v10091_v40  ;;  %v10093_v11 = vpop.f32.mrb[174].mxu0  ;;  %v4545_v10 = vadd.f32 %v9891_v26, %v4491_v3  ;;  %v4492_v8 = vmul.f32 %v9871_v39, %v4298_v29  ;;  %v10107_v40 = vpop.permute.xlu1 %2959  ;;  %v11189_v29 = vld [vmem:[#allocation25_spill] sm:$0xff]  ;;  %v4544_v35 = vadd.f32 %v9891_v26, %v4490_v60 }
 0x2e1   : > { %v3104_v47 = vpop.permute.xlu0 %3103  ;;  %11187 = vst [vmem:[#allocation45_spill] sm:$0xff] %v10093_v11  ;;  %v10098_v7 = vpop.f32.mrb[175].mxu0  ;;  %v4543_v11 = vadd.f32 %v9891_v26, %v4489_v53  ;;  %v4644_v57 = vsel %vm3325_vm4, %v4590_v51, -inf }
 0x2e2   : > { %11188 = vst [vmem:[#allocation43_spill] sm:$0xff] %v10098_v7  ;;  %v4593_v2 = vmax.f32 %v4545_v10, 0.0  ;;  %v4546_v22 = vadd.f32 %v9891_v26, %v4492_v8 }
 0x2e4   : > { %v4041_v12 = vpop.f32.mrb[28].mxu1  ;;  %v4642_v48 = vsel %vm3325_vm4, %v4593_v2, -inf  ;;  %v4594_v3 = vmax.f32 %v4546_v22, 0.0  ;;  %v11190_v2 = vld [vmem:[#allocation47_spill] sm:$0xff] }
 0x2e5   : > { %v10103_v54 = vpop.permute.xlu0 %3105  ;;  %v4303_v7 = vadd.f32 %v11189_v29, %v4041_v12  ;;  %v4043_v52 = vpop.f32.mrb[29].mxu1  ;;  %v10111_v10 = vmax.f32 %v4641_v19, %v4642_v48  ;;  %v4591_v29 = vmax.f32 %v4543_v11, 0.0 }
 0x2e6   : > { %v6860_v8 = vpop.f32.mrb[176].mxu0  ;;  %v4044_v38 = vpop.f32.mrb[30].mxu1  ;;  %v4645_v36 = vsel %vm3325_vm4, %v4594_v3, -inf  ;;  %v4592_v3 = vmax.f32 %v4544_v35, 0.0 }
 0x2e7   : > { %v4493_v53 = vmul.f32 %v9871_v39, %v4303_v7  ;;  %v4438_v56 = vpop.f32.mrb[177].mxu0  ;;  %v4306_v22 = vadd.f32 %v11190_v2, %v4044_v38  ;;  %v4046_v30 = vpop.f32.mrb[31].mxu1  ;;  %v4646_v46 = vmax.f32 %v4644_v57, %v4645_v36  ;;  %v4702_v60 = vrot.slane %v10111_v10, 2  ;;  %v7065_v36 = vld [vmem:[%s10955_s7 + $0x60] sm:$0xff]  }
 0x2e8   : > { %v6861_v12 = vpop.f32.mrb[178].mxu0  ;;  %v7066_v30 = vld [vmem:[%s10955_s7 + $0x20] sm:$0xff]   ;;  %v4647_v57 = vsel %vm3325_vm4, %v4591_v29, -inf  ;;  %v10133_v2 = vpop.permute.xlu1 %3047  ;;  %6480 = vmatprep.subr.bf16.mxu1 %v7065_v36  ;;  %v7068_v29 = vld [vmem:[%s10955_s7 + $0x28] sm:$0xff]  }
 0x2e9   : > { %v10117_v15 = vpop.permute.xlu0 %3165  ;;  %v4547_v51 = vadd.f32 %v9891_v26, %v4493_v53  ;;  %v4494_v19 = vmul.f32 %v9871_v39, %v4306_v22  ;;  %v4440_v48 = vpop.f32.mrb[179].mxu0  ;;  %v4708_v52 = vrot.slane %v4646_v46, 2  ;;  %6481 = vmatpush3.bf16.msra.mxu1 %v7066_v30  ;;  %v11192_v30 = vld [vmem:[#allocation22_spill] sm:$0xff] }
 0x2eb   : > { %v4595_v8 = vmax.f32 %v4547_v51, 0.0  ;;  %v4548_v56 = vadd.f32 %v9891_v26, %v4494_v19  ;;  %v4738_v7 = vsel %vm2513_vm2, %v4702_v60, %v4708_v52  ;;  %v7067_v51 = vld [vmem:[%s10955_s7 + $0x68] sm:$0xff]  }
 0x2ec   : > { %v10142_v58 = vmax.f32 %v10111_v10, %v4738_v7  ;;  %6482 = vmatprep.subr.bf16.mxu1 %v7067_v51  ;;  %v7069_v10 = vld [vmem:[%s10955_s7 + $0x70] sm:$0xff]   ;;  %v3309_v7 = vsel %vm984_vm0, %v11192_v30, %v9960_v6 }
 0x2ed   : > { %v3164_v11 = vpop.permute.xlu0 %3163  ;;  %v4049_v38 = vpop.f32.mrb[32].mxu1  ;;  %v4648_v35 = vsel %vm3325_vm4, %v4595_v8, -inf  ;;  %v4596_v53 = vmax.f32 %v4548_v56, 0.0  ;;  %v3551_v8 = vsel %vm984_vm0, %v9494_v0, %v3104_v47  ;;  %6483 = vmatpush3.bf16.msra.mxu1 %v7068_v29 }
 0x2ee   : > { %v10136_v22 = vadd.f32 %v9684_v43, %v4049_v38  ;;  %v4051_v12 = vpop.f32.mrb[33].mxu1  ;;  %v4649_v19 = vmax.f32 %v4647_v57, %v4648_v35  ;;  %v6864_v48 = vpop.f32.mrb[180].mxu0  ;;  %v4650_v43 = vsel %vm3325_vm4, %v4592_v3, -inf  ;;  %v11191_v38 = vld [vmem:[#allocation9_spill] sm:$0xff]  ;;  %v3616_v0 = vsel %vm3325_vm4, %v3551_v8, %v3164_v11  ;;  %v7070_v11 = vld [vmem:[%s10955_s7 + $0x30] sm:$0xff]   ;;  %6484 = vmatprep.subr.bf16.mxu1 %v7069_v10  ;;  %v7071_v8 = vld [vmem:[%s10955_s7 + $0x78] sm:$0xff]  }
 0x2ef   : > { %v4052_v5 = vpop.f32.mrb[34].mxu1  ;;  %v4651_v56 = vsel %vm3325_vm4, %v4596_v53, -inf  ;;  %v4450_v36 = vpop.f32.mrb[181].mxu0 }
 0x2f0   : > { %v10152_v57 = vadd.f32 %v11191_v38, %v4052_v5  ;;  %v4054_v35 = vpop.f32.mrb[35].mxu1  ;;  %v4714_v3 = vrot.slane %v4649_v19, 2  ;;  %v4652_v12 = vmax.f32 %v4650_v43, %v4651_v56  ;;  %v6865_v53 = vpop.f32.mrb[182].mxu0  ;;  %v3375_v5 = vsel %vm3325_vm4, %v3309_v7, %v9969_v9 }
 0x2f1   : > { %v3224_v47 = vpop.permute.xlu0 %3223  ;;  %v4452_v48 = vpop.f32.mrb[183].mxu0  ;;  %v3460_v38 = vsel %vm3386_vm5, %v3375_v5, %v9992_v32  ;;  %v11193_v35 = vld [vmem:[#allocation41_spill] sm:$0xff]  ;;  %v11194_v53 = vld [vmem:[#allocation24_spill] sm:$0xff]  ;;  %6485 = vmatpush3.bf16.msra.mxu1 %v7070_v11 }
 0x2f2   : > { %v3700_v51 = vsel %vm3386_vm5, %v3616_v0, %v3224_v47  ;;  %v4720_v36 = vrot.slane %v4652_v12, 2  ;;  %v4732_v6 = vsel %vm2513_vm2, %v4708_v52, %v4714_v3  ;;  %v10171_v43 = vpop.permute.xlu1 %3049  ;;  %v3312_v30 = vsel %vm984_vm0, %v11193_v35, %v10011_v59  ;;  %6486 = vmatprep.subr.bf16.mxu1 %v7071_v8  ;;  %v7072_v35 = vld [vmem:[%s10955_s7 + $0x38] sm:$0xff]  }
 0x2f3   : > { %4175 = vmatprep.mubr.bf16.mxu1 %v3700_v51  ;;  %v4754_v9 = vmax.f32 %v4646_v46, %v4732_v6  ;;  %v3377_v8 = vsel %vm3325_vm4, %v3312_v30, %v10019_v18 }
 0x2f4   : > { %4176 = vmatmul.mubr.bf16.gmra.mrb[96].mxu1 %v3460_v38  ;;  %v4744_v32 = vsel %vm2513_vm2, %v4720_v36, %v4702_v60  ;;  %v4726_v52 = vsel %vm2513_vm2, %v4714_v3, %v4720_v36  ;;  %v4776_v60 = vrot.slane %v10142_v58, 4  ;;  %v3554_v3 = vsel %vm984_vm0, %v9496_v63, %v10103_v54 }
 0x2f5   : > { %v10178_v56 = vpop.permute.xlu0 %3229  ;;  %v4057_v29 = vpop.f32.mrb[36].mxu1  ;;  %v4756_v7 = vmax.f32 %v4652_v12, %v4744_v32  ;;  %v10186_v46 = vpack.c.bf16 %v4754_v9, %v10142_v58  ;;  %v4755_v47 = vmax.f32 %v4649_v19, %v4726_v52  ;;  %v4782_v48 = vrot.slane %v4754_v9, 4  ;;  %v11195_v12 = vld [vmem:[#allocation29_spill] sm:$0xff]  ;;  %6487 = vmatpush3.bf16.msra.mxu1 %v7072_v35 }
 0x2f6   : > { %v4059_v10 = vpop.f32.mrb[37].mxu1  ;;  %v6868_v0 = vpop.f32.mrb[184].mxu0  ;;  %v10189_v5 = vadd.f32 %v11194_v53, %v4057_v29  ;;  %v3618_v11 = vsel %vm3325_vm4, %v3554_v3, %v10117_v15  ;;  %v3463_v53 = vsel %vm3386_vm5, %v3377_v8, %v10032_v20 }
 0x2f7   : > { %v4060_v51 = vpop.f32.mrb[38].mxu1  ;;  %v4462_v59 = vpop.f32.mrb[185].mxu0  ;;  %4907 = vrot.lane.b32.xlu0 %v10186_v46, %s7171_s19  ;;  %v4794_v38 = vrot.slane %v4756_v7, 4  ;;  %v10201_v6 = vpack.c.bf16 %v10142_v58, %v4756_v7  ;;  %v10205_v29 = vpack.c.bf16 %v4756_v7, %v4755_v47  ;;  %v4788_v63 = vrot.slane %v4755_v47, 4 }
 0x2f8   : > { %v10198_v36 = vadd.f32 %v11195_v12, %v4060_v51  ;;  %v4062_v19 = vpop.f32.mrb[39].mxu1  ;;  %v6869_v52 = vpop.f32.mrb[186].mxu0  ;;  %v4812_v54 = vsel %vm2634_vm3, %v4776_v60, %v4782_v48  ;;  %v10219_v0 = vpack.c.bf16 %v4755_v47, %v4754_v9  ;;  %v11196_v59 = vld [vmem:[#allocation20_spill] sm:$0xff] }
 0x2f9   : > { %v3226_v32 = vpop.permute.xlu0 %3225  ;;  %v10214_v58 = vpop.permute.xlu1 %3051  ;;  %v4818_v7 = vsel %vm2634_vm3, %v4794_v38, %v4776_v60  ;;  %v4806_v51 = vsel %vm2634_vm3, %v4782_v48, %v4788_v63  ;;  %v4800_v18 = vsel %vm2634_vm3, %v4788_v63, %v4794_v38  ;;  %v3315_v12 = vsel %vm984_vm0, %v11196_v59, %v10038_v49 }
 0x2fa   : > { %v4464_v10 = vpop.f32.mrb[187].mxu0  ;;  %v3703_v15 = vsel %vm3386_vm5, %v3618_v11, %v3226_v32  ;;  %v10229_v30 = vpack.c.bf16 %v4806_v51, %v4812_v54  ;;  %v10231_v3 = vpack.c.bf16 %v4818_v7, %v4800_v18  ;;  %v4495_v19 = vmul.f32 %v9871_v39, %v10136_v22  ;;  %v11197_v7 = vld [vmem:[#allocation44_spill] sm:$0xff] }
 0x2fb   : > { %4181 = vmatprep.mubr.bf16.mxu1 %v3703_v15  ;;  %4909 = vrot.lane.b32.xlu0 %v10205_v29, %s7171_s19 }
 0x2fc   : > { %4182 = vmatmul.mubr.bf16.gmra.mrb[100].mxu1 %v3463_v53  ;;  %4875 = vrot.lane.b32.xlu1 %v10229_v30, %s7171_s19  ;;  %v4549_v49 = vadd.f32 %v9891_v26, %v4495_v19  ;;  %v4497_v53 = vmul.f32 %v9871_v39, %v10189_v5 }
 0x2fd   : > { %v3108_v9 = vpop.permute.xlu0 %3107  ;;  %v2872_v60 = vpop.permute.xlu1 %2871 }
 0x2fe   : > { %v3557_v47 = vsel %vm984_vm0, %v9528_v13, %v3108_v9  ;;  %v3379_v13 = vsel %vm3325_vm4, %v3315_v12, %v10061_v24  ;;  %v4551_v12 = vadd.f32 %v9891_v26, %v4497_v53 }
 0x2ff   : > { %v3620_v20 = vsel %vm3325_vm4, %v3557_v47, %v10057_v14  ;;  %v4496_v14 = vmul.f32 %v9871_v39, %v10152_v57 }
 0x300   : > { %v3706_v48 = vsel %vm3386_vm5, %v3620_v20, %v10073_v41  ;;  %4877 = vrot.lane.b32.xlu1 %v10231_v3, %s7171_s19  ;;  %v3466_v41 = vsel %vm3386_vm5, %v3379_v13, %v10133_v2  ;;  %v4498_v20 = vmul.f32 %v9871_v39, %v10198_v36 }
 0x301   : > { %4187 = vmatprep.mubr.bf16.mxu1 %v3706_v48  ;;  %v3112_v38 = vpop.permute.xlu0 %3111  ;;  %v2962_v22 = vpop.permute.xlu1 %2961  ;;  %v4550_v54 = vadd.f32 %v9891_v26, %v4496_v14 }
 0x302   : > { %v3563_v5 = vsel %vm984_vm0, %v11152_v34, %v3112_v38 }
 0x303   : > { %v4598_v9 = vmax.f32 %v4550_v54, 0.0 }
 0x304   : > { %4188 = vmatmul.mubr.bf16.gmra.mrb[104].mxu1 %v3466_v41 }
 0x305   : > { %v3110_v11 = vpop.permute.xlu0 %3109  ;;  %v4065_v32 = vpop.f32.mrb[40].mxu1  ;;  %v4656_v14 = vsel %vm3325_vm4, %v4598_v9, -inf }
 0x306   : > { %v3560_v52 = vsel %vm984_vm0, %v9530_v23, %v3110_v11  ;;  %v4327_v24 = vadd.f32 %v9728_v16, %v4065_v32  ;;  %v4067_v63 = vpop.f32.mrb[41].mxu1  ;;  %v3318_v23 = vsel %vm984_vm0, %v11197_v7, %v10084_v55  ;;  %v4597_v16 = vmax.f32 %v4549_v49, 0.0  ;;  %v2874_v47 = vpop.permute.xlu1 %2873 }
 0x307   : > { %v3622_v57 = vsel %vm3325_vm4, %v3560_v52, %v10081_v37  ;;  %v4068_v35 = vpop.f32.mrb[42].mxu1  ;;  %v3381_v37 = vsel %vm3325_vm4, %v3318_v23, %v10107_v40  ;;  %v4552_v32 = vadd.f32 %v9891_v26, %v4498_v20  ;;  %v11198_v63 = vld [vmem:[#allocation30_spill] sm:$0xff] }
 0x308   : > { %v3709_v2 = vsel %vm3386_vm5, %v3622_v57, %v10178_v56  ;;  %v4499_v8 = vmul.f32 %v9871_v39, %v4327_v24  ;;  %v4330_v10 = vadd.f32 %v9736_v17, %v4068_v35  ;;  %v4070_v15 = vpop.f32.mrb[43].mxu1  ;;  %v3321_v17 = vsel %vm984_vm0, %v9488_v42, %v2872_v60 }
 0x309   : > { %4193 = vmatprep.mubr.bf16.mxu1 %v3709_v2  ;;  %v3172_v51 = vpop.permute.xlu0 %3171  ;;  %v3469_v55 = vsel %vm3386_vm5, %v3381_v37, %v10171_v43  ;;  %v4653_v59 = vsel %vm3325_vm4, %v4597_v16, -inf  ;;  %v3383_v41 = vsel %vm3325_vm4, %v3321_v17, %v2962_v22  ;;  %v4600_v16 = vmax.f32 %v4552_v32, 0.0 }
 0x30a   : > { %v4553_v56 = vadd.f32 %v9891_v26, %v4499_v8  ;;  %v4500_v18 = vmul.f32 %v9871_v39, %v4330_v10  ;;  %v3624_v42 = vsel %vm3325_vm4, %v3563_v5, %v3172_v51  ;;  %v2964_v8 = vpop.permute.xlu1 %2963  ;;  %v3472_v7 = vsel %vm3386_vm5, %v3383_v41, %v10214_v58 }
 0x30b   : > { %v3324_v37 = vsel %vm984_vm0, %v9471_v27, %v2874_v47  ;;  %v4662_v20 = vsel %vm3325_vm4, %v4600_v16, -inf }
 0x30c   : > { %4194 = vmatmul.mubr.bf16.gmra.mrb[108].mxu1 %v3469_v55  ;;  %v4601_v40 = vmax.f32 %v4553_v56, 0.0  ;;  %v4554_v48 = vadd.f32 %v9891_v26, %v4500_v18 }
 0x30d   : > { %v3232_v60 = vpop.permute.xlu0 %3231  ;;  %v4073_v19 = vpop.f32.mrb[44].mxu1 }
 0x30e   : > { %v3712_v43 = vsel %vm3386_vm5, %v3624_v42, %v3232_v60  ;;  %v4654_v13 = vsel %vm3325_vm4, %v4601_v40, -inf  ;;  %v4602_v34 = vmax.f32 %v4554_v48, 0.0  ;;  %v4335_v38 = vadd.f32 %v9724_v45, %v4073_v19  ;;  %v4075_v36 = vpop.f32.mrb[45].mxu1  ;;  %v3054_v48 = vpop.permute.xlu1 %3053 }
 0x30f   : > { %4199 = vmatprep.mubr.bf16.mxu1 %v3712_v43  ;;  %v4655_v49 = vmax.f32 %v4653_v59, %v4654_v13  ;;  %v4076_v11 = vpop.f32.mrb[46].mxu1  ;;  %v4599_v45 = vmax.f32 %v4551_v12, 0.0  ;;  %v3385_v40 = vsel %vm3325_vm4, %v3324_v37, %v2964_v8 }
 0x310   : > { %v4657_v52 = vsel %vm3325_vm4, %v4602_v34, -inf  ;;  %v4501_v24 = vmul.f32 %v9871_v39, %v4335_v38  ;;  %v4338_v54 = vadd.f32 %v11198_v63, %v4076_v11  ;;  %v4078_v57 = vpop.f32.mrb[47].mxu1  ;;  %v3475_v43 = vsel %vm3386_vm5, %v3385_v40, %v3054_v48  ;;  %v7073_v48 = vld [vmem:[%s10955_s7 + $0xc0] sm:$0xff]  }
 0x311   : > { %v3114_v35 = vpop.permute.xlu0 %3113  ;;  %v4658_v2 = vmax.f32 %v4656_v14, %v4657_v52  ;;  %v4703_v15 = vrot.slane %v4655_v49, 2  ;;  %v4659_v17 = vsel %vm3325_vm4, %v4599_v45, -inf  ;;  %6560 = vmatprep.subr.bf16.mxu0 %v7073_v48 }
 0x312   : > { %v4555_v10 = vadd.f32 %v9891_v26, %v4501_v24  ;;  %v4502_v22 = vmul.f32 %v9871_v39, %v4338_v54  ;;  %v3566_v59 = vsel %vm984_vm0, %v11160_v62, %v3114_v35  ;;  %v11200_v35 = vld [vmem:[#allocation16_spill] sm:$0xff] }
 0x313   : > { %v4709_v23 = vrot.slane %v4658_v2, 2 }
 0x314   : > { %4200 = vmatmul.mubr.bf16.gmra.mrb[112].mxu1 %v3472_v7  ;;  %v4603_v53 = vmax.f32 %v4555_v10, 0.0  ;;  %v4556_v51 = vadd.f32 %v9891_v26, %v4502_v22 }
 0x315   : > { %v3174_v56 = vpop.permute.xlu0 %3173  ;;  %v4739_v18 = vsel %vm2513_vm2, %v4703_v15, %v4709_v23 }
 0x316   : > { %v4660_v9 = vsel %vm3325_vm4, %v4603_v53, -inf  ;;  %v4604_v55 = vmax.f32 %v4556_v51, 0.0  ;;  %v4757_v5 = vmax.f32 %v4655_v49, %v4739_v18  ;;  %v3626_v47 = vsel %vm3325_vm4, %v3566_v59, %v3174_v56  ;;  %v11199_v49 = vld [vmem:[#allocation15_spill] sm:$0xff]  ;;  %v7074_v59 = vld [vmem:[%s10955_s7 + $0x80] sm:$0xff]  }
 0x317   : > { %v4661_v58 = vmax.f32 %v4659_v17, %v4660_v9  ;;  %v11201_v17 = vld [vmem:[#allocation12_spill] sm:$0xff]  ;;  %6561 = vmatpush3.bf16.msra.mxu0 %v7074_v59 }
 0x318   : > { %v4663_v27 = vsel %vm3325_vm4, %v4604_v55, -inf  ;;  %v4777_v54 = vrot.slane %v4757_v5, 4 }
 0x319   : > { %v3234_v12 = vpop.permute.xlu0 %3233  ;;  %v4715_v42 = vrot.slane %v4661_v58, 2  ;;  %v4664_v60 = vmax.f32 %v4662_v20, %v4663_v27 }
 0x31a   : > { %v3715_v19 = vsel %vm3386_vm5, %v3626_v47, %v3234_v12 }
 0x31b   : > { %4205 = vmatprep.mubr.bf16.mxu1 %v3715_v19  ;;  %v4721_v13 = vrot.slane %v4664_v60, 2  ;;  %v4733_v34 = vsel %vm2513_vm2, %v4709_v23, %v4715_v42 }
 0x31c   : > { %4206 = vmatmul.mubr.bf16.gmra.mrb[116].mxu1 %v3475_v43  ;;  %v4758_v38 = vmax.f32 %v4658_v2, %v4733_v34 }
 0x31d   : > { %v4745_v62 = vsel %vm2513_vm2, %v4721_v13, %v4703_v15  ;;  %v4081_v36 = vpop.f32.mrb[48].mxu1  ;;  %v4727_v14 = vsel %vm2513_vm2, %v4715_v42, %v4721_v13 }
 0x31e   : > { %v4760_v41 = vmax.f32 %v4664_v60, %v4745_v62  ;;  %v4343_v11 = vadd.f32 %v11199_v49, %v4081_v36  ;;  %v4083_v32 = vpop.f32.mrb[49].mxu1  ;;  %v10321_v52 = vpack.c.bf16 %v4758_v38, %v4757_v5  ;;  %v4759_v24 = vmax.f32 %v4661_v58, %v4727_v14  ;;  %v11202_v58 = vld [vmem:[#allocation23_spill] sm:$0xff]  ;;  %v7075_v49 = vld [vmem:[%s10955_s7 + $0xc8] sm:$0xff]  }
 0x31f   : > { %v4084_v63 = vpop.f32.mrb[50].mxu1  ;;  %v4783_v57 = vrot.slane %v4758_v38, 4  ;;  %6562 = vmatprep.subr.bf16.mxu0 %v7075_v49 }
 0x320   : > { %v4346_v45 = vadd.f32 %v11200_v35, %v4084_v63  ;;  %v4086_v2 = vpop.f32.mrb[51].mxu1  ;;  %4911 = vrot.lane.b32.xlu0 %v10321_v52, %s7171_s19  ;;  %v10326_v8 = vpack.c.bf16 %v4760_v41, %v4759_v24  ;;  %v4789_v10 = vrot.slane %v4759_v24, 4  ;;  %v4795_v15 = vrot.slane %v4760_v41, 4 }
 0x321   : > { %v4813_v22 = vsel %vm2634_vm3, %v4777_v54, %v4783_v57  ;;  %v10330_v7 = vpack.c.bf16 %v4759_v24, %v4758_v38  ;;  %v10332_v23 = vpack.c.bf16 %v4757_v5, %v4760_v41  ;;  %v4503_v27 = vmul.f32 %v9871_v39, %v4343_v11 }
 0x322   : > { %v4807_v16 = vsel %vm2634_vm3, %v4783_v57, %v4789_v10  ;;  %v4801_v51 = vsel %vm2634_vm3, %v4789_v10, %v4795_v15  ;;  %v4819_v37 = vsel %vm2634_vm3, %v4795_v15, %v4777_v54  ;;  %v4504_v47 = vmul.f32 %v9871_v39, %v4346_v45 }
 0x323   : > { %v10336_v53 = vpack.c.bf16 %v4807_v16, %v4813_v22  ;;  %v10344_v56 = vpack.c.bf16 %v4819_v37, %v4801_v51  ;;  %v4557_v42 = vadd.f32 %v9891_v26, %v4503_v27 }
 0x324   : > { %4913 = vrot.lane.b32.xlu0 %v10326_v8, %s7171_s19  ;;  %v4558_v13 = vadd.f32 %v9891_v26, %v4504_v47 }
 0x325   : > { %v4089_v18 = vpop.f32.mrb[52].mxu1  ;;  %4879 = vrot.lane.b32.xlu1 %v10336_v53, %s7171_s19  ;;  %v4605_v36 = vmax.f32 %v4557_v42, 0.0 }
 0x326   : > { %v4351_v9 = vadd.f32 %v11201_v17, %v4089_v18  ;;  %v4091_v55 = vpop.f32.mrb[53].mxu1  ;;  %v4606_v11 = vmax.f32 %v4558_v13, 0.0 }
 0x327   : > { %v4092_v5 = vpop.f32.mrb[54].mxu1  ;;  %v4665_v63 = vsel %vm3325_vm4, %v4605_v36, -inf }
 0x328   : > { %v4354_v20 = vadd.f32 %v11202_v58, %v4092_v5  ;;  %v4094_v40 = vpop.f32.mrb[55].mxu1  ;;  %v4505_v32 = vmul.f32 %v9871_v39, %v4351_v9  ;;  %v4668_v10 = vsel %vm3325_vm4, %v4606_v11, -inf }
 0x329   : > { %4881 = vrot.lane.b32.xlu1 %v10344_v56, %s7171_s19 }
 0x32a   : > { %v4506_v54 = vmul.f32 %v9871_v39, %v4354_v20  ;;  %v4559_v22 = vadd.f32 %v9891_v26, %v4505_v32 }
 0x32c   : > { %v4560_v17 = vadd.f32 %v9891_v26, %v4506_v54  ;;  %v4607_v40 = vmax.f32 %v4559_v22, 0.0 }
 0x32e   : > { %v4608_v27 = vmax.f32 %v4560_v17, 0.0 }
 0x330   : > { %v4674_v13 = vsel %vm3325_vm4, %v4608_v27, -inf }
 0x339   : > { %v4097_v12 = vpop.f32.mrb[56].mxu1 }
 0x33a   : > { %v4359_v60 = vadd.f32 %v9873_v28, %v4097_v12  ;;  %v4099_v19 = vpop.f32.mrb[57].mxu1  ;;  %v7076_v28 = vld [vmem:[%s10955_s7 + $0x88] sm:$0xff]  }
 0x33b   : > { %v4100_v43 = vpop.f32.mrb[58].mxu1  ;;  %6563 = vmatpush3.bf16.msra.mxu0 %v7076_v28 }
 0x33c   : > { %v4507_v34 = vmul.f32 %v9871_v39, %v4359_v60  ;;  %v4362_v38 = vadd.f32 %v9882_v33, %v4100_v43  ;;  %v4102_v62 = vpop.f32.mrb[59].mxu1  ;;  %v4671_v60 = vsel %vm3325_vm4, %v4607_v40, -inf  ;;  %v7080_v40 = vld [vmem:[%s10955_s7 + $0x98] sm:$0xff]  }
 0x33d   : > { %v7078_v62 = vld [vmem:[%s10955_s7 + $0x90] sm:$0xff]  }
 0x33e   : > { %v4561_v14 = vadd.f32 %v9891_v26, %v4507_v34  ;;  %v4508_v41 = vmul.f32 %v9871_v39, %v4362_v38  ;;  %v10386_v39 = vld [vmem:[%s10953_s5] ss:$0 sm:$0xff]  ;;  %v7077_v38 = vld [vmem:[%s10955_s7 + $0xd0] sm:$0xff]  }
 0x33f   : > { %6564 = vmatprep.subr.bf16.mxu0 %v7077_v38  ;;  %v7082_v38 = vld [vmem:[%s10955_s7 + $0xe0] sm:$0xff]  }
 0x340   : > { %v4609_v24 = vmax.f32 %v4561_v14, 0.0  ;;  %v4562_v33 = vadd.f32 %v9891_v26, %v4508_v41  ;;  %6565 = vmatpush3.bf16.msra.mxu0 %v7078_v62 }
 0x342   : > { %v4666_v57 = vsel %vm3325_vm4, %v4609_v24, -inf  ;;  %v4610_v35 = vmax.f32 %v4562_v33, 0.0 }
 0x343   : > { %v4667_v45 = vmax.f32 %v4665_v63, %v4666_v57 }
 0x344   : > { %v4669_v15 = vsel %vm3325_vm4, %v4610_v35, -inf }
 0x345   : > { %v4670_v37 = vmax.f32 %v4668_v10, %v4669_v15  ;;  %v4704_v58 = vrot.slane %v4667_v45, 2 }
 0x347   : > { %v4105_v2 = vpop.f32.mrb[60].mxu1  ;;  %v4710_v20 = vrot.slane %v4670_v37, 2 }
 0x348   : > { %v4367_v16 = vadd.f32 %v9860_v61, %v4105_v2  ;;  %v4107_v51 = vpop.f32.mrb[61].mxu1 }
 0x349   : > { %v4108_v18 = vpop.f32.mrb[62].mxu1  ;;  %v4740_v59 = vsel %vm2513_vm2, %v4704_v58, %v4710_v20 }
 0x34a   : > { %v4509_v9 = vmul.f32 %v10386_v39, %v4367_v16  ;;  %v4370_v55 = vadd.f32 %v9879_v50, %v4108_v18  ;;  %v4110_v5 = vpop.f32.mrb[63].mxu1  ;;  %v4761_v42 = vmax.f32 %v4667_v45, %v4740_v59 }
 0x34c   : > { %v4563_v61 = vadd.f32 %v9891_v26, %v4509_v9  ;;  %v4510_v48 = vmul.f32 %v10386_v39, %v4370_v55  ;;  %v4778_v32 = vrot.slane %v4761_v42, 4 }
 0x34e   : > { %v4611_v47 = vmax.f32 %v4563_v61, 0.0  ;;  %v4564_v12 = vadd.f32 %v9891_v26, %v4510_v48 }
 0x350   : > { %v4672_v50 = vsel %vm3325_vm4, %v4611_v47, -inf  ;;  %v4612_v19 = vmax.f32 %v4564_v12, 0.0  ;;  %v4872_v12 = vpop.permute.xlu1 %4871 }
 0x351   : > { %v4673_v43 = vmax.f32 %v4671_v60, %v4672_v50  ;;  %v7081_v60 = vld [vmem:[%s10955_s7 + $0x100] sm:$0xff]  }
 0x352   : > { %v4675_v34 = vsel %vm3325_vm4, %v4612_v19, -inf  ;;  %v11203_v19 = vld [vmem:[#allocation33_spill] sm:$0xff]  ;;  %6870 = vmatprep.subr.bf16.mxu1 %v7081_v60 }
 0x353   : > { %v4716_v26 = vrot.slane %v4673_v43, 2  ;;  %v4676_v36 = vmax.f32 %v4674_v13, %v4675_v34  ;;  %v11204_v13 = vld [vmem:[#allocation28_spill] sm:$0xff] }
 0x354   : > { %v4874_v62 = vpop.permute.xlu1 %4873 }
 0x355   : > { %v4722_v14 = vrot.slane %v4676_v36, 2  ;;  %v4734_v41 = vsel %vm2513_vm2, %v4710_v20, %v4716_v26 }
 0x356   : > { %v4762_v49 = vmax.f32 %v4670_v37, %v4734_v41  ;;  %v10475_v41 = vld [vmem:[%s10954_s6] ss:$0 sm:$0xff] }
 0x357   : > { %v4746_v28 = vsel %vm2513_vm2, %v4722_v14, %v4704_v58  ;;  %v4728_v11 = vsel %vm2513_vm2, %v4716_v26, %v4722_v14  ;;  %v7084_v14 = vld [vmem:[%s10955_s7 + $0xe8] sm:$0xff]  }
 0x358   : > { %v4764_v24 = vmax.f32 %v4676_v36, %v4746_v28  ;;  %v10411_v33 = vpack.c.bf16 %v4762_v49, %v4761_v42  ;;  %v4763_v63 = vmax.f32 %v4673_v43, %v4728_v11  ;;  %v4784_v54 = vrot.slane %v4762_v49, 4  ;;  %v7083_v36 = vld [vmem:[%s10955_s7 + $0xa0] sm:$0xff]   ;;  %v7085_v11 = vld [vmem:[%s10955_s7 + $0xa8] sm:$0xff]  }
 0x359   : > { %v10456_v43 = vsel %vm3325_vm4, %v11203_v19, %v4872_v12 }
 0x35a   : > { %4915 = vrot.lane.b32.xlu0 %v10411_v33, %s7171_s19  ;;  %v10415_v57 = vpack.c.bf16 %v4764_v24, %v4763_v63  ;;  %v4790_v35 = vrot.slane %v4763_v63, 4  ;;  %v4814_v45 = vsel %vm2634_vm3, %v4778_v32, %v4784_v54  ;;  %v4796_v2 = vrot.slane %v4764_v24, 4 }
 0x35b   : > { %v4113_v10 = vpop.f32.mrb[64].mxu1  ;;  %v10419_v22 = vpack.c.bf16 %v4763_v63, %v4762_v49  ;;  %v10421_v15 = vpack.c.bf16 %v4761_v42, %v4764_v24 }
 0x35c   : > { %v4375_v16 = vadd.f32 %v9979_v44, %v4113_v10  ;;  %v4115_v51 = vpop.f32.mrb[65].mxu1  ;;  %v4808_v37 = vsel %vm2634_vm3, %v4784_v54, %v4790_v35  ;;  %v4802_v18 = vsel %vm2634_vm3, %v4790_v35, %v4796_v2  ;;  %v4820_v17 = vsel %vm2634_vm3, %v4796_v2, %v4778_v32  ;;  %v7079_v44 = vld [vmem:[%s10955_s7 + $0xd8] sm:$0xff]   ;;  %v11205_v32 = vld [vmem:[#allocation42_spill] sm:$0xff]  ;;  %v11206_v54 = vld [vmem:[#allocation37_spill] sm:$0xff] }
 0x35d   : > { %v4116_v9 = vpop.f32.mrb[66].mxu1  ;;  %v10430_v55 = vpack.c.bf16 %v4808_v37, %v4814_v45  ;;  %v10432_v5 = vpack.c.bf16 %v4820_v17, %v4802_v18  ;;  %6566 = vmatprep.subr.bf16.mxu0 %v7079_v44  ;;  %v10484_v35 = vsel %vm3325_vm4, %v11206_v54, %v4874_v62 }
 0x35e   : > { %v4378_v58 = vadd.f32 %v9988_v1, %v4116_v9  ;;  %v4118_v20 = vpop.f32.mrb[67].mxu1  ;;  %4917 = vrot.lane.b32.xlu0 %v10415_v57, %s7171_s19  ;;  %6567 = vmatpush3.bf16.msra.mxu0 %v7080_v40 }
 0x35f   : > { %4883 = vrot.lane.b32.xlu1 %v10430_v55, %s7171_s19  ;;  %6568 = vmatprep.subr.bf16.mxu0 %v7082_v38 }
 0x360   : > { %v4512_v26 = vmul.f32 %v10386_v39, %v4378_v58 }
 0x362   : > { %6569 = vmatpush3.bf16.msra.mxu0 %v7083_v36  ;;  %v4566_v45 = vadd.f32 %v10475_v41, %v4512_v26  ;;  %v11209_v26 = vld [vmem:[#allocation31_spill] sm:$0xff] }
 0x363   : > { %v4121_v61 = vpop.f32.mrb[68].mxu1  ;;  %4885 = vrot.lane.b32.xlu1 %v10432_v5, %s7171_s19  ;;  %6570 = vmatprep.subr.bf16.mxu0 %v7084_v14 }
 0x364   : > { %v4383_v1 = vadd.f32 %v9971_v31, %v4121_v61  ;;  %v4123_v48 = vpop.f32.mrb[69].mxu1  ;;  %v4614_v20 = vmax.f32 %v4566_v45, 0.0 }
 0x365   : > { %v4124_v59 = vpop.f32.mrb[70].mxu1 }
 0x366   : > { %v4386_v27 = vadd.f32 %v9981_v4, %v4124_v59  ;;  %v4126_v47 = vpop.f32.mrb[71].mxu1  ;;  %v4511_v4 = vmul.f32 %v10386_v39, %v4375_v16  ;;  %v11207_v16 = vld [vmem:[#allocation38_spill] sm:$0xff]  ;;  %6571 = vmatpush3.bf16.msra.mxu0 %v7085_v11  ;;  %v4513_v17 = vmul.f32 %v10386_v39, %v4383_v1 }
 0x368   : > { %v4565_v49 = vadd.f32 %v10475_v41, %v4511_v4  ;;  %v4514_v44 = vmul.f32 %v10386_v39, %v4386_v27  ;;  %v4567_v47 = vadd.f32 %v10475_v41, %v4513_v17 }
 0x369   : > { %v4908_v42 = vpop.permute.xlu0 %4907 }
 0x36a   : > { %v5017_v50 = vsel %vm3325_vm4, %v9996_v21, %v4908_v42  ;;  %v4613_v18 = vmax.f32 %v4565_v49, 0.0  ;;  %v4568_v27 = vadd.f32 %v10475_v41, %v4514_v44 }
 0x36b   : > { %5455 = vmatprep.mubr.bf16.mxu1 %v5017_v50 }
 0x36c   : > { %5456 = vmatmul.mubr.bf16.vlgmr.msra.gmra.mrb[120].mxu1 %v10456_v43  ;;  %v4677_v48 = vsel %vm3325_vm4, %v4613_v18, -inf  ;;  %v4616_v45 = vmax.f32 %v4568_v27, 0.0  ;;  %v11210_v27 = vld [vmem:[#allocation36_spill] sm:$0xff] }
 0x36d   : > { %v4910_v31 = vpop.permute.xlu0 %4909  ;;  %6871 = vmatpush3.bf16.msra.mxu1 %v7081_v60  ;;  %v11208_v60 = vld [vmem:[#allocation32_spill] sm:$0xff] }
 0x36e   : > { %v5021_v34 = vsel %vm3325_vm4, %v11204_v13, %v4910_v31  ;;  %v4680_v31 = vsel %vm3325_vm4, %v4614_v20, -inf  ;;  %v4686_v44 = vsel %vm3325_vm4, %v4616_v45, -inf }
 0x36f   : > { %5463 = vmatprep.mubr.bf16.mxu1 %v5021_v34 }
 0x373   : > { %v4129_v28 = vpop.f32.mrb[72].mxu1 }
 0x374   : > { %v4391_v24 = vadd.f32 %v11205_v32, %v4129_v28  ;;  %v4131_v63 = vpop.f32.mrb[73].mxu1  ;;  %5464 = vmatmul.mubr.bf16.gmra.mrb[124].mxu1 %v10484_v35  ;;  %v4615_v28 = vmax.f32 %v4567_v47, 0.0 }
 0x375   : > { %v4132_v2 = vpop.f32.mrb[74].mxu1 }
 0x376   : > { %v4515_v10 = vmul.f32 %v10386_v39, %v4391_v24  ;;  %v4394_v51 = vadd.f32 %v11207_v16, %v4132_v2  ;;  %v4134_v37 = vpop.f32.mrb[75].mxu1  ;;  %v7086_v16 = vld [vmem:[%s10955_s7 + $0xf0] sm:$0xff]   ;;  %v4683_v18 = vsel %vm3325_vm4, %v4615_v28, -inf  ;;  %v4876_v28 = vpop.permute.xlu1 %4875 }
 0x377   : > { %v7087_v37 = vld [vmem:[%s10955_s7 + $0xb0] sm:$0xff]   ;;  %6572 = vmatprep.subr.bf16.mxu0 %v7086_v16 }
 0x378   : > { %v4569_v9 = vadd.f32 %v10475_v41, %v4515_v10  ;;  %v4516_v58 = vmul.f32 %v10386_v39, %v4394_v51  ;;  %6573 = vmatpush3.bf16.msra.mxu0 %v7087_v37 }
 0x37a   : > { %v4617_v40 = vmax.f32 %v4569_v9, 0.0  ;;  %v4570_v61 = vadd.f32 %v10475_v41, %v4516_v58 }
 0x37b   : > { %v4137_v59 = vpop.f32.mrb[76].mxu1 }
 0x37c   : > { %v4678_v12 = vsel %vm3325_vm4, %v4617_v40, -inf  ;;  %v4618_v42 = vmax.f32 %v4570_v61, 0.0  ;;  %v4399_v1 = vadd.f32 %v11208_v60, %v4137_v59  ;;  %v4139_v50 = vpop.f32.mrb[77].mxu1  ;;  %v7088_v61 = vld [vmem:[%s10955_s7 + $0xf8] sm:$0xff]  }
 0x37d   : > { %v4679_v4 = vmax.f32 %v4677_v48, %v4678_v12  ;;  %v4140_v34 = vpop.f32.mrb[78].mxu1  ;;  %v7089_v48 = vld [vmem:[%s10955_s7 + $0x108] sm:$0xff]   ;;  %v7090_v59 = vld [vmem:[%s10955_s7 + $0xb8] sm:$0xff]   ;;  %6574 = vmatprep.subr.bf16.mxu0 %v7088_v61 }
 0x37e   : > { %v4681_v38 = vsel %vm3325_vm4, %v4618_v42, -inf  ;;  %v4517_v62 = vmul.f32 %v10386_v39, %v4399_v1  ;;  %v4402_v36 = vadd.f32 %v11209_v26, %v4140_v34  ;;  %v4142_v14 = vpop.f32.mrb[79].mxu1  ;;  %6872 = vmatprep.subr.bf16.mxu1 %v7089_v48  ;;  %6575 = vmatpush3.bf16.msra.mxu0 %v7090_v59 }
 0x37f   : > { %v4682_v49 = vmax.f32 %v4680_v31, %v4681_v38  ;;  %v4705_v24 = vrot.slane %v4679_v4, 2  ;;  %6873 = vmatpush3.bf16.msra.mxu1 %v7089_v48  ;;  %v7091_v14 = vld [vmem:[%s10955_s7 + $0x110] sm:$0xff]  }
 0x380   : > { %v4571_v11 = vadd.f32 %v10475_v41, %v4517_v62  ;;  %v4518_v32 = vmul.f32 %v10386_v39, %v4402_v36  ;;  %6874 = vmatprep.subr.bf16.mxu1 %v7091_v14 }
 0x381   : > { %v4711_v63 = vrot.slane %v4682_v49, 2 }
 0x382   : > { %v4619_v2 = vmax.f32 %v4571_v11, 0.0  ;;  %v4572_v10 = vadd.f32 %v10475_v41, %v4518_v32 }
 0x383   : > { %v4741_v51 = vsel %vm2513_vm2, %v4705_v24, %v4711_v63  ;;  %6875 = vmatpush3.bf16.msra.mxu1 %v7091_v14 }
 0x384   : > { %v4684_v17 = vsel %vm3325_vm4, %v4619_v2, -inf  ;;  %v4620_v9 = vmax.f32 %v4572_v10, 0.0  ;;  %v4765_v58 = vmax.f32 %v4679_v4, %v4741_v51 }
 0x385   : > { %v4685_v20 = vmax.f32 %v4683_v18, %v4684_v17 }
 0x386   : > { %v4687_v40 = vsel %vm3325_vm4, %v4620_v9, -inf  ;;  %v4779_v11 = vrot.slane %v4765_v58, 4 }
 0x387   : > { %v4717_v47 = vrot.slane %v4685_v20, 2  ;;  %v4688_v12 = vmax.f32 %v4686_v44, %v4687_v40 }
 0x389   : > { %v4723_v42 = vrot.slane %v4688_v12, 2  ;;  %v4735_v60 = vsel %vm2513_vm2, %v4711_v63, %v4717_v47 }
 0x38a   : > { %v4766_v1 = vmax.f32 %v4682_v49, %v4735_v60  ;;  %v10568_v60 = vsel %vm3325_vm4, %v10186_v46, %v4876_v28 }
 0x38b   : > { %v4747_v50 = vsel %vm2513_vm2, %v4723_v42, %v4705_v24  ;;  %v4145_v31 = vpop.f32.mrb[80].mxu1  ;;  %v4729_v4 = vsel %vm2513_vm2, %v4717_v47, %v4723_v42  ;;  %v11211_v24 = vld [vmem:[#allocation39_spill] sm:$0xff]  ;;  %v11212_v47 = vld [vmem:[#allocation46_spill] sm:$0xff] }
 0x38c   : > { %v4768_v34 = vmax.f32 %v4688_v12, %v4747_v50  ;;  %v4407_v38 = vadd.f32 %v11210_v27, %v4145_v31  ;;  %v4147_v62 = vpop.f32.mrb[81].mxu1  ;;  %v10535_v26 = vpack.c.bf16 %v4766_v1, %v4765_v58  ;;  %v4767_v36 = vmax.f32 %v4685_v20, %v4729_v4  ;;  %v11213_v50 = vld [vmem:[#allocation10_spill] sm:$0xff] }
 0x38d   : > { %v4148_v49 = vpop.f32.mrb[82].mxu1  ;;  %v4785_v32 = vrot.slane %v4766_v1, 4 }
 0x38e   : > { %v4410_v63 = vadd.f32 %v11211_v24, %v4148_v49  ;;  %v4150_v45 = vpop.f32.mrb[83].mxu1  ;;  %4919 = vrot.lane.b32.xlu0 %v10535_v26, %s7171_s19  ;;  %v10543_v2 = vpack.c.bf16 %v4768_v34, %v4767_v36  ;;  %v4791_v10 = vrot.slane %v4767_v36, 4  ;;  %v4797_v51 = vrot.slane %v4768_v34, 4 }
 0x38f   : > { %v4815_v16 = vsel %vm2634_vm3, %v4779_v11, %v4785_v32  ;;  %v10547_v37 = vpack.c.bf16 %v4767_v36, %v4766_v1  ;;  %v10549_v18 = vpack.c.bf16 %v4765_v58, %v4768_v34  ;;  %v4878_v58 = vpop.permute.xlu1 %4877  ;;  %v4519_v46 = vmul.f32 %v10386_v39, %v4407_v38  ;;  %v11215_v38 = vld [vmem:[#allocation43_spill] sm:$0xff] }
 0x390   : > { %v4809_v17 = vsel %vm2634_vm3, %v4785_v32, %v4791_v10  ;;  %v4803_v20 = vsel %vm2634_vm3, %v4791_v10, %v4797_v51  ;;  %v4821_v44 = vsel %vm2634_vm3, %v4797_v51, %v4779_v11  ;;  %v10586_v14 = vsel %vm3325_vm4, %v10205_v29, %v4878_v58 }
 0x391   : > { %v10553_v9 = vpack.c.bf16 %v4809_v17, %v4815_v16  ;;  %v10561_v61 = vpack.c.bf16 %v4821_v44, %v4803_v20  ;;  %v4520_v28 = vmul.f32 %v10386_v39, %v4410_v63  ;;  %v4573_v49 = vadd.f32 %v10475_v41, %v4519_v46 }
 0x392   : > { %4921 = vrot.lane.b32.xlu0 %v10543_v2, %s7171_s19  ;;  %v4912_v40 = vpop.permute.xlu0 %4911 }
 0x393   : > { %v4153_v48 = vpop.f32.mrb[84].mxu1  ;;  %v5025_v59 = vsel %vm3325_vm4, %v10219_v0, %v4912_v40  ;;  %v4574_v45 = vadd.f32 %v10475_v41, %v4520_v28  ;;  %v4621_v29 = vmax.f32 %v4573_v49, 0.0 }
 0x394   : > { %v4415_v12 = vadd.f32 %v11212_v47, %v4153_v48  ;;  %v4155_v42 = vpop.f32.mrb[85].mxu1  ;;  %5470 = vmatprep.mubr.bf16.mxu1 %v5025_v59 }
 0x395   : > { %v4156_v1 = vpop.f32.mrb[86].mxu1  ;;  %5471 = vmatmul.mubr.bf16.gmra.mrb[128].mxu1 %v10568_v60  ;;  %v4622_v40 = vmax.f32 %v4574_v45, 0.0  ;;  %v4689_v47 = vsel %vm3325_vm4, %v4621_v29, -inf }
 0x396   : > { %v4418_v31 = vadd.f32 %v11213_v50, %v4156_v1  ;;  %v4158_v4 = vpop.f32.mrb[87].mxu1  ;;  %4943 = vrot.lane.b32.xlu0 %v10219_v0, %s7171_s19  ;;  %v4914_v34 = vpop.permute.xlu0 %4913  ;;  %v4521_v20 = vmul.f32 %v10386_v39, %v4415_v12 }
 0x397   : > { %v4880_v27 = vpop.permute.xlu1 %4879  ;;  %v5029_v62 = vsel %vm3325_vm4, %v10201_v6, %v4914_v34  ;;  %v11216_v34 = vld [vmem:[#allocation35_spill] sm:$0xff] }
 0x398   : > { %5478 = vmatprep.mubr.bf16.mxu1 %v5029_v62  ;;  %v10578_v36 = vsel %vm3325_vm4, %v10321_v52, %v4880_v27  ;;  %v11214_v52 = vld [vmem:[#allocation11_spill] sm:$0xff]  ;;  %v4522_v58 = vmul.f32 %v10386_v39, %v4418_v31  ;;  %v4575_v1 = vadd.f32 %v10475_v41, %v4521_v20  ;;  %v4692_v62 = vsel %vm3325_vm4, %v4622_v40, -inf }
 0x399   : > { %5572 = vmatprep.mubr.bf16.mxu0 %v10578_v36 }
 0x39a   : > { %4887 = vrot.lane.b32.xlu0 %v10553_v9, %s7171_s19  ;;  %v4576_v31 = vadd.f32 %v10475_v41, %v4522_v58 }
 0x39c   : > { %v4624_v29 = vmax.f32 %v4576_v31, 0.0 }
 0x39d   : > { %5479 = vmatmul.mubr.bf16.gmra.mrb[132].mxu1 %v10586_v14 }
 0x39f   : > { %v4161_v11 = vpop.f32.mrb[88].mxu1 }
 0x3a0   : > { %v4423_v32 = vadd.f32 %v11214_v52, %v4161_v11  ;;  %v4163_v24 = vpop.f32.mrb[89].mxu1  ;;  %v11217_v52 = vld [vmem:[#allocation45_spill] sm:$0xff] }
 0x3a1   : > { %v4164_v10 = vpop.f32.mrb[90].mxu1 }
 0x3a2   : > { %v4523_v16 = vmul.f32 %v10386_v39, %v4423_v32  ;;  %v4426_v51 = vadd.f32 %v11215_v38, %v4164_v10  ;;  %v4166_v17 = vpop.f32.mrb[91].mxu1  ;;  %v4623_v10 = vmax.f32 %v4575_v1, 0.0 }
 0x3a4   : > { %v4577_v63 = vadd.f32 %v10475_v41, %v4523_v16  ;;  %v4524_v44 = vmul.f32 %v10386_v39, %v4426_v51  ;;  %v4695_v40 = vsel %vm3325_vm4, %v4623_v10, -inf }
 0x3a6   : > { %v4625_v48 = vmax.f32 %v4577_v63, 0.0  ;;  %v4578_v59 = vadd.f32 %v10475_v41, %v4524_v44 }
 0x3a7   : > { %v4169_v42 = vpop.f32.mrb[92].mxu1 }
 0x3a8   : > { %v4690_v50 = vsel %vm3325_vm4, %v4625_v48, -inf  ;;  %v4626_v4 = vmax.f32 %v4578_v59, 0.0  ;;  %v4431_v12 = vadd.f32 %v11216_v34, %v4169_v42  ;;  %v4171_v27 = vpop.f32.mrb[93].mxu1  ;;  %v4698_v42 = vsel %vm3325_vm4, %v4624_v29, -inf }
 0x3a9   : > { %v4691_v46 = vmax.f32 %v4689_v47, %v4690_v50  ;;  %v4172_v28 = vpop.f32.mrb[94].mxu1 }
 0x3aa   : > { %v4693_v49 = vsel %vm3325_vm4, %v4626_v4, -inf  ;;  %v4525_v11 = vmul.f32 %v10386_v39, %v4431_v12  ;;  %v4434_v32 = vadd.f32 %v11217_v52, %v4172_v28  ;;  %v4174_v24 = vpop.f32.mrb[95].mxu1  ;;  %v7092_v12 = vld [vmem:[%s10955_s7 + $0x118] sm:$0xff]  }
 0x3ab   : > { %v4694_v45 = vmax.f32 %v4692_v62, %v4693_v49  ;;  %v4706_v51 = vrot.slane %v4691_v46, 2  ;;  %6876 = vmatprep.subr.bf16.mxu1 %v7092_v12 }
 0x3ac   : > { %v4579_v16 = vadd.f32 %v10475_v41, %v4525_v11  ;;  %v4526_v38 = vmul.f32 %v10386_v39, %v4434_v32  ;;  %6877 = vmatpush3.bf16.msra.mxu1 %v7092_v12 }
 0x3ad   : > { %v4712_v17 = vrot.slane %v4694_v45, 2 }
 0x3ae   : > { %v4627_v20 = vmax.f32 %v4579_v16, 0.0  ;;  %v4580_v63 = vadd.f32 %v10475_v41, %v4526_v38 }
 0x3af   : > { %v4742_v44 = vsel %vm2513_vm2, %v4706_v51, %v4712_v17 }
 0x3b0   : > { %v4696_v58 = vsel %vm3325_vm4, %v4627_v20, -inf  ;;  %v4628_v48 = vmax.f32 %v4580_v63, 0.0  ;;  %v4769_v59 = vmax.f32 %v4691_v46, %v4742_v44 }
 0x3b1   : > { %v4697_v47 = vmax.f32 %v4695_v40, %v4696_v58 }
 0x3b2   : > { %v4699_v39 = vsel %vm3325_vm4, %v4628_v48, -inf  ;;  %v4780_v46 = vrot.slane %v4769_v59, 4 }
 0x3b3   : > { %v4718_v1 = vrot.slane %v4697_v47, 2  ;;  %v4700_v50 = vmax.f32 %v4698_v42, %v4699_v39 }
 0x3b5   : > { %v4724_v4 = vrot.slane %v4700_v50, 2  ;;  %v4736_v41 = vsel %vm2513_vm2, %v4712_v17, %v4718_v1 }
 0x3b6   : > { %v4770_v34 = vmax.f32 %v4694_v45, %v4736_v41 }
 0x3b7   : > { %v4748_v27 = vsel %vm2513_vm2, %v4724_v4, %v4706_v51  ;;  %v4730_v62 = vsel %vm2513_vm2, %v4718_v1, %v4724_v4 }
 0x3b8   : > { %v4772_v28 = vmax.f32 %v4700_v50, %v4748_v27  ;;  %v10627_v31 = vpack.c.bf16 %v4770_v34, %v4769_v59  ;;  %v4771_v49 = vmax.f32 %v4697_v47, %v4730_v62  ;;  %v4786_v11 = vrot.slane %v4770_v34, 4  ;;  %v4882_v50 = vpop.permute.xlu1 %4881 }
 0x3ba   : > { %4923 = vrot.lane.b32.xlu1 %v10627_v31, %s7171_s19  ;;  %v10631_v52 = vpack.c.bf16 %v4772_v28, %v4771_v49  ;;  %v4792_v32 = vrot.slane %v4771_v49, 4  ;;  %v4816_v24 = vsel %vm2634_vm3, %v4780_v46, %v4786_v11  ;;  %v4798_v45 = vrot.slane %v4772_v28, 4 }
 0x3bb   : > { %v10635_v10 = vpack.c.bf16 %v4771_v49, %v4770_v34  ;;  %v10637_v16 = vpack.c.bf16 %v4769_v59, %v4772_v28 }
 0x3bc   : > { %4925 = vrot.lane.b32.xlu0 %v10631_v52, %s7171_s19  ;;  %v4810_v38 = vsel %vm2634_vm3, %v4786_v11, %v4792_v32  ;;  %v4804_v51 = vsel %vm2634_vm3, %v4792_v32, %v4798_v45  ;;  %v4822_v17 = vsel %vm2634_vm3, %v4798_v45, %v4780_v46 }
 0x3bd   : > { %v10647_v29 = vpack.c.bf16 %v4810_v38, %v4816_v24  ;;  %v10649_v20 = vpack.c.bf16 %v4822_v17, %v4804_v51 }
 0x3be   : > { %4945 = vrot.lane.b32.xlu1 %v10201_v6, %s7171_s19 }
 0x3c0   : > { %4947 = vrot.lane.b32.xlu0 %v10330_v7, %s7171_s19 }
 0x3c2   : > { %4889 = vrot.lane.b32.xlu1 %v10561_v61, %s7171_s19 }
 0x3c4   : > { %4891 = vrot.lane.b32.xlu0 %v10647_v29, %s7171_s19 }
 0x3c6   : > { %4927 = vrot.lane.b32.xlu1 %v11203_v19, %s7171_s19 }
 0x3c7   : > { %v4177_v63 = vpop.f32.mrb[96].mxu1 }
 0x3c8   : > { %v4178_v44 = vpop.f32.mrb[97].mxu1  ;;  %4929 = vrot.lane.b32.xlu0 %v11206_v54, %s7171_s19 }
 0x3c9   : > { %v4179_v40 = vpop.f32.mrb[98].mxu1 }
 0x3ca   : > { %v4180_v58 = vpop.f32.mrb[99].mxu1  ;;  %4949 = vrot.lane.b32.xlu1 %v10332_v23, %s7171_s19 }
 0x3cc   : > { %4951 = vrot.lane.b32.xlu0 %v10419_v22, %s7171_s19  ;;  %v4916_v48 = vpop.permute.xlu0 %4915 }
 0x3cd   : > { %v5033_v59 = vsel %vm3325_vm4, %v10330_v7, %v4916_v48 }
 0x3ce   : > { %4893 = vrot.lane.b32.xlu1 %v10649_v20, %s7171_s19  ;;  %5485 = vmatprep.mubr.bf16.mxu1 %v5033_v59 }
 0x3cf   : > { %v4183_v19 = vpop.f32.mrb[100].mxu1  ;;  %5486 = vmatmul.mubr.bf16.gmra.mrb[136].mxu1 %v10578_v36  ;;  %v4989_v36 = vsel %vm3325_vm4, %v10326_v8, %v4882_v50 }
 0x3d0   : > { %v4184_v54 = vpop.f32.mrb[101].mxu1  ;;  %4955 = vrot.lane.b32.xlu0 %v10547_v37, %s7171_s19  ;;  %v4918_v47 = vpop.permute.xlu0 %4917 }
 0x3d1   : > { %v4185_v42 = vpop.f32.mrb[102].mxu1  ;;  %v5037_v39 = vsel %vm3325_vm4, %v10332_v23, %v4918_v47  ;;  %v4884_v17 = vpop.permute.xlu1 %4883 }
 0x3d2   : > { %v4186_v1 = vpop.f32.mrb[103].mxu1  ;;  %4953 = vrot.lane.b32.xlu1 %v10421_v15, %s7171_s19  ;;  %5493 = vmatprep.mubr.bf16.mxu1 %v5037_v39  ;;  %v4993_v40 = vsel %vm3325_vm4, %v10411_v33, %v4884_v17 }
 0x3d4   : > { %4959 = vrot.lane.b32.xlu0 %v10635_v10, %s7171_s19 }
 0x3d5   : > { %v4886_v59 = vpop.permute.xlu1 %4885 }
 0x3d6   : > { %4957 = vrot.lane.b32.xlu1 %v10549_v18, %s7171_s19  ;;  %v4997_v47 = vsel %vm3325_vm4, %v10415_v57, %v4886_v59 }
 0x3d7   : > { %v4189_v4 = vpop.f32.mrb[104].mxu1  ;;  %5494 = vmatmul.mubr.bf16.gmra.mrb[140].mxu1 %v4989_v36 }
 0x3d8   : > { %v4190_v41 = vpop.f32.mrb[105].mxu1  ;;  %4963 = vrot.lane.b32.xlu0 %v9996_v21, %s7171_s19 }
 0x3d9   : > { %v4191_v34 = vpop.f32.mrb[106].mxu1 }
 0x3da   : > { %v4192_v12 = vpop.f32.mrb[107].mxu1  ;;  %4961 = vrot.lane.b32.xlu1 %v10637_v16, %s7171_s19 }
 0x3de   : > { %4965 = vrot.lane.b32.xlu1 %v11204_v13, %s7171_s19  ;;  %s10906_s19 = scalar_lea.hbm %s10964_s16, %s6370_s20 }
 0x3df   : > { %v4195_v27 = vpop.f32.mrb[108].mxu1 }
 0x3e0   : > { %v4196_v62 = vpop.f32.mrb[109].mxu1 }
 0x3e1   : > { %v4197_v46 = vpop.f32.mrb[110].mxu1 }
 0x3e2   : > { %v4198_v28 = vpop.f32.mrb[111].mxu1 }
 0x3e7   : > { %v4201_v49 = vpop.f32.mrb[112].mxu1 }
 0x3e8   : > { %v4202_v8 = vpop.f32.mrb[113].mxu1 }
 0x3e9   : > { %v4203_v11 = vpop.f32.mrb[114].mxu1 }
 0x3ea   : > { %v4204_v32 = vpop.f32.mrb[115].mxu1 }
 0x3ef   : > { %v4207_v24 = vpop.f32.mrb[116].mxu1 }
 0x3f0   : > { %v4208_v45 = vpop.f32.mrb[117].mxu1 }
 0x3f1   : > { %v4209_v38 = vpop.f32.mrb[118].mxu1 }
 0x3f2   : > { %v4210_v51 = vpop.f32.mrb[119].mxu1 }
 0x400   : > { %v4920_v63 = vpop.permute.xlu0 %4919 }
 0x401   : > { %v5041_v44 = vsel %vm3325_vm4, %v10419_v22, %v4920_v63 }
 0x402   : > { %5500 = vmatprep.mubr.bf16.mxu1 %v5041_v44 }
 0x403   : > { %5501 = vmatmul.mubr.bf16.gmra.mrb[144].mxu1 %v4993_v40 }
 0x404   : > { %v4922_v58 = vpop.permute.xlu0 %4921 }
 0x405   : > { %v5045_v48 = vsel %vm3325_vm4, %v10421_v15, %v4922_v58 }
 0x406   : > { %5508 = vmatprep.mubr.bf16.mxu1 %v5045_v48 }
 0x408   : > { %v4944_v19 = vpop.permute.xlu0 %4943 }
 0x409   : > { %v5065_v54 = vsel %vm3325_vm4, %v10229_v30, %v4944_v19 }
 0x40a   : > { %5573 = vmatmul.mubr.bf16.vlgmr.msra.gmra.mrb[188].mxu0 %v5065_v54 }
 0x40b   : > { %5509 = vmatmul.mubr.bf16.gmra.mrb[148].mxu1 %v4997_v47  ;;  %5580 = vmatprep.mubr.bf16.mxu0 %v4989_v36 }
 0x40c   : > { %v4888_v42 = vpop.permute.xlu0 %4887 }
 0x40d   : > { %v5001_v50 = vsel %vm3325_vm4, %v10535_v26, %v4888_v42 }
 0x42c   : > { %v4924_v39 = vpop.permute.xlu1 %4923 }
 0x42d   : > { %v5049_v33 = vsel %vm3325_vm4, %v10547_v37, %v4924_v39 }
 0x42e   : > { %v4926_v1 = vpop.permute.xlu0 %4925  ;;  %5515 = vmatprep.mubr.bf16.mxu1 %v5049_v33 }
 0x42f   : > { %5516 = vmatmul.mubr.bf16.gmra.mrb[152].mxu1 %v5001_v50  ;;  %v5053_v30 = vsel %vm3325_vm4, %v10549_v18, %v4926_v1 }
 0x430   : > { %5521 = vmatprep.mubr.bf16.mxu1 %v5053_v30  ;;  %v4946_v4 = vpop.permute.xlu1 %4945 }
 0x431   : > { %v5069_v57 = vsel %vm3325_vm4, %v10231_v3, %v4946_v4 }
 0x432   : > { %v4948_v36 = vpop.permute.xlu0 %4947  ;;  %5581 = vmatmul.mubr.bf16.gmra.mrb[192].mxu0 %v5069_v57 }
 0x433   : > { %5587 = vmatprep.mubr.bf16.mxu0 %v4993_v40  ;;  %v5073_v62 = vsel %vm3325_vm4, %v10336_v53, %v4948_v36 }
 0x434   : > { %v4890_v41 = vpop.permute.xlu1 %4889 }
 0x435   : > { %v5005_v34 = vsel %vm3325_vm4, %v10543_v2, %v4890_v41 }
 0x436   : > { %v4892_v12 = vpop.permute.xlu0 %4891 }
 0x437   : > { %5522 = vmatmul.mubr.bf16.gmra.mrb[156].mxu1 %v5005_v34  ;;  %v5009_v28 = vsel %vm3325_vm4, %v10627_v31, %v4892_v12  ;;  %v7174_v12 = vmov 0.0  }
 0x438   : > { %v4928_v27 = vpop.permute.xlu1 %4927  ;;  %6902 = vmatprep.subr.bf16.mxu1 %v7174_v12 }
 0x439   : > { %v5057_v26 = vsel %vm3325_vm4, %v10635_v10, %v4928_v27  ;;  %v7094_v27 = vld [vmem:[%s10958_s10 + $0x8] sm:$0xff]  }
 0x43a   : > { %5527 = vmatprep.mubr.bf16.mxu1 %v5057_v26  ;;  %5588 = vmatmul.mubr.bf16.gmra.mrb[196].mxu0 %v5073_v62  ;;  %v4930_v3 = vpop.permute.xlu0 %4929  ;;  %v7095_v26 = vld [vmem:[%s10958_s10 + $0x10] sm:$0xff]  }
 0x43b   : > { %5595 = vmatprep.mubr.bf16.mxu0 %v4997_v47  ;;  %v5061_v2 = vsel %vm3325_vm4, %v10637_v16, %v4930_v3  ;;  %v7096_v3 = vld [vmem:[%s10958_s10 + $0x18] sm:$0xff]  }
 0x43c   : > { %v4950_v46 = vpop.permute.xlu1 %4949 }
 0x43d   : > { %v5077_v8 = vsel %vm3325_vm4, %v10344_v56, %v4950_v46 }
 0x43e   : > { %v4952_v31 = vpop.permute.xlu0 %4951 }
 0x43f   : > { %5528 = vmatmul.mubr.bf16.gmra.mrb[160].mxu1 %v5009_v28  ;;  %v6488_v49 = vpop.f32.mrb[120].mxu1  ;;  %v5081_v56 = vsel %vm3325_vm4, %v10430_v55, %v4952_v31 }
 0x440   : > { %5533 = vmatprep.mubr.bf16.mxu1 %v5061_v2  ;;  %v6489_v11 = vpop.f32.mrb[121].mxu1  ;;  %v4894_v24 = vpop.permute.xlu1 %4893 }
 0x441   : > { %v10720_v53 = vadd.f32 %v6489_v11, %v6488_v49  ;;  %v6491_v32 = vpop.f32.mrb[122].mxu1  ;;  %v5013_v51 = vsel %vm3325_vm4, %v10631_v52, %v4894_v24 }
 0x442   : > { %5596 = vmatmul.mubr.bf16.gmra.mrb[200].mxu0 %v5077_v8  ;;  %v6492_v45 = vpop.f32.mrb[123].mxu1  ;;  %v4956_v55 = vpop.permute.xlu0 %4955 }
 0x443   : > { %5602 = vmatprep.mubr.bf16.mxu0 %v5001_v50  ;;  %v10722_v38 = vadd.f32 %v6492_v45, %v6491_v32  ;;  %v5089_v52 = vsel %vm3325_vm4, %v10553_v9, %v4956_v55 }
 0x444   : > { %v4954_v48 = vpop.permute.xlu1 %4953 }
 0x447   : > { %5534 = vmatmul.mubr.bf16.gmra.mrb[164].mxu1 %v5013_v51  ;;  %v6494_v17 = vpop.f32.mrb[124].mxu1 }
 0x448   : > { %6878 = vmatprep.mubr.msk.bf16.mxu1 %vm3325_vm4, %v10330_v7  ;;  %v6495_v63 = vpop.f32.mrb[125].mxu1  ;;  %v5085_v7 = vsel %vm3325_vm4, %v10432_v5, %v4954_v48 }
 0x449   : > { %v10730_v44 = vadd.f32 %v6495_v63, %v6494_v17  ;;  %v6497_v40 = vpop.f32.mrb[126].mxu1 }
 0x44a   : > { %5603 = vmatmul.mubr.bf16.gmra.mrb[204].mxu0 %v5081_v56  ;;  %v6498_v58 = vpop.f32.mrb[127].mxu1 }
 0x44b   : > { %5610 = vmatprep.mubr.bf16.mxu0 %v5005_v34 }
 0x44f   : > { %6879 = vmatmul.mubr.msk.bf16.vlgmr.msra.gmra.mrb[168].mxu1 %vm3325_vm4, %v10332_v23  ;;  %v4958_v23 = vpop.permute.xlu1 %4957 }
 0x450   : > { %6882 = vmatprep.mubr.msk.bf16.mxu1 %vm3325_vm4, %v10419_v22  ;;  %v5093_v22 = vsel %vm3325_vm4, %v10561_v61, %v4958_v23 }
 0x452   : > { %5611 = vmatmul.mubr.bf16.gmra.mrb[208].mxu0 %v5085_v7 }
 0x453   : > { %5617 = vmatprep.mubr.bf16.mxu0 %v5009_v28  ;;  %v4962_v59 = vpop.permute.xlu1 %4961 }
 0x457   : > { %6883 = vmatmul.mubr.msk.bf16.gmra.mrb[172].mxu1 %vm3325_vm4, %v10421_v15  ;;  %v4960_v15 = vpop.permute.xlu0 %4959 }
 0x458   : > { %6886 = vmatprep.mubr.msk.bf16.mxu1 %vm3325_vm4, %v10547_v37  ;;  %v5097_v37 = vsel %vm3325_vm4, %v10647_v29, %v4960_v15 }
 0x45a   : > { %5618 = vmatmul.mubr.bf16.gmra.mrb[212].mxu0 %v5089_v52 }
 0x45b   : > { %5625 = vmatprep.mubr.bf16.mxu0 %v5013_v51  ;;  %v4964_v47 = vpop.permute.xlu0 %4963 }
 0x45f   : > { %6887 = vmatmul.mubr.msk.bf16.gmra.mrb[176].mxu1 %vm3325_vm4, %v10549_v18 }
 0x460   : > { %6890 = vmatprep.mubr.msk.bf16.mxu1 %vm3325_vm4, %v10635_v10 }
 0x462   : > { %5626 = vmatmul.mubr.bf16.gmra.mrb[216].mxu0 %v5093_v22 }
 0x463   : > { %5632 = vmatprep.mubr.bf16.mxu0 %v10456_v43 }
 0x467   : > { %6891 = vmatmul.mubr.msk.bf16.gmra.mrb[180].mxu1 %vm3325_vm4, %v10637_v16  ;;  %v5101_v16 = vsel %vm3325_vm4, %v10649_v20, %v4962_v59  ;;  %v11219_v20 = vld [vmem:[#allocation27_spill] sm:$0xff] }
 0x468   : > { %6894 = vmatprep.mubr.msk.bf16.mxu1 %vm3325_vm4, %v9996_v21  ;;  %v6500_v5 = vpop.f32.mrb[128].mxu1 }
 0x469   : > { %v6501_v18 = vpop.f32.mrb[129].mxu1 }
 0x46a   : > { %5633 = vmatmul.mubr.bf16.gmra.mrb[220].mxu0 %v5097_v37  ;;  %v10757_v9 = vadd.f32 %v6501_v18, %v6500_v5  ;;  %v6503_v10 = vpop.f32.mrb[130].mxu1 }
 0x46b   : > { %5638 = vmatprep.mubr.bf16.mxu0 %v10484_v35  ;;  %v6504_v61 = vpop.f32.mrb[131].mxu1 }
 0x46c   : > { %v10760_v43 = vadd.f32 %v6504_v61, %v6503_v10 }
 0x46f   : > { %6895 = vmatmul.mubr.msk.bf16.gmra.mrb[184].mxu1 %vm3325_vm4, %v11204_v13  ;;  %v11218_v13 = vld [vmem:[#allocation34_spill] sm:$0xff] }
 0x470   : > { %6898 = vmatprep.mubr.msk.bf16.mxu1 %vm3325_vm4, %v10219_v0  ;;  %v6506_v21 = vpop.f32.mrb[132].mxu1  ;;  %v5105_v42 = vsel %vm3325_vm4, %v11218_v13, %v4964_v47  ;;  %v4966_v0 = vpop.permute.xlu1 %4965 }
 0x471   : > { %v6507_v29 = vpop.f32.mrb[133].mxu1  ;;  %v5109_v39 = vsel %vm3325_vm4, %v11219_v20, %v4966_v0 }
 0x472   : > { %5639 = vmatmul.mubr.bf16.gmra.mrb[224].mxu0 %v5101_v16  ;;  %v10768_v19 = vadd.f32 %v6507_v29, %v6506_v21  ;;  %v6509_v54 = vpop.f32.mrb[134].mxu1 }
 0x473   : > { %5644 = vmatprep.mubr.bf16.mxu0 %v10568_v60  ;;  %v6510_v35 = vpop.f32.mrb[135].mxu1 }
 0x477   : > { %6899 = vmatmul.mubr.msk.bf16.gmra.mrb[188].mxu1 %vm3325_vm4, %v10201_v6 }
 0x478   : > { %6910 = vmatprep.mubr.msk.bf16.mxu1 %vm7175_vm6, %v7174_v12 }
 0x47a   : > { %5645 = vmatmul.mubr.bf16.gmra.mrb[228].mxu0 %v5105_v42 }
 0x47b   : > { %5650 = vmatprep.mubr.bf16.mxu0 %v10586_v14  ;;  %v7093_v14 = vld [vmem:[%s10958_s10] sm:$0xff]  }
 0x47c   : > { %6903 = vmatpush3.bf16.msra.mxu1 %v7093_v14 }
 0x47d   : > { %6904 = vmatprep.subr.bf16.mxu1 %v7174_v12 }
 0x480   : > { %6905 = vmatpush3.bf16.msra.mxu1 %v7094_v27 }
 0x481   : > { %6906 = vmatprep.subr.bf16.mxu1 %v7174_v12 }
 0x482   : > { %5651 = vmatmul.mubr.bf16.gmra.mrb[232].mxu0 %v5109_v39 }
 0x484   : > { %6907 = vmatpush3.bf16.msra.mxu1 %v7095_v26 }
 0x485   : > { %6908 = vmatprep.subr.bf16.mxu1 %v7174_v12 }
 0x488   : > { %6909 = vmatpush3.bf16.msra.mxu1 %v7096_v3 }
 0x489   : > { %6914 = vmatprep.subr.bf16.mxu1 %v7174_v12 }
 0x4a2   : > { %v6512_v33 = vpop.f32.mrb[136].mxu1 }
 0x4a3   : > { %v6513_v1 = vpop.f32.mrb[137].mxu1 }
 0x4a4   : > { %v10778_v50 = vadd.f32 %v6513_v1, %v6512_v33  ;;  %v6515_v60 = vpop.f32.mrb[138].mxu1 }
 0x4a5   : > { %v6516_v30 = vpop.f32.mrb[139].mxu1 }
 0x4a6   : > { %v10780_v4 = vadd.f32 %v6516_v30, %v6515_v60 }
 0x4aa   : > { %v6518_v6 = vpop.f32.mrb[140].mxu1 }
 0x4ab   : > { %v6519_v57 = vpop.f32.mrb[141].mxu1 }
 0x4ac   : > { %v10782_v36 = vadd.f32 %v6519_v57, %v6518_v6  ;;  %v6521_v41 = vpop.f32.mrb[142].mxu1 }
 0x4ad   : > { %v6522_v34 = vpop.f32.mrb[143].mxu1 }
 0x4d6   : > { %v6524_v62 = vpop.f32.mrb[144].mxu1 }
 0x4d7   : > { %v6525_v46 = vpop.f32.mrb[145].mxu1 }
 0x4d8   : > { %v10802_v28 = vadd.f32 %v6525_v46, %v6524_v62  ;;  %v6527_v2 = vpop.f32.mrb[146].mxu1 }
 0x4d9   : > { %v6528_v49 = vpop.f32.mrb[147].mxu1 }
 0x4da   : > { %v10804_v8 = vadd.f32 %v6528_v49, %v6527_v2 }
 0x4dd   : > { %v6576_v11 = vpop.f32.mrb[188].mxu0 }
 0x4de   : > { %v6530_v32 = vpop.f32.mrb[148].mxu1  ;;  %v6577_v24 = vpop.f32.mrb[189].mxu0 }
 0x4df   : > { %v6578_v45 = vadd.f32 %v6577_v24, %v6576_v11  ;;  %v6531_v31 = vpop.f32.mrb[149].mxu1  ;;  %v6579_v51 = vpop.f32.mrb[190].mxu0 }
 0x4e0   : > { %v10807_v17 = vadd.f32 %v6531_v31, %v6530_v32  ;;  %v6533_v56 = vpop.f32.mrb[150].mxu1  ;;  %v6580_v63 = vpop.f32.mrb[191].mxu0  ;;  %v10819_v32 = vld [vmem:[%s10956_s8] ss:$0 sm:$0xff] }
 0x4e1   : > { %v6581_v40 = vadd.f32 %v6580_v63, %v6579_v51  ;;  %v6534_v58 = vpop.f32.mrb[151].mxu1  ;;  %v5575_v48 = vadd.f32 %v6578_v45, %v10720_v53 }
 0x4e3   : > { %v5578_v7 = vadd.f32 %v6581_v40, %v10722_v38 }
 0x502   : > { %v6536_v55 = vpop.f32.mrb[152].mxu1 }
 0x503   : > { %v6537_v52 = vpop.f32.mrb[153].mxu1 }
 0x504   : > { %v6539_v23 = vpop.f32.mrb[154].mxu1 }
 0x505   : > { %v6540_v22 = vpop.f32.mrb[155].mxu1  ;;  %v6582_v15 = vpop.f32.mrb[192].mxu0 }
 0x506   : > { %v6583_v5 = vpop.f32.mrb[193].mxu0 }
 0x507   : > { %v6584_v37 = vadd.f32 %v6583_v5, %v6582_v15  ;;  %v6585_v18 = vpop.f32.mrb[194].mxu0 }
 0x508   : > { %v6586_v10 = vpop.f32.mrb[195].mxu0 }
 0x509   : > { %v5583_v61 = vadd.f32 %v6584_v37, %v10730_v44 }
 0x50a   : > { %v6542_v59 = vpop.f32.mrb[156].mxu1 }
 0x50b   : > { %v6543_v21 = vpop.f32.mrb[157].mxu1 }
 0x50c   : > { %v6545_v16 = vpop.f32.mrb[158].mxu1 }
 0x50d   : > { %v6546_v29 = vpop.f32.mrb[159].mxu1  ;;  %v6588_v54 = vpop.f32.mrb[196].mxu0 }
 0x50e   : > { %v6589_v35 = vpop.f32.mrb[197].mxu0 }
 0x50f   : > { %v6590_v53 = vadd.f32 %v6589_v35, %v6588_v54  ;;  %v6591_v47 = vpop.f32.mrb[198].mxu0 }
 0x510   : > { %v6592_v38 = vpop.f32.mrb[199].mxu0 }
 0x511   : > { %v6593_v13 = vadd.f32 %v6592_v38, %v6591_v47  ;;  %v5590_v42 = vadd.f32 %v6590_v53, %v10757_v9 }
 0x512   : > { %v6548_v0 = vpop.f32.mrb[160].mxu1 }
 0x513   : > { %v6549_v20 = vpop.f32.mrb[161].mxu1  ;;  %v5593_v39 = vadd.f32 %v6593_v13, %v10760_v43 }
 0x514   : > { %v6551_v33 = vpop.f32.mrb[162].mxu1 }
 0x515   : > { %v6552_v1 = vpop.f32.mrb[163].mxu1  ;;  %v6594_v60 = vpop.f32.mrb[200].mxu0 }
 0x516   : > { %v6595_v44 = vpop.f32.mrb[201].mxu0 }
 0x517   : > { %v6596_v30 = vadd.f32 %v6595_v44, %v6594_v60  ;;  %v6597_v6 = vpop.f32.mrb[202].mxu0 }
 0x518   : > { %v6598_v57 = vpop.f32.mrb[203].mxu0 }
 0x519   : > { %v5598_v41 = vadd.f32 %v6596_v30, %v10768_v19 }
 0x51a   : > { %v6554_v34 = vpop.f32.mrb[164].mxu1 }
 0x51b   : > { %v6555_v14 = vpop.f32.mrb[165].mxu1 }
 0x51c   : > { %v6557_v27 = vpop.f32.mrb[166].mxu1 }
 0x51d   : > { %v6558_v26 = vpop.f32.mrb[167].mxu1  ;;  %v6600_v62 = vpop.f32.mrb[204].mxu0 }
 0x51e   : > { %v6601_v3 = vpop.f32.mrb[205].mxu0 }
 0x51f   : > { %v6602_v9 = vadd.f32 %v6601_v3, %v6600_v62  ;;  %v6603_v46 = vpop.f32.mrb[206].mxu0 }
 0x520   : > { %v6604_v2 = vpop.f32.mrb[207].mxu0 }
 0x521   : > { %v6605_v49 = vadd.f32 %v6604_v2, %v6603_v46  ;;  %v5605_v43 = vadd.f32 %v6602_v9, %v10778_v50  ;;  %v10826_v50 = vld [vmem:[%s10957_s9] ss:$0 sm:$0xff] }
 0x522   : > { %v6880_v11 = vpop.f32.mrb[168].mxu1 }
 0x523   : > { %v5700_v24 = vadd.f32 %v6880_v11, %v5583_v61  ;;  %v5691_v19 = vpop.f32.mrb[169].mxu1  ;;  %v5608_v45 = vadd.f32 %v6605_v49, %v10780_v4 }
 0x524   : > { %v5692_v31 = vadd.f32 %v5691_v19, %v5575_v48  ;;  %v6881_v51 = vpop.f32.mrb[170].mxu1 }
 0x525   : > { %v6606_v56 = vpop.f32.mrb[208].mxu0  ;;  %v5694_v63 = vpop.f32.mrb[171].mxu1  ;;  %v5782_v40 = vmul.f32 %v10819_v32, %v5700_v24 }
 0x526   : > { %v5695_v58 = vadd.f32 %v5694_v63, %v5578_v7  ;;  %v6607_v55 = vpop.f32.mrb[209].mxu0  ;;  %v5780_v52 = vmul.f32 %v10819_v32, %v5692_v31 }
 0x527   : > { %v6608_v23 = vadd.f32 %v6607_v55, %v6606_v56  ;;  %v6609_v22 = vpop.f32.mrb[210].mxu0  ;;  %v5800_v48 = vadd.f32 %v10826_v50, %v5782_v40 }
 0x528   : > { %v6610_v15 = vpop.f32.mrb[211].mxu0  ;;  %v5781_v5 = vmul.f32 %v10819_v32, %v5695_v58  ;;  %v5798_v7 = vadd.f32 %v10826_v50, %v5780_v52 }
 0x529   : > { %v5613_v4 = vadd.f32 %v6608_v23, %v10782_v36  ;;  %v5812_v54 = vmax.f32 %v5800_v48, 0.0 }
 0x52a   : > { %v6884_v37 = vpop.f32.mrb[172].mxu1  ;;  %v5799_v35 = vadd.f32 %v10826_v50, %v5781_v5  ;;  %v5810_v38 = vmax.f32 %v5798_v7, 0.0 }
 0x52b   : > { %v5715_v18 = vadd.f32 %v6884_v37, %v5598_v41  ;;  %v5706_v10 = vpop.f32.mrb[173].mxu1  ;;  %v5828_v6 = vsel %vm3325_vm4, %v5812_v54, -inf }
 0x52c   : > { %v5707_v61 = vadd.f32 %v5706_v10, %v5590_v42  ;;  %v6885_v59 = vpop.f32.mrb[174].mxu1  ;;  %v5811_v57 = vmax.f32 %v5799_v35, 0.0  ;;  %v5822_v14 = vsel %vm3325_vm4, %v5810_v38, -inf }
 0x52d   : > { %v5785_v21 = vmul.f32 %v10819_v32, %v5715_v18  ;;  %v6612_v16 = vpop.f32.mrb[212].mxu0  ;;  %v5709_v29 = vpop.f32.mrb[175].mxu1 }
 0x52e   : > { %v5783_v36 = vmul.f32 %v10819_v32, %v5707_v61  ;;  %v5710_v53 = vadd.f32 %v5709_v29, %v5593_v39  ;;  %v6613_v47 = vpop.f32.mrb[213].mxu0  ;;  %v5825_v31 = vsel %vm3325_vm4, %v5811_v57, -inf }
 0x52f   : > { %v5803_v13 = vadd.f32 %v10826_v50, %v5785_v21  ;;  %v6614_v0 = vadd.f32 %v6613_v47, %v6612_v16  ;;  %v6615_v20 = vpop.f32.mrb[214].mxu0 }
 0x530   : > { %v5801_v33 = vadd.f32 %v10826_v50, %v5783_v36  ;;  %v5784_v42 = vmul.f32 %v10819_v32, %v5710_v53  ;;  %v6616_v1 = vpop.f32.mrb[215].mxu0 }
 0x531   : > { %v5815_v60 = vmax.f32 %v5803_v13, 0.0  ;;  %v6617_v44 = vadd.f32 %v6616_v1, %v6615_v20  ;;  %v5620_v30 = vadd.f32 %v6614_v0, %v10802_v28 }
 0x532   : > { %v5813_v41 = vmax.f32 %v5801_v33, 0.0  ;;  %v5802_v39 = vadd.f32 %v10826_v50, %v5784_v42  ;;  %v6888_v34 = vpop.f32.mrb[176].mxu1 }
 0x533   : > { %v5829_v27 = vsel %vm3325_vm4, %v5815_v60, -inf  ;;  %v5730_v26 = vadd.f32 %v6888_v34, %v5613_v4  ;;  %v5721_v62 = vpop.f32.mrb[177].mxu1  ;;  %v5623_v3 = vadd.f32 %v6617_v44, %v10804_v8 }
 0x534   : > { %v5830_v9 = vmax.f32 %v5828_v6, %v5829_v27  ;;  %v5823_v46 = vsel %vm3325_vm4, %v5813_v41, -inf  ;;  %v5814_v2 = vmax.f32 %v5802_v39, 0.0  ;;  %v5722_v28 = vadd.f32 %v5721_v62, %v5605_v43  ;;  %v6889_v49 = vpop.f32.mrb[178].mxu1 }
 0x535   : > { %v5824_v11 = vmax.f32 %v5822_v14, %v5823_v46  ;;  %v6618_v24 = vpop.f32.mrb[216].mxu0  ;;  %v5724_v19 = vpop.f32.mrb[179].mxu1  ;;  %v5788_v58 = vmul.f32 %v10819_v32, %v5730_v26 }
 0x536   : > { %v5826_v51 = vsel %vm3325_vm4, %v5814_v2, -inf  ;;  %v5725_v56 = vadd.f32 %v5724_v19, %v5608_v45  ;;  %v6619_v63 = vpop.f32.mrb[217].mxu0  ;;  %v5844_v52 = vrot.slane %v5830_v9, 4  ;;  %v5786_v43 = vmul.f32 %v10819_v32, %v5722_v28 }
 0x537   : > { %v5827_v40 = vmax.f32 %v5825_v31, %v5826_v51  ;;  %v6620_v55 = vadd.f32 %v6619_v63, %v6618_v24  ;;  %v6621_v8 = vpop.f32.mrb[218].mxu0  ;;  %v5840_v22 = vrot.slane %v5824_v11, 4  ;;  %v5806_v7 = vadd.f32 %v10826_v50, %v5788_v58 }
 0x538   : > { %v6622_v23 = vpop.f32.mrb[219].mxu0  ;;  %v5787_v48 = vmul.f32 %v10819_v32, %v5725_v56  ;;  %v5804_v16 = vadd.f32 %v10826_v50, %v5786_v43 }
 0x539   : > { %v5842_v15 = vrot.slane %v5827_v40, 4  ;;  %v5628_v4 = vadd.f32 %v6620_v55, %v10807_v17  ;;  %v5818_v13 = vmax.f32 %v5806_v7, 0.0 }
 0x53a   : > { %v6892_v5 = vpop.f32.mrb[180].mxu1  ;;  %v5805_v53 = vadd.f32 %v10826_v50, %v5787_v48  ;;  %v5816_v60 = vmax.f32 %v5804_v16, 0.0  ;;  %v7098_v16 = vld [vmem:[%s10960_s12 + $0x8] sm:$0xff]  }
 0x53b   : > { %v5846_v45 = vsel %vm2634_vm3, %v5842_v15, %v5844_v52  ;;  %v5848_v37 = vsel %vm2634_vm3, %v5840_v22, %v5842_v15  ;;  %v5745_v18 = vadd.f32 %v6892_v5, %v5628_v4  ;;  %v5736_v10 = vpop.f32.mrb[181].mxu1  ;;  %v5837_v39 = vsel %vm3325_vm4, %v5818_v13, -inf }
 0x53c   : > { %v5850_v61 = vmax.f32 %v5824_v11, %v5848_v37  ;;  %v5851_v59 = vmax.f32 %v5827_v40, %v5846_v45  ;;  %v6893_v21 = vpop.f32.mrb[182].mxu1  ;;  %v5737_v29 = vadd.f32 %v5736_v10, %v5620_v30  ;;  %v5817_v6 = vmax.f32 %v5805_v53, 0.0 }
 0x53d   : > { %v5791_v17 = vmul.f32 %v10819_v32, %v5745_v18  ;;  %v6624_v54 = vpop.f32.mrb[220].mxu0  ;;  %v5739_v35 = vpop.f32.mrb[183].mxu1  ;;  %v7097_v18 = vld [vmem:[%s10960_s12] sm:$0xff]  }
 0x53e   : > { %v5854_v36 = vadd.f32 %v5851_v59, %v5850_v61  ;;  %v5740_v47 = vadd.f32 %v5739_v35, %v5623_v3  ;;  %v6625_v38 = vpop.f32.mrb[221].mxu0  ;;  %v5789_v20 = vmul.f32 %v10819_v32, %v5737_v29  ;;  %v5834_v28 = vsel %vm3325_vm4, %v5817_v6, -inf  ;;  %v6001_v6 = vld [vmem:[%s10963_s15] sm:$0x1] }
 0x53f   : > { %v5809_v0 = vadd.f32 %v10826_v50, %v5791_v17  ;;  %v6627_v33 = vpop.f32.mrb[222].mxu0  ;;  %v5867_v17 = vld [vmem:[%s10959_s11] sm:$0x1] }
 0x540   : > { %v5790_v42 = vmul.f32 %v10819_v32, %v5740_v47  ;;  %v6628_v1 = vpop.f32.mrb[223].mxu0  ;;  %v5807_v30 = vadd.f32 %v10826_v50, %v5789_v20  ;;  %v5831_v32 = vsel %vm3325_vm4, %v5816_v60, -inf  ;;  %v7099_v38 = vld [vmem:[%s10962_s14] sm:$0xff]  }
 0x541   : > { %v5821_v44 = vmax.f32 %v5809_v0, 0.0  ;;  %v5941_v0 = vld [vmem:[%s10961_s13] sm:$0x1] }
 0x542   : > { %v5808_v57 = vadd.f32 %v10826_v50, %v5790_v42  ;;  %v6896_v41 = vpop.f32.mrb[184].mxu1  ;;  %v5819_v14 = vmax.f32 %v5807_v30, 0.0 }
 0x543   : > { %v5838_v34 = vsel %vm3325_vm4, %v5821_v44, -inf  ;;  %v5751_v27 = vpop.f32.mrb[185].mxu1 }
 0x544   : > { %v5839_v26 = vmax.f32 %v5837_v39, %v5838_v34  ;;  %v5820_v62 = vmax.f32 %v5808_v57, 0.0  ;;  %v6897_v3 = vpop.f32.mrb[186].mxu1  ;;  %v5832_v9 = vsel %vm3325_vm4, %v5819_v14, -inf }
 0x545   : > { %v6630_v46 = vpop.f32.mrb[224].mxu0  ;;  %v5753_v2 = vpop.f32.mrb[187].mxu1  ;;  %v5833_v49 = vmax.f32 %v5831_v32, %v5832_v9 }
 0x546   : > { %v5835_v50 = vsel %vm3325_vm4, %v5820_v62, -inf  ;;  %v6631_v11 = vpop.f32.mrb[225].mxu0  ;;  %v5845_v51 = vrot.slane %v5839_v26, 4 }
 0x547   : > { %v5836_v24 = vmax.f32 %v5834_v28, %v5835_v50  ;;  %v6633_v19 = vpop.f32.mrb[226].mxu0  ;;  %v5841_v56 = vrot.slane %v5833_v49, 4 }
 0x548   : > { %v6634_v31 = vpop.f32.mrb[227].mxu0 }
 0x549   : > { %v5843_v63 = vrot.slane %v5836_v24, 4 }
 0x54a   : > { %v6900_v40 = vpop.f32.mrb[188].mxu1 }
 0x54b   : > { %v5847_v58 = vsel %vm2634_vm3, %v5843_v63, %v5845_v51  ;;  %v5849_v55 = vsel %vm2634_vm3, %v5841_v56, %v5843_v63  ;;  %v5763_v8 = vpop.f32.mrb[189].mxu1 }
 0x54c   : > { %v5852_v52 = vmax.f32 %v5833_v49, %v5849_v55  ;;  %v5853_v23 = vmax.f32 %v5836_v24, %v5847_v58  ;;  %v6901_v22 = vpop.f32.mrb[190].mxu1 }
 0x54d   : > { %v6636_v15 = vpop.f32.mrb[228].mxu0  ;;  %v5765_v43 = vpop.f32.mrb[191].mxu1 }
 0x54e   : > { %v5855_v4 = vadd.f32 %v5853_v23, %v5852_v52  ;;  %v6637_v48 = vpop.f32.mrb[229].mxu0 }
 0x54f   : > { %v6639_v5 = vpop.f32.mrb[230].mxu0 }
 0x550   : > { %v5856_v45 = vadd.f32 %v5855_v4, %v5854_v36  ;;  %v6640_v37 = vpop.f32.mrb[231].mxu0 }
 0x552   : > { %v5857_v7 = vmul.f32 0.25, %v5856_v45 }
 0x554   : > { %v5858_v10 = vpack.c.bf16 %v5857_v7, %v5857_v7 }
 0x555   : > { %v6642_v61 = vpop.f32.mrb[232].mxu0 }
 0x556   : > { %v6643_v25 = vpop.f32.mrb[233].mxu0  ;;  %6911 = vmatmul.mubr.msk.bf16.vlgmr.msra.gmra.mrb[192].mxu1 %vm3325_vm4, %v5858_v10 }
 0x557   : > { %v6645_v59 = vpop.f32.mrb[234].mxu0  ;;  %6915 = vmatpush3.bf16.msra.mxu1 %v7097_v18  ;;  %6918 = vmatprep.mubr.msk.bf16.mxu1 %vm7175_vm6, %v7174_v12 }
 0x558   : > { %v6646_v21 = vpop.f32.mrb[235].mxu0  ;;  %6916 = vmatprep.subr.bf16.mxu1 %v7174_v12 }
 0x55b   : > { %6917 = vmatpush3.bf16.msra.mxu1 %v7098_v16 }
 0x55c   : > { %6922 = vmatprep.subr.bf16.mxu1 %v7174_v12 }
 0x629   : > { %v5929_v29 = vpop.f32.mrb[192].mxu1 }
 0x62a   : > { %v5930_v54 = vadd.f32 %v5929_v29, %v5867_v17  ;;  %v6912_v35 = vpop.f32.mrb[193].mxu1 }
 0x62b   : > { %v5932_v36 = vpop.f32.mrb[194].mxu1 }
 0x62c   : > { %v5935_v53 = vmax.f32 %v5930_v54, 0.0  ;;  %v6913_v47 = vpop.f32.mrb[195].mxu1 }
 0x62e   : > { %v5936_v13 = vpack.c.bf16 %v5935_v53, %v5935_v53 }
 0x630   : > { %6919 = vmatmul.mubr.msk.bf16.vlgmr.msra.gmra.mrb[196].mxu1 %vm984_vm0, %v5936_v13 }
 0x631   : > { %6923 = vmatpush3.bf16.msra.mxu1 %v7099_v38  ;;  %6924 = vmatprep.mubr.msk.bf16.mxu1 %vm7175_vm6, %v7174_v12 }
 0x703   : > { %v5991_v20 = vpop.f32.mrb[196].mxu1 }
 0x704   : > { %v5992_v33 = vadd.f32 %v5991_v20, %v5941_v0  ;;  %v6920_v42 = vpop.f32.mrb[197].mxu1 }
 0x705   : > { %v5994_v1 = vpop.f32.mrb[198].mxu1 }
 0x706   : > { %v5997_v60 = vmax.f32 %v5992_v33, 0.0  ;;  %v6921_v44 = vpop.f32.mrb[199].mxu1 }
 0x708   : > { %v5998_v30 = vpack.c.bf16 %v5997_v60, %v5997_v60 }
 0x70a   : > { %6925 = vmatmul.mubr.msk.bf16.vlgmr.msra.gmra.mrb[200].mxu1 %vm6008_vm7, %v5998_v30 }
 0x7dd   : > { %v6046_v12 = vpop.f32.mrb[200].mxu1 }
 0x7de   : > { %v6047_v57 = vadd.f32 %v6046_v12, %v6001_v6  ;;  %v6926_v41 = vpop.f32.mrb[201].mxu1 }
 0x7df   : > { %v6049_v39 = vpop.f32.mrb[202].mxu1 }
 0x7e0   : > { %v6927_v34 = vpop.f32.mrb[203].mxu1  ;;  %6053 = vst.msk [vmem:[%s513_s17] sm:$0x1] %vm6052_vm8, %v6047_v57 }
 0x7e1   : > { %7119 = shalt.err (!%p7116_p3)
}
 0x7e2   : > { %s7120_s18 = scalar_lea.hbm %s10906_s19, 16  ;;  %s7124_s27 = scalar_lea.hbm %s10964_s16, 32 }
 0x7e3   : > { %p7121_p4 = scmp.ne.s32.totalorder %s10906_s19, %s7120_s18  ;;  %p7125_p9 = scmp.lt.u32.totalorder %s10906_s19, %s10964_s16 }
 0x7e4   : > { %p7126_p10 = scmp.lt.u32.totalorder %s7124_s27, %s7120_s18  ;;  %p7128_p12 = scmp.lt.u32.totalorder %s7120_s18, %s10906_s19 }
 0x7e5   : > { %p7122_p7 = pnand %p7121_p4, %p7300_p5 }
 0x7e6   : > { %p7127_p11 = por %p7126_p10, %p7125_p9 }
 0x7e7   : > { %p7123_p8 = pneg %p7122_p7 }
 0x7e8   : > { %p7129_p13 = por %p7128_p12, %p7127_p11 }
 0x7ea   : > { %p7130_p0 = pnand %p7129_p13, %p7123_p8 }
 0x7ec   : > { %7133 = shalt.err (!%p7130_p0)
}
 0x7ed   : > { %6928 = dma.vmem_to_hbm [thread:$0]  (%p7300_p5), %s10908_s29, 16, %s10906_s19, %s6055_s25  }
 0x7ee PF: > { %p6934_p1 = scmp.ge.s32.totalorder %s7168_s24, 2  ;;  %s6079_s23 = sand.u32 1, %s7156_s21  }
 0x7ef   : > { %s6080_s20 = scalar_lea.sflag [#allocation3], %s6079_s23 }
 0x7f0   : > { %p6931_p2 = pnand %p6934_p1, %p7304_p6 }
 0x7f2   : > { %7151 = dma.done.wait (!%p6931_p2), %s6080_s20, 16  }
 0x7f3   : > { %7153 = vsyncadd (!%p6931_p2), %s6080_s20, 4294967280  ;;  %s11221_s24 = sld [smem:[#allocation6_spill]]  ;;  %s11222_s18 = sld [smem:[#allocation5_spill]] }
 0x7f4   : > { %s11223_s23 = sld [smem:[#allocation7_spill]]  ;;  %s11224_s21 = smov %s7160_s22 }
 0x7f9   : > { %p26_p3 = scmp.ge.s32.totalorder %s11221_s24, 4   ;;  %s11225_s22 = smov %s11222_s18 }
 0x7fb   :  { %28 = sbr.rel (!%p26_p3) target bundleno = 5 (0x5), region = 119 }
 0x802   :  { %6084 = vsyncpa [#allocation3], 1 }
 0x803   :  { %6086 = vsyncpa [#allocation3 + $0x1], 1 }

</bundles_post_ra>
